<compile_context>
chip_gen: v7x
topology: tpu7x:2x2x1
jax: 0.10.0
libtpu: 0.0.40
codegen_flags: <defaults>
</compile_context>

<pallas_src>
import math

import jax
import jax.numpy as jnp
from jax.experimental import pallas as pl
from jax.experimental.pallas import tpu as pltpu

IN_DIM = 784
HID = 400
LATENT = 20


def _vae_kernel(
    x_ref, eps_ref,
    w1_ref, b1_ref, w2_ref, b2_ref, w3_ref, b3_ref,
    w4_ref, b4_ref, w5_ref, b5_ref, w6_ref, b6_ref,
    musig_ref, z_ref, logits_ref,
):
    f32 = jnp.float32
    bf16 = jnp.bfloat16

    # ----- encoder -----
    x = x_ref[...].astype(bf16)                                   # (TB, 784) bf16
    h = jnp.maximum(
        jnp.dot(x, w1_ref[...], preferred_element_type=f32) + b1_ref[...], 0.0)
    h = jnp.maximum(
        jnp.dot(h.astype(bf16), w2_ref[...], preferred_element_type=f32)
        + b2_ref[...], 0.0)
    # fused fc31 / fc32: one (TB, 40) matmul, then split
    ms = (jnp.dot(h.astype(bf16), w3_ref[...], preferred_element_type=f32)
          + b3_ref[...])                                          # (TB, 40)
    mu = ms[:, :LATENT]
    sigma = jnp.exp(ms[:, LATENT:])                               # torch: fc32(h).exp()
    musig_ref[...] = jnp.concatenate([mu, sigma], axis=-1)        # one fused store

    # ----- reparameterized sample: z = mu + sigma * eps, eps ~ N(0, 1) -----
    eps = eps_ref[...]                                            # (k, TB, L) f32
    z = mu[None, :, :] + sigma[None, :, :] * eps
    z_ref[...] = z

    # ----- decoder: fold k into the batch -> one MXU pass per layer -----
    k, tb, _ = eps.shape
    z2 = z.reshape(k * tb, LATENT).astype(bf16)
    d = jnp.maximum(
        jnp.dot(z2, w4_ref[...], preferred_element_type=f32) + b4_ref[...], 0.0)
    d = jnp.maximum(
        jnp.dot(d.astype(bf16), w5_ref[...], preferred_element_type=f32)
        + b5_ref[...], 0.0)
    logits = (jnp.dot(d.astype(bf16), w6_ref[...], preferred_element_type=f32)
              + b6_ref[...])                                      # (k*TB, 784) f32
    # bf16 writeback halves the largest HBM store stream.
    logits_ref[...] = logits.reshape(k, tb, IN_DIM).astype(logits_ref.dtype)


def pack_params(params):
    """One-time weight packing: fuse fc31/fc32, cast weights to bf16.

    Weights are stored transposed vs. PyTorch, i.e. (in, out), so the kernel
    computes y = x @ W + b. Biases stay f32 (added to f32 accumulators).
    """
    bf16 = jnp.bfloat16
    w1 = params["w1"].astype(bf16)
    b1 = params["b1"]
    w2 = params["w2"].astype(bf16)
    b2 = params["b2"]
    w3 = jnp.concatenate([params["w31"], params["w32"]], axis=1).astype(bf16)
    b3 = jnp.concatenate([params["b31"], params["b32"]], axis=1)
    w4 = params["w4"].astype(bf16)
    b4 = params["b4"]
    w5 = params["w5"].astype(bf16)
    b5 = params["b5"]
    w6 = params["w6"].astype(bf16)
    b6 = params["b6"]
    return (w1, b1, w2, b2, w3, b3, w4, b4, w5, b5, w6, b6)


def _default_batch_tile():
    """256 fills the 2x256x256 MXU on v6e/v7x; v5e MXUs are 128-wide."""
    try:
        kind = jax.devices()[0].device_kind.lower()
    except Exception:
        return 256
    if "v5 lite" in kind or "v5e" in kind or "v5lite" in kind:
        return 128
    return 256


def vae_forward(x, eps, weights, *, batch_tile=None):
    """x: (B, 784), eps: (k, B, latent) f32, weights: pack_params(...) output.

    Returns (mu, sigma, z, logits) with logits in bf16.
    """
    B = x.shape[0]
    k = eps.shape[0]

    # bf16 input halves the dominant per-step input DMA; no-op if already bf16.
    # (For best results the caller should produce x in bf16 directly.)
    x = x.astype(jnp.bfloat16)

    # --- batch tiling: no padding, ragged last block is clipped by Pallas ---
    if batch_tile is None:
        batch_tile = _default_batch_tile()
    if B <= batch_tile:
        TB = B                      # full-dim block: legal for any B, no padding
    else:
        # keep the (k, TB, 784) bf16 logits block (x2 buffers) well under VMEM
        # (matters on v7x's 64 MiB chip when k is large)
        while batch_tile > 16 and k * batch_tile * IN_DIM * 2 * 2 > (8 << 20):
            batch_tile //= 2
        TB = batch_tile             # multiple of 16, fine for (8,128) tiling
    grid = (pl.cdiv(B, TB),)

    out_shape = (
        jax.ShapeDtypeStruct((B, 2 * LATENT), jnp.float32),     # [mu | sigma]
        jax.ShapeDtypeStruct((k, B, LATENT), jnp.float32),      # z
        jax.ShapeDtypeStruct((k, B, IN_DIM), jnp.bfloat16),     # logits (bf16)
    )
    out_specs = (
        pl.BlockSpec((TB, 2 * LATENT), lambda i: (i, 0)),
        pl.BlockSpec((k, TB, LATENT), lambda i: (0, i, 0)),
        pl.BlockSpec((k, TB, IN_DIM), lambda i: (0, i, 0)),
    )

    def _weight_spec(a, single_buffer):
        idx = lambda i, _n=a.ndim: (0,) * _n   # constant block index: resident
        if single_buffer:
            # Never re-fetched -> a second pipeline buffer is pure VMEM waste.
            return pl.BlockSpec(a.shape, idx, pipeline_mode=pl.Buffered(1))
        return pl.BlockSpec(a.shape, idx)

    def _call(single_buffer_weights):
        in_specs = [
            pl.BlockSpec((TB, IN_DIM), lambda i: (i, 0)),        # x (batch-tiled)
            pl.BlockSpec((k, TB, LATENT), lambda i: (0, i, 0)),  # eps (batch-tiled)
        ] + [_weight_spec(w, single_buffer_weights) for w in weights]
        return pl.pallas_call(
            _vae_kernel,
            out_shape=out_shape,
            grid=grid,
            in_specs=in_specs,
            out_specs=out_specs,
            compiler_params=pltpu.CompilerParams(
                dimension_semantics=("parallel",),   # shard batch tiles on v7x TCs
                vmem_limit_bytes=32 << 20,
            ),
        )(x, eps, *weights)

    try:
        musig, z, logits = _call(True)
    except Exception:
        # pl.Buffered(1) is only a VMEM saving; fall back to default double
        # buffering if this JAX / Mosaic build rejects pipeline_mode.
        musig, z, logits = _call(False)

    mu = musig[:, :LATENT]
    sigma = musig[:, LATENT:]
    # TODO(synk): for tiny single-tile batches on v7x a second "parallel" grid
    # axis (e.g. split k or fc6's output columns) would engage the idle TC.
    return mu, sigma, z, logits


def init_params(key):
    """Deterministic PyTorch-Linear-style init (uniform +/- 1/sqrt(fan_in))."""
    def linear(k, fan_in, fan_out):
        kw, kb = jax.random.split(k)
        bound = 1.0 / math.sqrt(fan_in)
        w = jax.random.uniform(kw, (fan_in, fan_out), jnp.float32, -bound, bound)
        b = jax.random.uniform(kb, (1, fan_out), jnp.float32, -bound, bound)
        return w, b

    keys = jax.random.split(key, 7)
    params = {}
    params["w1"], params["b1"] = linear(keys[0], IN_DIM, HID)
    params["w2"], params["b2"] = linear(keys[1], HID, HID)
    params["w31"], params["b31"] = linear(keys[2], HID, LATENT)
    params["w32"], params["b32"] = linear(keys[3], HID, LATENT)
    params["w4"], params["b4"] = linear(keys[4], LATENT, HID)
    params["w5"], params["b5"] = linear(keys[5], HID, HID)
    params["w6"], params["b6"] = linear(keys[6], HID, IN_DIM)
    return params


def vae_reference(x, eps, p):
    """Pure-JAX reference with the same bf16-weight / f32-accum recipe."""
    bf16 = jnp.bfloat16
    f32 = jnp.float32

    def mm(a, w):
        return jnp.dot(a.astype(bf16), w.astype(bf16), preferred_element_type=f32)

    h = jax.nn.relu(mm(x, p["w1"]) + p["b1"])
    h = jax.nn.relu(mm(h, p["w2"]) + p["b2"])
    mu = mm(h, p["w31"]) + p["b31"]
    sigma = jnp.exp(mm(h, p["w32"]) + p["b32"])
    z = mu[None] + sigma[None] * eps
    d = jax.nn.relu(mm(z, p["w4"]) + p["b4"])
    d = jax.nn.relu(mm(d, p["w5"]) + p["b5"])
    logits = mm(d, p["w6"]) + p["b6"]
    return mu, sigma, z, logits


if __name__ == "__main__":
    key = jax.random.PRNGKey(0)
    k_x, k_eps, k_par = jax.random.split(key, 3)

    batch, k_samples = 2, 1
    # module does x.view(-1, 784): start from an MNIST-shaped NCHW input.
    x_img = jax.random.normal(k_x, (batch, 1, 28, 28), jnp.float32)
    x = x_img.reshape(-1, IN_DIM)                       # the .view(-1, 784)
    eps = jax.random.normal(k_eps, (k_samples, batch, LATENT), jnp.float32)
    params = init_params(k_par)
    weights = pack_params(params)                       # pack once, reuse

    mu, sigma, z, logits = jax.block_until_ready(vae_forward(x, eps, weights))

    assert mu.shape == (batch, LATENT)
    assert sigma.shape == (batch, LATENT)
    assert z.shape == (k_samples, batch, LATENT)
    assert logits.shape == (k_samples, batch, IN_DIM)

    # sanity check vs pure-JAX reference (same bf16-weight recipe)
    mu_r, sigma_r, z_r, logits_r = vae_reference(x, eps, params)
    assert jnp.allclose(mu, mu_r, atol=1e-2, rtol=1e-2)
    assert jnp.allclose(sigma, sigma_r, atol=1e-2, rtol=1e-2)
    assert jnp.allclose(z, z_r, atol=1e-2, rtol=1e-2)
    assert jnp.allclose(logits.astype(jnp.float32), logits_r, atol=3e-2, rtol=3e-2)

    # qz_x ~ Normal(mu, sigma); px_z ~ Bernoulli(logits=logits); z is rsample.
    print("KERNEL_OK")
</pallas_src>

<mosaic_0001>
module attributes {stable_mosaic.version = 11 : i64} {
  func.func @_vae_kernel(%arg0: i32, %arg1: memref<2x784xbf16, #tpu.memory_space<vmem>>, %arg2: memref<1x2x20xf32, #tpu.memory_space<vmem>>, %arg3: memref<784x400xbf16, #tpu.memory_space<vmem>>, %arg4: memref<1x400xf32, #tpu.memory_space<vmem>>, %arg5: memref<400x400xbf16, #tpu.memory_space<vmem>>, %arg6: memref<1x400xf32, #tpu.memory_space<vmem>>, %arg7: memref<400x40xbf16, #tpu.memory_space<vmem>>, %arg8: memref<1x40xf32, #tpu.memory_space<vmem>>, %arg9: memref<20x400xbf16, #tpu.memory_space<vmem>>, %arg10: memref<1x400xf32, #tpu.memory_space<vmem>>, %arg11: memref<400x400xbf16, #tpu.memory_space<vmem>>, %arg12: memref<1x400xf32, #tpu.memory_space<vmem>>, %arg13: memref<400x784xbf16, #tpu.memory_space<vmem>>, %arg14: memref<1x784xf32, #tpu.memory_space<vmem>>, %arg15: memref<2x40xf32, #tpu.memory_space<vmem>>, %arg16: memref<1x2x20xf32, #tpu.memory_space<vmem>>, %arg17: memref<1x2x784xbf16, #tpu.memory_space<vmem>>) attributes {dimension_semantics = [#tpu.dimension_semantics<parallel>], iteration_bounds = array<i64: 1>, scalar_prefetch = 0 : i64, scratch_operands = 0 : i64, tpu.core_type = #tpu.core_type<tc>, window_params = [{transform_indices = @transform_0, window_bounds = array<i64: 2, 784>}, {transform_indices = @transform_1, window_bounds = array<i64: 1, 2, 20>}, {pipeline_mode = #tpu.pipeline_mode<synchronous>, transform_indices = @transform_2, window_bounds = array<i64: 784, 400>}, {pipeline_mode = #tpu.pipeline_mode<synchronous>, transform_indices = @transform_3, window_bounds = array<i64: 1, 400>}, {pipeline_mode = #tpu.pipeline_mode<synchronous>, transform_indices = @transform_4, window_bounds = array<i64: 400, 400>}, {pipeline_mode = #tpu.pipeline_mode<synchronous>, transform_indices = @transform_5, window_bounds = array<i64: 1, 400>}, {pipeline_mode = #tpu.pipeline_mode<synchronous>, transform_indices = @transform_6, window_bounds = array<i64: 400, 40>}, {pipeline_mode = #tpu.pipeline_mode<synchronous>, transform_indices = @transform_7, window_bounds = array<i64: 1, 40>}, {pipeline_mode = #tpu.pipeline_mode<synchronous>, transform_indices = @transform_8, window_bounds = array<i64: 20, 400>}, {pipeline_mode = #tpu.pipeline_mode<synchronous>, transform_indices = @transform_9, window_bounds = array<i64: 1, 400>}, {pipeline_mode = #tpu.pipeline_mode<synchronous>, transform_indices = @transform_10, window_bounds = array<i64: 400, 400>}, {pipeline_mode = #tpu.pipeline_mode<synchronous>, transform_indices = @transform_11, window_bounds = array<i64: 1, 400>}, {pipeline_mode = #tpu.pipeline_mode<synchronous>, transform_indices = @transform_12, window_bounds = array<i64: 400, 784>}, {pipeline_mode = #tpu.pipeline_mode<synchronous>, transform_indices = @transform_13, window_bounds = array<i64: 1, 784>}, {transform_indices = @transform_14, window_bounds = array<i64: 2, 40>}, {transform_indices = @transform_15, window_bounds = array<i64: 1, 2, 20>}, {transform_indices = @transform_16, window_bounds = array<i64: 1, 2, 784>}]} {
    %c0 = arith.constant 0 : index
    %c0_0 = arith.constant 0 : index
    %0 = vector.load %arg1[%c0, %c0_0] : memref<2x784xbf16, #tpu.memory_space<vmem>>, vector<2x784xbf16>
    %c0_1 = arith.constant 0 : index
    %c0_2 = arith.constant 0 : index
    %1 = vector.load %arg3[%c0_1, %c0_2] : memref<784x400xbf16, #tpu.memory_space<vmem>>, vector<784x400xbf16>
    %cst = arith.constant dense<0.000000e+00> : vector<2x400xf32>
    %2 = tpu.matmul %0, %1, %cst {dimension_numbers = #tpu.dot_dimension_numbers<[1], [0], [0], [1], [0, 0, 1, 1], [], []>} : vector<2x784xbf16>, vector<784x400xbf16>, vector<2x400xf32> -> vector<2x400xf32>
    %c0_3 = arith.constant 0 : index
    %c0_4 = arith.constant 0 : index
    %3 = vector.load %arg4[%c0_3, %c0_4] : memref<1x400xf32, #tpu.memory_space<vmem>>, vector<1x400xf32>
    %4 = vector.broadcast %3 : vector<1x400xf32> to vector<2x400xf32>
    %5 = arith.addf %2, %4 : vector<2x400xf32>
    %cst_5 = arith.constant 0.000000e+00 : f32
    %6 = vector.broadcast %cst_5 : f32 to vector<2x400xf32>
    %7 = arith.maximumf %5, %6 : vector<2x400xf32>
    %8 = arith.truncf %7 : vector<2x400xf32> to vector<2x400xbf16>
    %c0_6 = arith.constant 0 : index
    %c0_7 = arith.constant 0 : index
    %9 = vector.load %arg5[%c0_6, %c0_7] : memref<400x400xbf16, #tpu.memory_space<vmem>>, vector<400x400xbf16>
    %cst_8 = arith.constant dense<0.000000e+00> : vector<2x400xf32>
    %10 = tpu.matmul %8, %9, %cst_8 {dimension_numbers = #tpu.dot_dimension_numbers<[1], [0], [0], [1], [0, 0, 1, 1], [], []>} : vector<2x400xbf16>, vector<400x400xbf16>, vector<2x400xf32> -> vector<2x400xf32>
    %c0_9 = arith.constant 0 : index
    %c0_10 = arith.constant 0 : index
    %11 = vector.load %arg6[%c0_9, %c0_10] : memref<1x400xf32, #tpu.memory_space<vmem>>, vector<1x400xf32>
    %12 = vector.broadcast %11 : vector<1x400xf32> to vector<2x400xf32>
    %13 = arith.addf %10, %12 : vector<2x400xf32>
    %cst_11 = arith.constant 0.000000e+00 : f32
    %14 = vector.broadcast %cst_11 : f32 to vector<2x400xf32>
    %15 = arith.maximumf %13, %14 : vector<2x400xf32>
    %16 = arith.truncf %15 : vector<2x400xf32> to vector<2x400xbf16>
    %c0_12 = arith.constant 0 : index
    %c0_13 = arith.constant 0 : index
    %17 = vector.load %arg7[%c0_12, %c0_13] : memref<400x40xbf16, #tpu.memory_space<vmem>>, vector<400x40xbf16>
    %cst_14 = arith.constant dense<0.000000e+00> : vector<2x40xf32>
    %18 = tpu.matmul %16, %17, %cst_14 {dimension_numbers = #tpu.dot_dimension_numbers<[1], [0], [0], [1], [0, 0, 1, 1], [], []>} : vector<2x400xbf16>, vector<400x40xbf16>, vector<2x40xf32> -> vector<2x40xf32>
    %c0_15 = arith.constant 0 : index
    %c0_16 = arith.constant 0 : index
    %19 = vector.load %arg8[%c0_15, %c0_16] : memref<1x40xf32, #tpu.memory_space<vmem>>, vector<1x40xf32>
    %20 = vector.broadcast %19 : vector<1x40xf32> to vector<2x40xf32>
    %21 = arith.addf %18, %20 : vector<2x40xf32>
    %22 = vector.extract_strided_slice %21 {offsets = [0, 0], sizes = [2, 20], strides = [1, 1]} : vector<2x40xf32> to vector<2x20xf32>
    %23 = vector.extract_strided_slice %21 {offsets = [0, 20], sizes = [2, 20], strides = [1, 1]} : vector<2x40xf32> to vector<2x20xf32>
    %24 = math.exp %23 : vector<2x20xf32>
    %25 = tpu.concatenate %22, %24 in 1 : vector<2x20xf32>, vector<2x20xf32> -> vector<2x40xf32>
    %c0_17 = arith.constant 0 : index
    %c0_18 = arith.constant 0 : index
    %26 = vector.load %arg15[%c0_17, %c0_18] : memref<2x40xf32, #tpu.memory_space<vmem>>, vector<2x40xf32>
    tpu.vector_store %arg15[%c0_17, %c0_18], %25 {strides = array<i32>} : memref<2x40xf32, #tpu.memory_space<vmem>>, vector<2x40xf32>,
    %c0_19 = arith.constant 0 : index
    %c0_20 = arith.constant 0 : index
    %c0_21 = arith.constant 0 : index
    %27 = vector.load %arg2[%c0_19, %c0_20, %c0_21] : memref<1x2x20xf32, #tpu.memory_space<vmem>>, vector<1x2x20xf32>
    %28 = vector.shape_cast %22 : vector<2x20xf32> to vector<1x2x20xf32>
    %29 = vector.shape_cast %24 : vector<2x20xf32> to vector<1x2x20xf32>
    %30 = arith.mulf %29, %27 : vector<1x2x20xf32>
    %31 = arith.addf %28, %30 : vector<1x2x20xf32>
    %c0_22 = arith.constant 0 : index
    %c0_23 = arith.constant 0 : index
    %c0_24 = arith.constant 0 : index
    %32 = vector.load %arg16[%c0_22, %c0_23, %c0_24] : memref<1x2x20xf32, #tpu.memory_space<vmem>>, vector<1x2x20xf32>
    tpu.vector_store %arg16[%c0_22, %c0_23, %c0_24], %31 {strides = array<i32>} : memref<1x2x20xf32, #tpu.memory_space<vmem>>, vector<1x2x20xf32>,
    %33 = vector.shape_cast %31 : vector<1x2x20xf32> to vector<2x20xf32>
    %34 = arith.truncf %33 : vector<2x20xf32> to vector<2x20xbf16>
    %c0_25 = arith.constant 0 : index
    %c0_26 = arith.constant 0 : index
    %35 = vector.load %arg9[%c0_25, %c0_26] : memref<20x400xbf16, #tpu.memory_space<vmem>>, vector<20x400xbf16>
    %cst_27 = arith.constant dense<0.000000e+00> : vector<2x400xf32>
    %36 = tpu.matmul %34, %35, %cst_27 {dimension_numbers = #tpu.dot_dimension_numbers<[1], [0], [0], [1], [0, 0, 1, 1], [], []>} : vector<2x20xbf16>, vector<20x400xbf16>, vector<2x400xf32> -> vector<2x400xf32>
    %c0_28 = arith.constant 0 : index
    %c0_29 = arith.constant 0 : index
    %37 = vector.load %arg10[%c0_28, %c0_29] : memref<1x400xf32, #tpu.memory_space<vmem>>, vector<1x400xf32>
    %38 = vector.broadcast %37 : vector<1x400xf32> to vector<2x400xf32>
    %39 = arith.addf %36, %38 : vector<2x400xf32>
    %cst_30 = arith.constant 0.000000e+00 : f32
    %40 = vector.broadcast %cst_30 : f32 to vector<2x400xf32>
    %41 = arith.maximumf %39, %40 : vector<2x400xf32>
    %42 = arith.truncf %41 : vector<2x400xf32> to vector<2x400xbf16>
    %c0_31 = arith.constant 0 : index
    %c0_32 = arith.constant 0 : index
    %43 = vector.load %arg11[%c0_31, %c0_32] : memref<400x400xbf16, #tpu.memory_space<vmem>>, vector<400x400xbf16>
    %cst_33 = arith.constant dense<0.000000e+00> : vector<2x400xf32>
    %44 = tpu.matmul %42, %43, %cst_33 {dimension_numbers = #tpu.dot_dimension_numbers<[1], [0], [0], [1], [0, 0, 1, 1], [], []>} : vector<2x400xbf16>, vector<400x400xbf16>, vector<2x400xf32> -> vector<2x400xf32>
    %c0_34 = arith.constant 0 : index
    %c0_35 = arith.constant 0 : index
    %45 = vector.load %arg12[%c0_34, %c0_35] : memref<1x400xf32, #tpu.memory_space<vmem>>, vector<1x400xf32>
    %46 = vector.broadcast %45 : vector<1x400xf32> to vector<2x400xf32>
    %47 = arith.addf %44, %46 : vector<2x400xf32>
    %cst_36 = arith.constant 0.000000e+00 : f32
    %48 = vector.broadcast %cst_36 : f32 to vector<2x400xf32>
    %49 = arith.maximumf %47, %48 : vector<2x400xf32>
    %50 = arith.truncf %49 : vector<2x400xf32> to vector<2x400xbf16>
    %c0_37 = arith.constant 0 : index
    %c0_38 = arith.constant 0 : index
    %51 = vector.load %arg13[%c0_37, %c0_38] : memref<400x784xbf16, #tpu.memory_space<vmem>>, vector<400x784xbf16>
    %cst_39 = arith.constant dense<0.000000e+00> : vector<2x784xf32>
    %52 = tpu.matmul %50, %51, %cst_39 {dimension_numbers = #tpu.dot_dimension_numbers<[1], [0], [0], [1], [0, 0, 1, 1], [], []>} : vector<2x400xbf16>, vector<400x784xbf16>, vector<2x784xf32> -> vector<2x784xf32>
    %c0_40 = arith.constant 0 : index
    %c0_41 = arith.constant 0 : index
    %53 = vector.load %arg14[%c0_40, %c0_41] : memref<1x784xf32, #tpu.memory_space<vmem>>, vector<1x784xf32>
    %54 = vector.broadcast %53 : vector<1x784xf32> to vector<2x784xf32>
    %55 = arith.addf %52, %54 : vector<2x784xf32>
    %56 = vector.shape_cast %55 : vector<2x784xf32> to vector<1x2x784xf32>
    %57 = arith.truncf %56 : vector<1x2x784xf32> to vector<1x2x784xbf16>
    %c0_42 = arith.constant 0 : index
    %c0_43 = arith.constant 0 : index
    %c0_44 = arith.constant 0 : index
    %58 = vector.load %arg17[%c0_42, %c0_43, %c0_44] : memref<1x2x784xbf16, #tpu.memory_space<vmem>>, vector<1x2x784xbf16>
    tpu.vector_store %arg17[%c0_42, %c0_43, %c0_44], %57 {strides = array<i32>} : memref<1x2x784xbf16, #tpu.memory_space<vmem>>, vector<1x2x784xbf16>,
    return
  }
  func.func @transform_0(%arg0: i32) -> (i32, i32) {
    %c0_i32 = arith.constant 0 : i32
    %c0_i32_0 = arith.constant 0 : i32
    return %arg0, %c0_i32 : i32, i32
  }
  func.func @transform_1(%arg0: i32) -> (i32, i32, i32) {
    %c0_i32 = arith.constant 0 : i32
    %c0_i32_0 = arith.constant 0 : i32
    %c0_i32_1 = arith.constant 0 : i32
    return %c0_i32, %arg0, %c0_i32_0 : i32, i32, i32
  }
  func.func @transform_2(%arg0: i32) -> (i32, i32) {
    %c0_i32 = arith.constant 0 : i32
    %c0_i32_0 = arith.constant 0 : i32
    %c0_i32_1 = arith.constant 0 : i32
    return %c0_i32, %c0_i32_0 : i32, i32
  }
  func.func @transform_3(%arg0: i32) -> (i32, i32) {
    %c0_i32 = arith.constant 0 : i32
    %c0_i32_0 = arith.constant 0 : i32
    %c0_i32_1 = arith.constant 0 : i32
    return %c0_i32, %c0_i32_0 : i32, i32
  }
  func.func @transform_4(%arg0: i32) -> (i32, i32) {
    %c0_i32 = arith.constant 0 : i32
    %c0_i32_0 = arith.constant 0 : i32
    %c0_i32_1 = arith.constant 0 : i32
    return %c0_i32, %c0_i32_0 : i32, i32
  }
  func.func @transform_5(%arg0: i32) -> (i32, i32) {
    %c0_i32 = arith.constant 0 : i32
    %c0_i32_0 = arith.constant 0 : i32
    %c0_i32_1 = arith.constant 0 : i32
    return %c0_i32, %c0_i32_0 : i32, i32
  }
  func.func @transform_6(%arg0: i32) -> (i32, i32) {
    %c0_i32 = arith.constant 0 : i32
    %c0_i32_0 = arith.constant 0 : i32
    %c0_i32_1 = arith.constant 0 : i32
    return %c0_i32, %c0_i32_0 : i32, i32
  }
  func.func @transform_7(%arg0: i32) -> (i32, i32) {
    %c0_i32 = arith.constant 0 : i32
    %c0_i32_0 = arith.constant 0 : i32
    %c0_i32_1 = arith.constant 0 : i32
    return %c0_i32, %c0_i32_0 : i32, i32
  }
  func.func @transform_8(%arg0: i32) -> (i32, i32) {
    %c0_i32 = arith.constant 0 : i32
    %c0_i32_0 = arith.constant 0 : i32
    %c0_i32_1 = arith.constant 0 : i32
    return %c0_i32, %c0_i32_0 : i32, i32
  }
  func.func @transform_9(%arg0: i32) -> (i32, i32) {
    %c0_i32 = arith.constant 0 : i32
    %c0_i32_0 = arith.constant 0 : i32
    %c0_i32_1 = arith.constant 0 : i32
    return %c0_i32, %c0_i32_0 : i32, i32
  }
  func.func @transform_10(%arg0: i32) -> (i32, i32) {
    %c0_i32 = arith.constant 0 : i32
    %c0_i32_0 = arith.constant 0 : i32
    %c0_i32_1 = arith.constant 0 : i32
    return %c0_i32, %c0_i32_0 : i32, i32
  }
  func.func @transform_11(%arg0: i32) -> (i32, i32) {
    %c0_i32 = arith.constant 0 : i32
    %c0_i32_0 = arith.constant 0 : i32
    %c0_i32_1 = arith.constant 0 : i32
    return %c0_i32, %c0_i32_0 : i32, i32
  }
  func.func @transform_12(%arg0: i32) -> (i32, i32) {
    %c0_i32 = arith.constant 0 : i32
    %c0_i32_0 = arith.constant 0 : i32
    %c0_i32_1 = arith.constant 0 : i32
    return %c0_i32, %c0_i32_0 : i32, i32
  }
  func.func @transform_13(%arg0: i32) -> (i32, i32) {
    %c0_i32 = arith.constant 0 : i32
    %c0_i32_0 = arith.constant 0 : i32
    %c0_i32_1 = arith.constant 0 : i32
    return %c0_i32, %c0_i32_0 : i32, i32
  }
  func.func @transform_14(%arg0: i32) -> (i32, i32) {
    %c0_i32 = arith.constant 0 : i32
    %c0_i32_0 = arith.constant 0 : i32
    return %arg0, %c0_i32 : i32, i32
  }
  func.func @transform_15(%arg0: i32) -> (i32, i32, i32) {
    %c0_i32 = arith.constant 0 : i32
    %c0_i32_0 = arith.constant 0 : i32
    %c0_i32_1 = arith.constant 0 : i32
    return %c0_i32, %arg0, %c0_i32_0 : i32, i32, i32
  }
  func.func @transform_16(%arg0: i32) -> (i32, i32, i32) {
    %c0_i32 = arith.constant 0 : i32
    %c0_i32_0 = arith.constant 0 : i32
    %c0_i32_1 = arith.constant 0 : i32
    return %c0_i32, %arg0, %c0_i32_0 : i32, i32, i32
  }
}

module attributes {stable_mosaic.version = 11 : i64} {
  func.func @_vae_kernel(%arg0: i32, %arg1: memref<2x784xbf16, #tpu.memory_space<vmem>>, %arg2: memref<1x2x20xf32, #tpu.memory_space<vmem>>, %arg3: memref<784x400xbf16, #tpu.memory_space<vmem>>, %arg4: memref<1x400xf32, #tpu.memory_space<vmem>>, %arg5: memref<400x400xbf16, #tpu.memory_space<vmem>>, %arg6: memref<1x400xf32, #tpu.memory_space<vmem>>, %arg7: memref<400x40xbf16, #tpu.memory_space<vmem>>, %arg8: memref<1x40xf32, #tpu.memory_space<vmem>>, %arg9: memref<20x400xbf16, #tpu.memory_space<vmem>>, %arg10: memref<1x400xf32, #tpu.memory_space<vmem>>, %arg11: memref<400x400xbf16, #tpu.memory_space<vmem>>, %arg12: memref<1x400xf32, #tpu.memory_space<vmem>>, %arg13: memref<400x784xbf16, #tpu.memory_space<vmem>>, %arg14: memref<1x784xf32, #tpu.memory_space<vmem>>, %arg15: memref<2x40xf32, #tpu.memory_space<vmem>>, %arg16: memref<1x2x20xf32, #tpu.memory_space<vmem>>, %arg17: memref<1x2x784xbf16, #tpu.memory_space<vmem>>) attributes {dimension_semantics = [#tpu.dimension_semantics<parallel>], iteration_bounds = array<i64: 1>, scalar_prefetch = 0 : i64, scratch_operands = 0 : i64, tpu.core_type = #tpu.core_type<tc>, window_params = [{transform_indices = @transform_0, window_bounds = array<i64: 2, 784>}, {transform_indices = @transform_1, window_bounds = array<i64: 1, 2, 20>}, {pipeline_mode = #tpu.pipeline_mode<synchronous>, transform_indices = @transform_2, window_bounds = array<i64: 784, 400>}, {pipeline_mode = #tpu.pipeline_mode<synchronous>, transform_indices = @transform_3, window_bounds = array<i64: 1, 400>}, {pipeline_mode = #tpu.pipeline_mode<synchronous>, transform_indices = @transform_4, window_bounds = array<i64: 400, 400>}, {pipeline_mode = #tpu.pipeline_mode<synchronous>, transform_indices = @transform_5, window_bounds = array<i64: 1, 400>}, {pipeline_mode = #tpu.pipeline_mode<synchronous>, transform_indices = @transform_6, window_bounds = array<i64: 400, 40>}, {pipeline_mode = #tpu.pipeline_mode<synchronous>, transform_indices = @transform_7, window_bounds = array<i64: 1, 40>}, {pipeline_mode = #tpu.pipeline_mode<synchronous>, transform_indices = @transform_8, window_bounds = array<i64: 20, 400>}, {pipeline_mode = #tpu.pipeline_mode<synchronous>, transform_indices = @transform_9, window_bounds = array<i64: 1, 400>}, {pipeline_mode = #tpu.pipeline_mode<synchronous>, transform_indices = @transform_10, window_bounds = array<i64: 400, 400>}, {pipeline_mode = #tpu.pipeline_mode<synchronous>, transform_indices = @transform_11, window_bounds = array<i64: 1, 400>}, {pipeline_mode = #tpu.pipeline_mode<synchronous>, transform_indices = @transform_12, window_bounds = array<i64: 400, 784>}, {pipeline_mode = #tpu.pipeline_mode<synchronous>, transform_indices = @transform_13, window_bounds = array<i64: 1, 784>}, {transform_indices = @transform_14, window_bounds = array<i64: 2, 40>}, {transform_indices = @transform_15, window_bounds = array<i64: 1, 2, 20>}, {transform_indices = @transform_16, window_bounds = array<i64: 1, 2, 784>}]} {
    %c0 = arith.constant 0 : index
    %c0_0 = arith.constant 0 : index
    %0 = vector.load %arg1[%c0, %c0_0] : memref<2x784xbf16, #tpu.memory_space<vmem>>, vector<2x784xbf16>
    %c0_1 = arith.constant 0 : index
    %c0_2 = arith.constant 0 : index
    %1 = vector.load %arg3[%c0_1, %c0_2] : memref<784x400xbf16, #tpu.memory_space<vmem>>, vector<784x400xbf16>
    %cst = arith.constant dense<0.000000e+00> : vector<2x400xf32>
    %2 = tpu.matmul %0, %1, %cst {dimension_numbers = #tpu.dot_dimension_numbers<[1], [0], [0], [1], [0, 0, 1, 1], [], []>} : vector<2x784xbf16>, vector<784x400xbf16>, vector<2x400xf32> -> vector<2x400xf32>
    %c0_3 = arith.constant 0 : index
    %c0_4 = arith.constant 0 : index
    %3 = vector.load %arg4[%c0_3, %c0_4] : memref<1x400xf32, #tpu.memory_space<vmem>>, vector<1x400xf32>
    %4 = vector.broadcast %3 : vector<1x400xf32> to vector<2x400xf32>
    %5 = arith.addf %2, %4 : vector<2x400xf32>
    %cst_5 = arith.constant 0.000000e+00 : f32
    %6 = vector.broadcast %cst_5 : f32 to vector<2x400xf32>
    %7 = arith.maximumf %5, %6 : vector<2x400xf32>
    %8 = arith.truncf %7 : vector<2x400xf32> to vector<2x400xbf16>
    %c0_6 = arith.constant 0 : index
    %c0_7 = arith.constant 0 : index
    %9 = vector.load %arg5[%c0_6, %c0_7] : memref<400x400xbf16, #tpu.memory_space<vmem>>, vector<400x400xbf16>
    %cst_8 = arith.constant dense<0.000000e+00> : vector<2x400xf32>
    %10 = tpu.matmul %8, %9, %cst_8 {dimension_numbers = #tpu.dot_dimension_numbers<[1], [0], [0], [1], [0, 0, 1, 1], [], []>} : vector<2x400xbf16>, vector<400x400xbf16>, vector<2x400xf32> -> vector<2x400xf32>
    %c0_9 = arith.constant 0 : index
    %c0_10 = arith.constant 0 : index
    %11 = vector.load %arg6[%c0_9, %c0_10] : memref<1x400xf32, #tpu.memory_space<vmem>>, vector<1x400xf32>
    %12 = vector.broadcast %11 : vector<1x400xf32> to vector<2x400xf32>
    %13 = arith.addf %10, %12 : vector<2x400xf32>
    %cst_11 = arith.constant 0.000000e+00 : f32
    %14 = vector.broadcast %cst_11 : f32 to vector<2x400xf32>
    %15 = arith.maximumf %13, %14 : vector<2x400xf32>
    %16 = arith.truncf %15 : vector<2x400xf32> to vector<2x400xbf16>
    %c0_12 = arith.constant 0 : index
    %c0_13 = arith.constant 0 : index
    %17 = vector.load %arg7[%c0_12, %c0_13] : memref<400x40xbf16, #tpu.memory_space<vmem>>, vector<400x40xbf16>
    %cst_14 = arith.constant dense<0.000000e+00> : vector<2x40xf32>
    %18 = tpu.matmul %16, %17, %cst_14 {dimension_numbers = #tpu.dot_dimension_numbers<[1], [0], [0], [1], [0, 0, 1, 1], [], []>} : vector<2x400xbf16>, vector<400x40xbf16>, vector<2x40xf32> -> vector<2x40xf32>
    %c0_15 = arith.constant 0 : index
    %c0_16 = arith.constant 0 : index
    %19 = vector.load %arg8[%c0_15, %c0_16] : memref<1x40xf32, #tpu.memory_space<vmem>>, vector<1x40xf32>
    %20 = vector.broadcast %19 : vector<1x40xf32> to vector<2x40xf32>
    %21 = arith.addf %18, %20 : vector<2x40xf32>
    %22 = vector.extract_strided_slice %21 {offsets = [0, 0], sizes = [2, 20], strides = [1, 1]} : vector<2x40xf32> to vector<2x20xf32>
    %23 = vector.extract_strided_slice %21 {offsets = [0, 20], sizes = [2, 20], strides = [1, 1]} : vector<2x40xf32> to vector<2x20xf32>
    %24 = math.exp %23 : vector<2x20xf32>
    %25 = tpu.concatenate %22, %24 in 1 : vector<2x20xf32>, vector<2x20xf32> -> vector<2x40xf32>
    %c0_17 = arith.constant 0 : index
    %c0_18 = arith.constant 0 : index
    %26 = vector.load %arg15[%c0_17, %c0_18] : memref<2x40xf32, #tpu.memory_space<vmem>>, vector<2x40xf32>
    tpu.vector_store %arg15[%c0_17, %c0_18], %25 {strides = array<i32>} : memref<2x40xf32, #tpu.memory_space<vmem>>, vector<2x40xf32>,
    %c0_19 = arith.constant 0 : index
    %c0_20 = arith.constant 0 : index
    %c0_21 = arith.constant 0 : index
    %27 = vector.load %arg2[%c0_19, %c0_20, %c0_21] : memref<1x2x20xf32, #tpu.memory_space<vmem>>, vector<1x2x20xf32>
    %28 = vector.shape_cast %22 : vector<2x20xf32> to vector<1x2x20xf32>
    %29 = vector.shape_cast %24 : vector<2x20xf32> to vector<1x2x20xf32>
    %30 = arith.mulf %29, %27 : vector<1x2x20xf32>
    %31 = arith.addf %28, %30 : vector<1x2x20xf32>
    %c0_22 = arith.constant 0 : index
    %c0_23 = arith.constant 0 : index
    %c0_24 = arith.constant 0 : index
    %32 = vector.load %arg16[%c0_22, %c0_23, %c0_24] : memref<1x2x20xf32, #tpu.memory_space<vmem>>, vector<1x2x20xf32>
    tpu.vector_store %arg16[%c0_22, %c0_23, %c0_24], %31 {strides = array<i32>} : memref<1x2x20xf32, #tpu.memory_space<vmem>>, vector<1x2x20xf32>,
    %33 = vector.shape_cast %31 : vector<1x2x20xf32> to vector<2x20xf32>
    %34 = arith.truncf %33 : vector<2x20xf32> to vector<2x20xbf16>
    %c0_25 = arith.constant 0 : index
    %c0_26 = arith.constant 0 : index
    %35 = vector.load %arg9[%c0_25, %c0_26] : memref<20x400xbf16, #tpu.memory_space<vmem>>, vector<20x400xbf16>
    %cst_27 = arith.constant dense<0.000000e+00> : vector<2x400xf32>
    %36 = tpu.matmul %34, %35, %cst_27 {dimension_numbers = #tpu.dot_dimension_numbers<[1], [0], [0], [1], [0, 0, 1, 1], [], []>} : vector<2x20xbf16>, vector<20x400xbf16>, vector<2x400xf32> -> vector<2x400xf32>
    %c0_28 = arith.constant 0 : index
    %c0_29 = arith.constant 0 : index
    %37 = vector.load %arg10[%c0_28, %c0_29] : memref<1x400xf32, #tpu.memory_space<vmem>>, vector<1x400xf32>
    %38 = vector.broadcast %37 : vector<1x400xf32> to vector<2x400xf32>
    %39 = arith.addf %36, %38 : vector<2x400xf32>
    %cst_30 = arith.constant 0.000000e+00 : f32
    %40 = vector.broadcast %cst_30 : f32 to vector<2x400xf32>
    %41 = arith.maximumf %39, %40 : vector<2x400xf32>
    %42 = arith.truncf %41 : vector<2x400xf32> to vector<2x400xbf16>
    %c0_31 = arith.constant 0 : index
    %c0_32 = arith.constant 0 : index
    %43 = vector.load %arg11[%c0_31, %c0_32] : memref<400x400xbf16, #tpu.memory_space<vmem>>, vector<400x400xbf16>
    %cst_33 = arith.constant dense<0.000000e+00> : vector<2x400xf32>
    %44 = tpu.matmul %42, %43, %cst_33 {dimension_numbers = #tpu.dot_dimension_numbers<[1], [0], [0], [1], [0, 0, 1, 1], [], []>} : vector<2x400xbf16>, vector<400x400xbf16>, vector<2x400xf32> -> vector<2x400xf32>
    %c0_34 = arith.constant 0 : index
    %c0_35 = arith.constant 0 : index
    %45 = vector.load %arg12[%c0_34, %c0_35] : memref<1x400xf32, #tpu.memory_space<vmem>>, vector<1x400xf32>
    %46 = vector.broadcast %45 : vector<1x400xf32> to vector<2x400xf32>
    %47 = arith.addf %44, %46 : vector<2x400xf32>
    %cst_36 = arith.constant 0.000000e+00 : f32
    %48 = vector.broadcast %cst_36 : f32 to vector<2x400xf32>
    %49 = arith.maximumf %47, %48 : vector<2x400xf32>
    %50 = arith.truncf %49 : vector<2x400xf32> to vector<2x400xbf16>
    %c0_37 = arith.constant 0 : index
    %c0_38 = arith.constant 0 : index
    %51 = vector.load %arg13[%c0_37, %c0_38] : memref<400x784xbf16, #tpu.memory_space<vmem>>, vector<400x784xbf16>
    %cst_39 = arith.constant dense<0.000000e+00> : vector<2x784xf32>
    %52 = tpu.matmul %50, %51, %cst_39 {dimension_numbers = #tpu.dot_dimension_numbers<[1], [0], [0], [1], [0, 0, 1, 1], [], []>} : vector<2x400xbf16>, vector<400x784xbf16>, vector<2x784xf32> -> vector<2x784xf32>
    %c0_40 = arith.constant 0 : index
    %c0_41 = arith.constant 0 : index
    %53 = vector.load %arg14[%c0_40, %c0_41] : memref<1x784xf32, #tpu.memory_space<vmem>>, vector<1x784xf32>
    %54 = vector.broadcast %53 : vector<1x784xf32> to vector<2x784xf32>
    %55 = arith.addf %52, %54 : vector<2x784xf32>
    %56 = vector.shape_cast %55 : vector<2x784xf32> to vector<1x2x784xf32>
    %57 = arith.truncf %56 : vector<1x2x784xf32> to vector<1x2x784xbf16>
    %c0_42 = arith.constant 0 : index
    %c0_43 = arith.constant 0 : index
    %c0_44 = arith.constant 0 : index
    %58 = vector.load %arg17[%c0_42, %c0_43, %c0_44] : memref<1x2x784xbf16, #tpu.memory_space<vmem>>, vector<1x2x784xbf16>
    tpu.vector_store %arg17[%c0_42, %c0_43, %c0_44], %57 {strides = array<i32>} : memref<1x2x784xbf16, #tpu.memory_space<vmem>>, vector<1x2x784xbf16>,
    return
  }
  func.func @transform_0(%arg0: i32) -> (i32, i32) {
    %c0_i32 = arith.constant 0 : i32
    %c0_i32_0 = arith.constant 0 : i32
    return %arg0, %c0_i32 : i32, i32
  }
  func.func @transform_1(%arg0: i32) -> (i32, i32, i32) {
    %c0_i32 = arith.constant 0 : i32
    %c0_i32_0 = arith.constant 0 : i32
    %c0_i32_1 = arith.constant 0 : i32
    return %c0_i32, %arg0, %c0_i32_0 : i32, i32, i32
  }
  func.func @transform_2(%arg0: i32) -> (i32, i32) {
    %c0_i32 = arith.constant 0 : i32
    %c0_i32_0 = arith.constant 0 : i32
    %c0_i32_1 = arith.constant 0 : i32
    return %c0_i32, %c0_i32_0 : i32, i32
  }
  func.func @transform_3(%arg0: i32) -> (i32, i32) {
    %c0_i32 = arith.constant 0 : i32
    %c0_i32_0 = arith.constant 0 : i32
    %c0_i32_1 = arith.constant 0 : i32
    return %c0_i32, %c0_i32_0 : i32, i32
  }
  func.func @transform_4(%arg0: i32) -> (i32, i32) {
    %c0_i32 = arith.constant 0 : i32
    %c0_i32_0 = arith.constant 0 : i32
    %c0_i32_1 = arith.constant 0 : i32
    return %c0_i32, %c0_i32_0 : i32, i32
  }
  func.func @transform_5(%arg0: i32) -> (i32, i32) {
    %c0_i32 = arith.constant 0 : i32
    %c0_i32_0 = arith.constant 0 : i32
    %c0_i32_1 = arith.constant 0 : i32
    return %c0_i32, %c0_i32_0 : i32, i32
  }
  func.func @transform_6(%arg0: i32) -> (i32, i32) {
    %c0_i32 = arith.constant 0 : i32
    %c0_i32_0 = arith.constant 0 : i32
    %c0_i32_1 = arith.constant 0 : i32
    return %c0_i32, %c0_i32_0 : i32, i32
  }
  func.func @transform_7(%arg0: i32) -> (i32, i32) {
    %c0_i32 = arith.constant 0 : i32
    %c0_i32_0 = arith.constant 0 : i32
    %c0_i32_1 = arith.constant 0 : i32
    return %c0_i32, %c0_i32_0 : i32, i32
  }
  func.func @transform_8(%arg0: i32) -> (i32, i32) {
    %c0_i32 = arith.constant 0 : i32
    %c0_i32_0 = arith.constant 0 : i32
    %c0_i32_1 = arith.constant 0 : i32
    return %c0_i32, %c0_i32_0 : i32, i32
  }
  func.func @transform_9(%arg0: i32) -> (i32, i32) {
    %c0_i32 = arith.constant 0 : i32
    %c0_i32_0 = arith.constant 0 : i32
    %c0_i32_1 = arith.constant 0 : i32
    return %c0_i32, %c0_i32_0 : i32, i32
  }
  func.func @transform_10(%arg0: i32) -> (i32, i32) {
    %c0_i32 = arith.constant 0 : i32
    %c0_i32_0 = arith.constant 0 : i32
    %c0_i32_1 = arith.constant 0 : i32
    return %c0_i32, %c0_i32_0 : i32, i32
  }
  func.func @transform_11(%arg0: i32) -> (i32, i32) {
    %c0_i32 = arith.constant 0 : i32
    %c0_i32_0 = arith.constant 0 : i32
    %c0_i32_1 = arith.constant 0 : i32
    return %c0_i32, %c0_i32_0 : i32, i32
  }
  func.func @transform_12(%arg0: i32) -> (i32, i32) {
    %c0_i32 = arith.constant 0 : i32
    %c0_i32_0 = arith.constant 0 : i32
    %c0_i32_1 = arith.constant 0 : i32
    return %c0_i32, %c0_i32_0 : i32, i32
  }
  func.func @transform_13(%arg0: i32) -> (i32, i32) {
    %c0_i32 = arith.constant 0 : i32
    %c0_i32_0 = arith.constant 0 : i32
    %c0_i32_1 = arith.constant 0 : i32
    return %c0_i32, %c0_i32_0 : i32, i32
  }
  func.func @transform_14(%arg0: i32) -> (i32, i32) {
    %c0_i32 = arith.constant 0 : i32
    %c0_i32_0 = arith.constant 0 : i32
    return %arg0, %c0_i32 : i32, i32
  }
  func.func @transform_15(%arg0: i32) -> (i32, i32, i32) {
    %c0_i32 = arith.constant 0 : i32
    %c0_i32_0 = arith.constant 0 : i32
    %c0_i32_1 = arith.constant 0 : i32
    return %c0_i32, %arg0, %c0_i32_0 : i32, i32, i32
  }
  func.func @transform_16(%arg0: i32) -> (i32, i32, i32) {
    %c0_i32 = arith.constant 0 : i32
    %c0_i32_0 = arith.constant 0 : i32
    %c0_i32_1 = arith.constant 0 : i32
    return %c0_i32, %arg0, %c0_i32_0 : i32, i32, i32
  }
}

</mosaic_0001>

<bundles_post_ra>
// kernel: tpu_custom_call.1
= control target key start
LH: loop header
LB: loop body
LE: loop exit
PB: predicated region body
PF: predicated region fallthrough
CT: control target
= control target key end

     0   :  { %s9134_s0 = inlined_call_operand.vmem [shape: bf16[2,784], index: 0, kind: input, shape index: {}]   ;;  %s9135_s1 = inlined_call_operand.vmem [shape: f32[1,2,20], index: 1, kind: input, shape index: {}]   ;;  %s9136_s2 = inlined_call_operand.vmem [shape: bf16[784,400], index: 2, kind: input, shape index: {}]   ;;  %s9137_s3 = inlined_call_operand.vmem [shape: f32[1,400], index: 3, kind: input, shape index: {}]   ;;  %s9138_s4 = inlined_call_operand.vmem [shape: bf16[400,400], index: 4, kind: input, shape index: {}]   ;;  %s9139_s5 = inlined_call_operand.vmem [shape: f32[1,400], index: 5, kind: input, shape index: {}]   ;;  %s9140_s6 = inlined_call_operand.vmem [shape: bf16[400,40], index: 6, kind: input, shape index: {}]   ;;  %s9141_s7 = inlined_call_operand.vmem [shape: f32[1,40], index: 7, kind: input, shape index: {}]   ;;  %s9142_s8 = inlined_call_operand.vmem [shape: bf16[20,400], index: 8, kind: input, shape index: {}]   ;;  %s9143_s9 = inlined_call_operand.vmem [shape: f32[1,400], index: 9, kind: input, shape index: {}]   ;;  %s9144_s10 = inlined_call_operand.vmem [shape: bf16[400,400], index: 10, kind: input, shape index: {}]   ;;  %s9145_s11 = inlined_call_operand.vmem [shape: f32[1,400], index: 11, kind: input, shape index: {}]   ;;  %s9146_s12 = inlined_call_operand.vmem [shape: bf16[400,784], index: 12, kind: input, shape index: {}]   ;;  %s9147_s13 = inlined_call_operand.vmem [shape: f32[1,784], index: 13, kind: input, shape index: {}]   ;;  %s9148_s14 = inlined_call_operand.hbm [shape: f32[2,40], index: 14, kind: output, shape index: {0}]   ;;  %s9149_s15 = inlined_call_operand.hbm [shape: f32[1,2,20], index: 15, kind: output, shape index: {1}]   ;;  %s9150_s16 = inlined_call_operand.hbm [shape: bf16[1,2,784], index: 16, kind: output, shape index: {2}]  }
   0x1   :  { %9151 = sst [smem:[#allocation9_spill]] %s9134_s0 }
   0x2   :  { %22 = vsyncpa [#allocation3], 0  ;;  %v6041_v0 = vld [vmem:[%s9136_s2 + $0x4] ss:$16 sps:$4 sm:$0xff]   ;;  %v252_v1 = vlaneseq  ;;  %v6043_v2 = vld [vmem:[%s9136_s2] ss:$16 sps:$4 sm:$0xff]  }
   0x3   :  { %v6993_v3 = vmov 0   ;;  %1311 = vmatprep.subr.bf16.mxu0 %v6041_v0  ;;  %v6044_v4 = vld [vmem:[%s9136_s2 + $0x24] ss:$16 sps:$4 sm:$0xff]   ;;  %v6046_v5 = vld [vmem:[%s9136_s2 + $0x20] ss:$16 sps:$4 sm:$0xff]   ;;  %s9152_s24 = sld [smem:[#allocation9_spill]] }
   0x4   :  { %1466 = vmatprep.mubr.bf16.mxu1 %v6993_v3  ;;  %v7098_v6 = vshrl.u32 %v252_v1, 7  ;;  %v6994_v7 = vmov 1966171168   ;;  %1312 = vmatpush1.bf16.msra.mxu0 %v6043_v2  ;;  %v6047_v9 = vld [vmem:[%s9136_s2 + $0x604] ss:$16 sps:$4 sm:$0xff]   ;;  %vm1307_vm0 = vcmask 130048  }
   0x5   :  { %v275_v8 = vunpack.c.l.s4 %v6994_v7  ;;  %v6049_v10 = vld [vmem:[%s9136_s2 + $0x600] ss:$16 sps:$4 sm:$0xff]   ;;  %1313 = vmatprep.subr.bf16.mxu0 %v6044_v4  ;;  %v6050_v11 = vld [vmem:[%s9136_s2 + $0x44] ss:$16 sps:$4 sm:$0xff]   ;;  %1434 = vmatprep.subr.bf16.mxu1 %v6047_v9  ;;  %v6055_v13 = vld [vmem:[%s9136_s2 + $0xc] ss:$16 sps:$4 sm:$0xff]  }
   0x6   :  { %1435 = vmatpush1.bf16.msra.mxu1 %v6049_v10  ;;  %v6052_v16 = vld [vmem:[%s9136_s2 + $0x40] ss:$16 sps:$4 sm:$0xff]   ;;  %v6057_v18 = vld [vmem:[%s9136_s2 + $0x64] ss:$16 sps:$4 sm:$0xff]   ;;  %v6053_v21 = vld [vmem:[%s9136_s2 + $0x8] ss:$16 sps:$4 sm:$0xff]  }
   0x7   :  { %v276_v12 = vunpack.c.0.s8 %v275_v8  ;;  %1475 = vmatprep.subr.bf16.mxu1 %v6055_v13  ;;  %v6059_v24 = vld [vmem:[%s9136_s2 + $0x60] ss:$16 sps:$4 sm:$0xff]   ;;  %v6063_v25 = vld [vmem:[%s9136_s2 + $0x84] ss:$16 sps:$4 sm:$0xff]   ;;  %v6062_v28 = vld [vmem:[%s9136_s2 + $0x2c] ss:$16 sps:$4 sm:$0xff]  }
   0x8   :  { %1314 = vmatpush1.bf16.msra.mxu0 %v6046_v5  ;;  %v6060_v29 = vld [vmem:[%s9136_s2 + $0x28] ss:$16 sps:$4 sm:$0xff]   ;;  %v6065_v30 = vld [vmem:[%s9136_s2 + $0x80] ss:$16 sps:$4 sm:$0xff]   ;;  %v6069_v31 = vld [vmem:[%s9136_s2 + $0xa4] ss:$16 sps:$4 sm:$0xff]  }
   0x9   :  { %v53_v14 = vld [vmem:[%s9152_s24] sm:$0x7f]  ;;  %v7116_v15 = vsub.s32 %v276_v12, %v7098_v6  ;;  %1315 = vmatprep.subr.bf16.mxu0 %v6050_v11  ;;  %v6068_v32 = vld [vmem:[%s9136_s2 + $0x4c] ss:$16 sps:$4 sm:$0xff]   ;;  %v6066_v33 = vld [vmem:[%s9136_s2 + $0x48] ss:$16 sps:$4 sm:$0xff]  }
   0xa   :  { %v273_v17 = vcombine.high %v53_v14, %v53_v14  ;;  %v6071_v34 = vld [vmem:[%s9136_s2 + $0xa0] ss:$16 sps:$4 sm:$0xff]   ;;  %v6075_v35 = vld [vmem:[%s9136_s2 + $0xc4] ss:$16 sps:$4 sm:$0xff]   ;;  %v6074_v36 = vld [vmem:[%s9136_s2 + $0x6c] ss:$16 sps:$4 sm:$0xff]  }
   0xb   :  { %v7125_v19 = vrot.slane %v53_v14, %v7116_v15  ;;  %v6072_v37 = vld [vmem:[%s9136_s2 + $0x68] ss:$16 sps:$4 sm:$0xff]   ;;  %v6077_v38 = vld [vmem:[%s9136_s2 + $0xc0] ss:$16 sps:$4 sm:$0xff]   ;;  %v6081_v39 = vld [vmem:[%s9136_s2 + $0xe4] ss:$16 sps:$4 sm:$0xff]  }
   0xc   :  { %v7128_v20 = vrot.slane %v273_v17, %v7116_v15  ;;  %1316 = vmatpush1.bf16.msra.mxu0 %v6052_v16  ;;  %v6080_v40 = vld [vmem:[%s9136_s2 + $0x8c] ss:$16 sps:$4 sm:$0xff]   ;;  %v6078_v41 = vld [vmem:[%s9136_s2 + $0x88] ss:$16 sps:$4 sm:$0xff]   ;;  %v6083_v42 = vld [vmem:[%s9136_s2 + $0xe0] ss:$16 sps:$4 sm:$0xff]  }
   0xd   :  { %v288_v22 = vcombine.high %v7125_v19, %v7125_v19  ;;  %1317 = vmatprep.subr.bf16.mxu0 %v6057_v18  ;;  %v6087_v43 = vld [vmem:[%s9136_s2 + $0x104] ss:$16 sps:$4 sm:$0xff]   ;;  %v6086_v44 = vld [vmem:[%s9136_s2 + $0xac] ss:$16 sps:$4 sm:$0xff]   ;;  %v6084_v45 = vld [vmem:[%s9136_s2 + $0xa8] ss:$16 sps:$4 sm:$0xff]   ;;  %v7308_v17 = vrot.slane %v7125_v19, %v7116_v15 }
   0xe   :  { %v7137_v23 = vrot.slane %v7128_v20, %v7116_v15  ;;  %v6089_v46 = vld [vmem:[%s9136_s2 + $0x100] ss:$16 sps:$4 sm:$0xff]   ;;  %v6093_v47 = vld [vmem:[%s9136_s2 + $0x124] ss:$16 sps:$4 sm:$0xff]   ;;  %v6092_v48 = vld [vmem:[%s9136_s2 + $0xcc] ss:$16 sps:$4 sm:$0xff]  }
   0xf   :  { %v7146_v26 = vrot.slane %v288_v22, %v7116_v15  ;;  %v6090_v49 = vld [vmem:[%s9136_s2 + $0xc8] ss:$16 sps:$4 sm:$0xff]   ;;  %v6095_v50 = vld [vmem:[%s9136_s2 + $0x120] ss:$16 sps:$4 sm:$0xff]   ;;  %v6099_v51 = vld [vmem:[%s9136_s2 + $0x144] ss:$16 sps:$4 sm:$0xff]  }
  0x10   :  { %v7150_v27 = vcombine.high %v7137_v23, %v7137_v23  ;;  %1318 = vmatpush1.bf16.msra.mxu0 %v6059_v24  ;;  %v6098_v52 = vld [vmem:[%s9136_s2 + $0xec] ss:$16 sps:$4 sm:$0xff]   ;;  %v6096_v53 = vld [vmem:[%s9136_s2 + $0xe8] ss:$16 sps:$4 sm:$0xff]   ;;  %v6101_v54 = vld [vmem:[%s9136_s2 + $0x140] ss:$16 sps:$4 sm:$0xff]  }
  0x11   :  { %1343 = vmatprep.mubr.bf16.mxu0 %v7146_v26  ;;  %1319 = vmatprep.subr.bf16.mxu0 %v6063_v25  ;;  %v6105_v55 = vld [vmem:[%s9136_s2 + $0x164] ss:$16 sps:$4 sm:$0xff]   ;;  %v6104_v56 = vld [vmem:[%s9136_s2 + $0x10c] ss:$16 sps:$4 sm:$0xff]   ;;  %v6102_v57 = vld [vmem:[%s9136_s2 + $0x108] ss:$16 sps:$4 sm:$0xff]  }
  0x12   :  { %5495 = vmatmul.mubr.msk.bf16.vlgmr.msra.gmra.mrb[0].mxu1 %vm1307_vm0, %v7150_v27  ;;  %v6107_v58 = vld [vmem:[%s9136_s2 + $0x160] ss:$16 sps:$4 sm:$0xff]   ;;  %v6111_v59 = vld [vmem:[%s9136_s2 + $0x184] ss:$16 sps:$4 sm:$0xff]   ;;  %v6110_v60 = vld [vmem:[%s9136_s2 + $0x12c] ss:$16 sps:$4 sm:$0xff]  }
  0x13   :  { %1476 = vmatpush1.bf16.msra.mxu1 %v6053_v21  ;;  %1507 = vmatprep.mubr.bf16.mxu1 %v7146_v26  ;;  %v6108_v61 = vld [vmem:[%s9136_s2 + $0x128] ss:$16 sps:$4 sm:$0xff]   ;;  %v6113_v62 = vld [vmem:[%s9136_s2 + $0x180] ss:$16 sps:$4 sm:$0xff]   ;;  %v6117_v63 = vld [vmem:[%s9136_s2 + $0x1a4] ss:$16 sps:$4 sm:$0xff]   ;;  %v320_v21 = vcombine.high %v7146_v26, %v7146_v26 }
  0x14   :  { %1477 = vmatprep.subr.bf16.mxu1 %v6062_v28  ;;  %1320 = vmatpush1.bf16.msra.mxu0 %v6065_v30  ;;  %v6116_v0 = vld [vmem:[%s9136_s2 + $0x14c] ss:$16 sps:$4 sm:$0xff]   ;;  %v6114_v1 = vld [vmem:[%s9136_s2 + $0x148] ss:$16 sps:$4 sm:$0xff]   ;;  %v6119_v2 = vld [vmem:[%s9136_s2 + $0x1a0] ss:$16 sps:$4 sm:$0xff]  }
  0x15   :  { %1321 = vmatprep.subr.bf16.mxu0 %v6069_v31  ;;  %v6123_v4 = vld [vmem:[%s9136_s2 + $0x1c4] ss:$16 sps:$4 sm:$0xff]   ;;  %v6122_v5 = vld [vmem:[%s9136_s2 + $0x16c] ss:$16 sps:$4 sm:$0xff]   ;;  %v6120_v7 = vld [vmem:[%s9136_s2 + $0x168] ss:$16 sps:$4 sm:$0xff]  }
  0x16   :  { %v6125_v8 = vld [vmem:[%s9136_s2 + $0x1c0] ss:$16 sps:$4 sm:$0xff]   ;;  %v6129_v9 = vld [vmem:[%s9136_s2 + $0x1e4] ss:$16 sps:$4 sm:$0xff]   ;;  %v6128_v10 = vld [vmem:[%s9136_s2 + $0x18c] ss:$16 sps:$4 sm:$0xff]  }
  0x17   :  { %1478 = vmatpush1.bf16.msra.mxu1 %v6060_v29  ;;  %v6126_v11 = vld [vmem:[%s9136_s2 + $0x188] ss:$16 sps:$4 sm:$0xff]   ;;  %v6131_v12 = vld [vmem:[%s9136_s2 + $0x1e0] ss:$16 sps:$4 sm:$0xff]   ;;  %v6137_v13 = vld [vmem:[%s9136_s2 + $0x204] ss:$16 sps:$4 sm:$0xff]  }
  0x18   :  { %1479 = vmatprep.subr.bf16.mxu1 %v6068_v32  ;;  %1322 = vmatpush1.bf16.msra.mxu0 %v6071_v34  ;;  %v6134_v14 = vld [vmem:[%s9136_s2 + $0x1ac] ss:$16 sps:$4 sm:$0xff]   ;;  %v6132_v16 = vld [vmem:[%s9136_s2 + $0x1a8] ss:$16 sps:$4 sm:$0xff]   ;;  %v6135_v18 = vld [vmem:[%s9136_s2 + $0x200] ss:$16 sps:$4 sm:$0xff]  }
  0x19   :  { %1323 = vmatprep.subr.bf16.mxu0 %v6075_v35  ;;  %v6143_v22 = vld [vmem:[%s9136_s2 + $0x224] ss:$16 sps:$4 sm:$0xff]   ;;  %v6140_v19 = vld [vmem:[%s9136_s2 + $0x1cc] ss:$16 sps:$4 sm:$0xff]   ;;  %v6138_v24 = vld [vmem:[%s9136_s2 + $0x1c8] ss:$16 sps:$4 sm:$0xff]  }
  0x1a   :  { %v6141_v25 = vld [vmem:[%s9136_s2 + $0x220] ss:$16 sps:$4 sm:$0xff]   ;;  %v6149_v26 = vld [vmem:[%s9136_s2 + $0x244] ss:$16 sps:$4 sm:$0xff]   ;;  %v6146_v28 = vld [vmem:[%s9136_s2 + $0x1ec] ss:$16 sps:$4 sm:$0xff]  }
  0x1b   :  { %1480 = vmatpush1.bf16.msra.mxu1 %v6066_v33  ;;  %v6144_v29 = vld [vmem:[%s9136_s2 + $0x1e8] ss:$16 sps:$4 sm:$0xff]   ;;  %v6147_v30 = vld [vmem:[%s9136_s2 + $0x240] ss:$16 sps:$4 sm:$0xff]   ;;  %v6155_v31 = vld [vmem:[%s9136_s2 + $0x264] ss:$16 sps:$4 sm:$0xff]  }
  0x1c   :  { %1481 = vmatprep.subr.bf16.mxu1 %v6074_v36  ;;  %1324 = vmatpush1.bf16.msra.mxu0 %v6077_v38  ;;  %v6152_v32 = vld [vmem:[%s9136_s2 + $0x20c] ss:$16 sps:$4 sm:$0xff]   ;;  %v6150_v33 = vld [vmem:[%s9136_s2 + $0x208] ss:$16 sps:$4 sm:$0xff]   ;;  %v6153_v34 = vld [vmem:[%s9136_s2 + $0x260] ss:$16 sps:$4 sm:$0xff]  }
  0x1d   :  { %1325 = vmatprep.subr.bf16.mxu0 %v6081_v39  ;;  %v6161_v35 = vld [vmem:[%s9136_s2 + $0x284] ss:$16 sps:$4 sm:$0xff]   ;;  %v6158_v36 = vld [vmem:[%s9136_s2 + $0x22c] ss:$16 sps:$4 sm:$0xff]   ;;  %v6159_v38 = vld [vmem:[%s9136_s2 + $0x280] ss:$16 sps:$4 sm:$0xff]  }
  0x1e   :  { %v6167_v39 = vld [vmem:[%s9136_s2 + $0x2a4] ss:$16 sps:$4 sm:$0xff]  }
  0x1f   :  { %1482 = vmatpush1.bf16.msra.mxu1 %v6072_v37  ;;  %v6156_v37 = vld [vmem:[%s9136_s2 + $0x228] ss:$16 sps:$4 sm:$0xff]  }
  0x20   :  { %1483 = vmatprep.subr.bf16.mxu1 %v6080_v40  ;;  %1326 = vmatpush1.bf16.msra.mxu0 %v6083_v42  ;;  %v6164_v40 = vld [vmem:[%s9136_s2 + $0x24c] ss:$16 sps:$4 sm:$0xff]   ;;  %v6165_v42 = vld [vmem:[%s9136_s2 + $0x2a0] ss:$16 sps:$4 sm:$0xff]  }
  0x21   :  { %1327 = vmatprep.subr.bf16.mxu0 %v6087_v43  ;;  %v6173_v43 = vld [vmem:[%s9136_s2 + $0x2c4] ss:$16 sps:$4 sm:$0xff]  }
  0x23   :  { %1484 = vmatpush1.bf16.msra.mxu1 %v6078_v41  ;;  %v6162_v41 = vld [vmem:[%s9136_s2 + $0x248] ss:$16 sps:$4 sm:$0xff]  }
  0x24   :  { %1485 = vmatprep.subr.bf16.mxu1 %v6086_v44  ;;  %1328 = vmatpush1.bf16.msra.mxu0 %v6089_v46  ;;  %v6170_v44 = vld [vmem:[%s9136_s2 + $0x26c] ss:$16 sps:$4 sm:$0xff]   ;;  %v6171_v46 = vld [vmem:[%s9136_s2 + $0x2c0] ss:$16 sps:$4 sm:$0xff]  }
  0x25   :  { %1329 = vmatprep.subr.bf16.mxu0 %v6093_v47  ;;  %v6179_v47 = vld [vmem:[%s9136_s2 + $0x2e4] ss:$16 sps:$4 sm:$0xff]  }
  0x27   :  { %1486 = vmatpush1.bf16.msra.mxu1 %v6084_v45  ;;  %v6168_v45 = vld [vmem:[%s9136_s2 + $0x268] ss:$16 sps:$4 sm:$0xff]  }
  0x28   :  { %1487 = vmatprep.subr.bf16.mxu1 %v6092_v48  ;;  %1330 = vmatpush1.bf16.msra.mxu0 %v6095_v50  ;;  %v6176_v48 = vld [vmem:[%s9136_s2 + $0x28c] ss:$16 sps:$4 sm:$0xff]   ;;  %v6177_v50 = vld [vmem:[%s9136_s2 + $0x2e0] ss:$16 sps:$4 sm:$0xff]  }
  0x29   :  { %1331 = vmatprep.subr.bf16.mxu0 %v6099_v51  ;;  %v6185_v51 = vld [vmem:[%s9136_s2 + $0x304] ss:$16 sps:$4 sm:$0xff]  }
  0x2b   :  { %1488 = vmatpush1.bf16.msra.mxu1 %v6090_v49  ;;  %v6174_v49 = vld [vmem:[%s9136_s2 + $0x288] ss:$16 sps:$4 sm:$0xff]  }
  0x2c   :  { %1489 = vmatprep.subr.bf16.mxu1 %v6098_v52  ;;  %1332 = vmatpush1.bf16.msra.mxu0 %v6101_v54  ;;  %v6182_v52 = vld [vmem:[%s9136_s2 + $0x2ac] ss:$16 sps:$4 sm:$0xff]   ;;  %v6183_v54 = vld [vmem:[%s9136_s2 + $0x300] ss:$16 sps:$4 sm:$0xff]  }
  0x2d   :  { %1333 = vmatprep.subr.bf16.mxu0 %v6105_v55  ;;  %v6191_v55 = vld [vmem:[%s9136_s2 + $0x324] ss:$16 sps:$4 sm:$0xff]  }
  0x2f   :  { %1490 = vmatpush1.bf16.msra.mxu1 %v6096_v53  ;;  %v6180_v53 = vld [vmem:[%s9136_s2 + $0x2a8] ss:$16 sps:$4 sm:$0xff]  }
  0x30   :  { %1491 = vmatprep.subr.bf16.mxu1 %v6104_v56  ;;  %1334 = vmatpush1.bf16.msra.mxu0 %v6107_v58  ;;  %v6188_v56 = vld [vmem:[%s9136_s2 + $0x2cc] ss:$16 sps:$4 sm:$0xff]   ;;  %v6189_v58 = vld [vmem:[%s9136_s2 + $0x320] ss:$16 sps:$4 sm:$0xff]  }
  0x31   :  { %1335 = vmatprep.subr.bf16.mxu0 %v6111_v59  ;;  %v6197_v59 = vld [vmem:[%s9136_s2 + $0x344] ss:$16 sps:$4 sm:$0xff]  }
  0x33   :  { %1492 = vmatpush1.bf16.msra.mxu1 %v6102_v57  ;;  %v6186_v57 = vld [vmem:[%s9136_s2 + $0x2c8] ss:$16 sps:$4 sm:$0xff]  }
  0x34   :  { %1493 = vmatprep.subr.bf16.mxu1 %v6110_v60  ;;  %1336 = vmatpush1.bf16.msra.mxu0 %v6113_v62  ;;  %v6194_v60 = vld [vmem:[%s9136_s2 + $0x2ec] ss:$16 sps:$4 sm:$0xff]   ;;  %v6195_v62 = vld [vmem:[%s9136_s2 + $0x340] ss:$16 sps:$4 sm:$0xff]  }
  0x35   :  { %1337 = vmatprep.subr.bf16.mxu0 %v6117_v63  ;;  %v6203_v63 = vld [vmem:[%s9136_s2 + $0x364] ss:$16 sps:$4 sm:$0xff]  }
  0x37   :  { %1494 = vmatpush1.bf16.msra.mxu1 %v6108_v61  ;;  %v6192_v61 = vld [vmem:[%s9136_s2 + $0x2e8] ss:$16 sps:$4 sm:$0xff]  }
  0x38   :  { %1495 = vmatprep.subr.bf16.mxu1 %v6116_v0  ;;  %1338 = vmatpush1.bf16.msra.mxu0 %v6119_v2  ;;  %v6200_v0 = vld [vmem:[%s9136_s2 + $0x30c] ss:$16 sps:$4 sm:$0xff]   ;;  %v6201_v2 = vld [vmem:[%s9136_s2 + $0x360] ss:$16 sps:$4 sm:$0xff]  }
  0x39   :  { %1339 = vmatprep.subr.bf16.mxu0 %v6123_v4  ;;  %v6209_v4 = vld [vmem:[%s9136_s2 + $0x384] ss:$16 sps:$4 sm:$0xff]  }
  0x3b   :  { %1496 = vmatpush1.bf16.msra.mxu1 %v6114_v1  ;;  %v6198_v1 = vld [vmem:[%s9136_s2 + $0x308] ss:$16 sps:$4 sm:$0xff]  }
  0x3c   :  { %1497 = vmatprep.subr.bf16.mxu1 %v6122_v5  ;;  %1340 = vmatpush1.bf16.msra.mxu0 %v6125_v8  ;;  %v6206_v5 = vld [vmem:[%s9136_s2 + $0x32c] ss:$16 sps:$4 sm:$0xff]   ;;  %v6207_v8 = vld [vmem:[%s9136_s2 + $0x380] ss:$16 sps:$4 sm:$0xff]  }
  0x3d   :  { %1341 = vmatprep.subr.bf16.mxu0 %v6129_v9  ;;  %v6215_v9 = vld [vmem:[%s9136_s2 + $0x3a4] ss:$16 sps:$4 sm:$0xff]  }
  0x3f   :  { %1498 = vmatpush1.bf16.msra.mxu1 %v6120_v7  ;;  %v6204_v7 = vld [vmem:[%s9136_s2 + $0x328] ss:$16 sps:$4 sm:$0xff]  }
  0x40   :  { %1499 = vmatprep.subr.bf16.mxu1 %v6128_v10  ;;  %1342 = vmatpush1.bf16.msra.mxu0 %v6131_v12  ;;  %v6212_v10 = vld [vmem:[%s9136_s2 + $0x34c] ss:$16 sps:$4 sm:$0xff]   ;;  %v6213_v12 = vld [vmem:[%s9136_s2 + $0x3a0] ss:$16 sps:$4 sm:$0xff]  }
  0x41   :  { %1352 = vmatprep.subr.bf16.mxu0 %v6137_v13  ;;  %v6221_v13 = vld [vmem:[%s9136_s2 + $0x3c4] ss:$16 sps:$4 sm:$0xff]  }
  0x43   :  { %1500 = vmatpush1.bf16.msra.mxu1 %v6126_v11  ;;  %1344 = vmatmul.mubr.bf16.vlgmr.msra.gmra.mrb[0].mxu0 %v7308_v17  ;;  %v6210_v11 = vld [vmem:[%s9136_s2 + $0x348] ss:$16 sps:$4 sm:$0xff]  }
  0x44   :  { %1501 = vmatprep.subr.bf16.mxu1 %v6134_v14  ;;  %1353 = vmatpush1.bf16.msra.mxu0 %v6135_v18  ;;  %v6218_v14 = vld [vmem:[%s9136_s2 + $0x36c] ss:$16 sps:$4 sm:$0xff]   ;;  %v6219_v18 = vld [vmem:[%s9136_s2 + $0x3c0] ss:$16 sps:$4 sm:$0xff]  }
  0x45   :  { %1384 = vmatprep.mubr.bf16.mxu0 %v320_v21  ;;  %1354 = vmatprep.subr.bf16.mxu0 %v6143_v22  ;;  %v6224_v22 = vld [vmem:[%s9136_s2 + $0x38c] ss:$16 sps:$4 sm:$0xff]  }
  0x47   :  { %1502 = vmatpush1.bf16.msra.mxu1 %v6132_v16  ;;  %v6216_v16 = vld [vmem:[%s9136_s2 + $0x368] ss:$16 sps:$4 sm:$0xff]  }
  0x48   :  { %1503 = vmatprep.subr.bf16.mxu1 %v6140_v19  ;;  %1355 = vmatpush1.bf16.msra.mxu0 %v6141_v25  ;;  %v6222_v19 = vld [vmem:[%s9136_s2 + $0x388] ss:$16 sps:$4 sm:$0xff]   ;;  %v289_v25 = vcombine.high %v7128_v20, %v7128_v20  ;;  %v6231_v20 = vld [vmem:[%s9136_s2 + $0x400] ss:$16 sps:$4 sm:$0xff]  }
  0x49   :  { %1356 = vmatprep.subr.bf16.mxu0 %v6149_v26  ;;  %v6233_v26 = vld [vmem:[%s9136_s2 + $0x404] ss:$16 sps:$4 sm:$0xff]  }
  0x4b   :  { %1504 = vmatpush1.bf16.msra.mxu1 %v6138_v24  ;;  %v6225_v24 = vld [vmem:[%s9136_s2 + $0x3e0] ss:$16 sps:$4 sm:$0xff]  }
  0x4c   :  { %1505 = vmatprep.subr.bf16.mxu1 %v6146_v28  ;;  %1357 = vmatpush1.bf16.msra.mxu0 %v6147_v30  ;;  %v6230_v28 = vld [vmem:[%s9136_s2 + $0x3ac] ss:$16 sps:$4 sm:$0xff]   ;;  %v318_v30 = vcombine.high %v7308_v17, %v7308_v17 }
  0x4d   :  { %1358 = vmatprep.subr.bf16.mxu0 %v6155_v31  ;;  %v317_v31 = vrot.slane %v289_v25, %v7116_v15  ;;  %v6317_v25 = vld [vmem:[%s9136_s2 + $0x5c4] ss:$16 sps:$4 sm:$0xff]  }
  0x4f   :  { %1506 = vmatpush1.bf16.msra.mxu1 %v6144_v29  ;;  %v6228_v29 = vld [vmem:[%s9136_s2 + $0x3a8] ss:$16 sps:$4 sm:$0xff]  }
  0x50   :  { %1516 = vmatprep.subr.bf16.mxu1 %v6152_v32  ;;  %1359 = vmatpush1.bf16.msra.mxu0 %v6153_v34  ;;  %v6239_v32 = vld [vmem:[%s9136_s2 + $0x424] ss:$16 sps:$4 sm:$0xff]   ;;  %v6237_v34 = vld [vmem:[%s9136_s2 + $0x420] ss:$16 sps:$4 sm:$0xff]  }
  0x51   :  { %1360 = vmatprep.subr.bf16.mxu0 %v6161_v35  ;;  %v6245_v35 = vld [vmem:[%s9136_s2 + $0x444] ss:$16 sps:$4 sm:$0xff]  }
  0x52   :  { %1508 = vmatmul.mubr.bf16.vlgmr.msra.gmra.mrb[4].mxu1 %v7308_v17  ;;  %v6234_v17 = vld [vmem:[%s9136_s2 + $0x3c8] ss:$16 sps:$4 sm:$0xff]  }
  0x53   :  { %1517 = vmatpush1.bf16.msra.mxu1 %v6150_v33  ;;  %1548 = vmatprep.mubr.bf16.mxu1 %v320_v21  ;;  %v6227_v21 = vld [vmem:[%s9136_s2 + $0x3e4] ss:$16 sps:$4 sm:$0xff]   ;;  %v6236_v33 = vld [vmem:[%s9136_s2 + $0x3cc] ss:$16 sps:$4 sm:$0xff]  }
  0x54   :  { %1518 = vmatprep.subr.bf16.mxu1 %v6158_v36  ;;  %1361 = vmatpush1.bf16.msra.mxu0 %v6159_v38  ;;  %v6242_v36 = vld [vmem:[%s9136_s2 + $0x3ec] ss:$16 sps:$4 sm:$0xff]   ;;  %v6243_v38 = vld [vmem:[%s9136_s2 + $0x440] ss:$16 sps:$4 sm:$0xff]  }
  0x55   :  { %1362 = vmatprep.subr.bf16.mxu0 %v6167_v39  ;;  %v6251_v39 = vld [vmem:[%s9136_s2 + $0x464] ss:$16 sps:$4 sm:$0xff]  }
  0x57   :  { %1519 = vmatpush1.bf16.msra.mxu1 %v6156_v37  ;;  %v6240_v37 = vld [vmem:[%s9136_s2 + $0x3e8] ss:$16 sps:$4 sm:$0xff]  }
  0x58   :  { %1520 = vmatprep.subr.bf16.mxu1 %v6164_v40  ;;  %1363 = vmatpush1.bf16.msra.mxu0 %v6165_v42  ;;  %v6248_v40 = vld [vmem:[%s9136_s2 + $0x40c] ss:$16 sps:$4 sm:$0xff]   ;;  %v6249_v42 = vld [vmem:[%s9136_s2 + $0x460] ss:$16 sps:$4 sm:$0xff]  }
  0x59   :  { %1364 = vmatprep.subr.bf16.mxu0 %v6173_v43  ;;  %v6257_v43 = vld [vmem:[%s9136_s2 + $0x484] ss:$16 sps:$4 sm:$0xff]  }
  0x5b   :  { %1521 = vmatpush1.bf16.msra.mxu1 %v6162_v41  ;;  %v6246_v41 = vld [vmem:[%s9136_s2 + $0x408] ss:$16 sps:$4 sm:$0xff]  }
  0x5c   :  { %1522 = vmatprep.subr.bf16.mxu1 %v6170_v44  ;;  %1365 = vmatpush1.bf16.msra.mxu0 %v6171_v46  ;;  %v6254_v44 = vld [vmem:[%s9136_s2 + $0x42c] ss:$16 sps:$4 sm:$0xff]   ;;  %v6255_v46 = vld [vmem:[%s9136_s2 + $0x480] ss:$16 sps:$4 sm:$0xff]  }
  0x5d   :  { %1366 = vmatprep.subr.bf16.mxu0 %v6179_v47  ;;  %v6263_v47 = vld [vmem:[%s9136_s2 + $0x4a4] ss:$16 sps:$4 sm:$0xff]  }
  0x5f   :  { %1523 = vmatpush1.bf16.msra.mxu1 %v6168_v45  ;;  %v6252_v45 = vld [vmem:[%s9136_s2 + $0x428] ss:$16 sps:$4 sm:$0xff]  }
  0x60   :  { %1524 = vmatprep.subr.bf16.mxu1 %v6176_v48  ;;  %1367 = vmatpush1.bf16.msra.mxu0 %v6177_v50  ;;  %v6260_v48 = vld [vmem:[%s9136_s2 + $0x44c] ss:$16 sps:$4 sm:$0xff]   ;;  %v6261_v50 = vld [vmem:[%s9136_s2 + $0x4a0] ss:$16 sps:$4 sm:$0xff]  }
  0x61   :  { %1368 = vmatprep.subr.bf16.mxu0 %v6185_v51  ;;  %v6269_v51 = vld [vmem:[%s9136_s2 + $0x4c4] ss:$16 sps:$4 sm:$0xff]  }
  0x63   :  { %1525 = vmatpush1.bf16.msra.mxu1 %v6174_v49  ;;  %v6258_v49 = vld [vmem:[%s9136_s2 + $0x448] ss:$16 sps:$4 sm:$0xff]  }
  0x64   :  { %1526 = vmatprep.subr.bf16.mxu1 %v6182_v52  ;;  %1369 = vmatpush1.bf16.msra.mxu0 %v6183_v54  ;;  %v6266_v52 = vld [vmem:[%s9136_s2 + $0x46c] ss:$16 sps:$4 sm:$0xff]   ;;  %v6267_v54 = vld [vmem:[%s9136_s2 + $0x4c0] ss:$16 sps:$4 sm:$0xff]  }
  0x65   :  { %1370 = vmatprep.subr.bf16.mxu0 %v6191_v55  ;;  %v6275_v55 = vld [vmem:[%s9136_s2 + $0x4e4] ss:$16 sps:$4 sm:$0xff]  }
  0x67   :  { %1527 = vmatpush1.bf16.msra.mxu1 %v6180_v53  ;;  %v6264_v53 = vld [vmem:[%s9136_s2 + $0x468] ss:$16 sps:$4 sm:$0xff]  }
  0x68   :  { %1528 = vmatprep.subr.bf16.mxu1 %v6188_v56  ;;  %1371 = vmatpush1.bf16.msra.mxu0 %v6189_v58  ;;  %v6272_v56 = vld [vmem:[%s9136_s2 + $0x48c] ss:$16 sps:$4 sm:$0xff]   ;;  %v6273_v58 = vld [vmem:[%s9136_s2 + $0x4e0] ss:$16 sps:$4 sm:$0xff]  }
  0x69   :  { %1372 = vmatprep.subr.bf16.mxu0 %v6197_v59  ;;  %v6281_v59 = vld [vmem:[%s9136_s2 + $0x504] ss:$16 sps:$4 sm:$0xff]  }
  0x6b   :  { %1529 = vmatpush1.bf16.msra.mxu1 %v6186_v57  ;;  %v6270_v57 = vld [vmem:[%s9136_s2 + $0x488] ss:$16 sps:$4 sm:$0xff]  }
  0x6c   :  { %1530 = vmatprep.subr.bf16.mxu1 %v6194_v60  ;;  %1373 = vmatpush1.bf16.msra.mxu0 %v6195_v62  ;;  %v6278_v60 = vld [vmem:[%s9136_s2 + $0x4ac] ss:$16 sps:$4 sm:$0xff]   ;;  %v6279_v62 = vld [vmem:[%s9136_s2 + $0x500] ss:$16 sps:$4 sm:$0xff]  }
  0x6d   :  { %1374 = vmatprep.subr.bf16.mxu0 %v6203_v63  ;;  %v6287_v63 = vld [vmem:[%s9136_s2 + $0x524] ss:$16 sps:$4 sm:$0xff]  }
  0x6f   :  { %1531 = vmatpush1.bf16.msra.mxu1 %v6192_v61  ;;  %v6276_v61 = vld [vmem:[%s9136_s2 + $0x4a8] ss:$16 sps:$4 sm:$0xff]  }
  0x70   :  { %1532 = vmatprep.subr.bf16.mxu1 %v6200_v0  ;;  %1375 = vmatpush1.bf16.msra.mxu0 %v6201_v2  ;;  %v6284_v0 = vld [vmem:[%s9136_s2 + $0x4cc] ss:$16 sps:$4 sm:$0xff]   ;;  %v6285_v2 = vld [vmem:[%s9136_s2 + $0x520] ss:$16 sps:$4 sm:$0xff]  }
  0x71   :  { %1376 = vmatprep.subr.bf16.mxu0 %v6209_v4  ;;  %v6293_v4 = vld [vmem:[%s9136_s2 + $0x544] ss:$16 sps:$4 sm:$0xff]  }
  0x73   :  { %1533 = vmatpush1.bf16.msra.mxu1 %v6198_v1  ;;  %v6282_v1 = vld [vmem:[%s9136_s2 + $0x4c8] ss:$16 sps:$4 sm:$0xff]  }
  0x74   :  { %1534 = vmatprep.subr.bf16.mxu1 %v6206_v5  ;;  %1377 = vmatpush1.bf16.msra.mxu0 %v6207_v8  ;;  %v6290_v5 = vld [vmem:[%s9136_s2 + $0x4ec] ss:$16 sps:$4 sm:$0xff]   ;;  %v6291_v8 = vld [vmem:[%s9136_s2 + $0x540] ss:$16 sps:$4 sm:$0xff]  }
  0x75   :  { %1378 = vmatprep.subr.bf16.mxu0 %v6215_v9  ;;  %v6296_v9 = vld [vmem:[%s9136_s2 + $0x50c] ss:$16 sps:$4 sm:$0xff]  }
  0x77   :  { %1535 = vmatpush1.bf16.msra.mxu1 %v6204_v7  ;;  %v6288_v7 = vld [vmem:[%s9136_s2 + $0x4e8] ss:$16 sps:$4 sm:$0xff]  }
  0x78   :  { %1536 = vmatprep.subr.bf16.mxu1 %v6212_v10  ;;  %1379 = vmatpush1.bf16.msra.mxu0 %v6213_v12  ;;  %v6299_v10 = vld [vmem:[%s9136_s2 + $0x564] ss:$16 sps:$4 sm:$0xff]   ;;  %v6294_v12 = vld [vmem:[%s9136_s2 + $0x508] ss:$16 sps:$4 sm:$0xff]  }
  0x79   :  { %1380 = vmatprep.subr.bf16.mxu0 %v6221_v13  ;;  %v6305_v13 = vld [vmem:[%s9136_s2 + $0x584] ss:$16 sps:$4 sm:$0xff]  }
  0x7b   :  { %1537 = vmatpush1.bf16.msra.mxu1 %v6210_v11  ;;  %v6297_v11 = vld [vmem:[%s9136_s2 + $0x560] ss:$16 sps:$4 sm:$0xff]  }
  0x7c   :  { %1538 = vmatprep.subr.bf16.mxu1 %v6218_v14  ;;  %1381 = vmatpush1.bf16.msra.mxu0 %v6219_v18  ;;  %v6302_v14 = vld [vmem:[%s9136_s2 + $0x52c] ss:$16 sps:$4 sm:$0xff]   ;;  %v6300_v18 = vld [vmem:[%s9136_s2 + $0x528] ss:$16 sps:$4 sm:$0xff]  }
  0x7d   :  { %1382 = vmatprep.subr.bf16.mxu0 %v6227_v21  ;;  %v6311_v21 = vld [vmem:[%s9136_s2 + $0x5a4] ss:$16 sps:$4 sm:$0xff]  }
  0x7f   :  { %1539 = vmatpush1.bf16.msra.mxu1 %v6216_v16  ;;  %v6303_v16 = vld [vmem:[%s9136_s2 + $0x580] ss:$16 sps:$4 sm:$0xff]  }
  0x80   :  { %1540 = vmatprep.subr.bf16.mxu1 %v6224_v22  ;;  %1383 = vmatpush1.bf16.msra.mxu0 %v6225_v24  ;;  %v6308_v22 = vld [vmem:[%s9136_s2 + $0x54c] ss:$16 sps:$4 sm:$0xff]   ;;  %v6306_v24 = vld [vmem:[%s9136_s2 + $0x548] ss:$16 sps:$4 sm:$0xff]  }
  0x81   :  { %1393 = vmatprep.subr.bf16.mxu0 %v6233_v26  ;;  %v6314_v26 = vld [vmem:[%s9136_s2 + $0x56c] ss:$16 sps:$4 sm:$0xff]  }
  0x83   :  { %1541 = vmatpush1.bf16.msra.mxu1 %v6222_v19  ;;  %1385 = vmatmul.mubr.bf16.vlgmr.msra.gmra.mrb[0].mxu0 %v318_v30  ;;  %v6309_v19 = vld [vmem:[%s9136_s2 + $0x5a0] ss:$16 sps:$4 sm:$0xff]  }
  0x84   :  { %1542 = vmatprep.subr.bf16.mxu1 %v6230_v28  ;;  %1394 = vmatpush1.bf16.msra.mxu0 %v6231_v20  ;;  %v6315_v28 = vld [vmem:[%s9136_s2 + $0x5c0] ss:$16 sps:$4 sm:$0xff]   ;;  %v6320_v20 = vld [vmem:[%s9136_s2 + $0x58c] ss:$16 sps:$4 sm:$0xff]  }
  0x85   :  { %1425 = vmatprep.mubr.bf16.mxu0 %v317_v31  ;;  %1395 = vmatprep.subr.bf16.mxu0 %v6239_v32  ;;  %v6318_v32 = vld [vmem:[%s9136_s2 + $0x588] ss:$16 sps:$4 sm:$0xff]  }
  0x87   :  { %1543 = vmatpush1.bf16.msra.mxu1 %v6228_v29  ;;  %v6312_v29 = vld [vmem:[%s9136_s2 + $0x568] ss:$16 sps:$4 sm:$0xff]  }
  0x88   :  { %1544 = vmatprep.subr.bf16.mxu1 %v6236_v33  ;;  %1396 = vmatpush1.bf16.msra.mxu0 %v6237_v34  ;;  %v6338_v33 = vld [vmem:[%s9138_s4 + $0x4] ss:$16 sps:$4 sm:$0xff]   ;;  %v6336_v34 = vld [vmem:[%s9138_s4] ss:$16 sps:$4 sm:$0xff]  }
  0x89   :  { %1397 = vmatprep.subr.bf16.mxu0 %v6245_v35  ;;  %v6324_v35 = vld [vmem:[%s9136_s2 + $0x5a8] ss:$16 sps:$4 sm:$0xff]  }
  0x8b   :  { %1545 = vmatpush1.bf16.msra.mxu1 %v6234_v17  ;;  %v6326_v17 = vld [vmem:[%s9136_s2 + $0x5ac] ss:$16 sps:$4 sm:$0xff]  }
  0x8c   :  { %1546 = vmatprep.subr.bf16.mxu1 %v6242_v36  ;;  %1398 = vmatpush1.bf16.msra.mxu0 %v6243_v38  ;;  %v6344_v36 = vld [vmem:[%s9138_s4 + $0x24] ss:$16 sps:$4 sm:$0xff]   ;;  %v6342_v38 = vld [vmem:[%s9138_s4 + $0x20] ss:$16 sps:$4 sm:$0xff]  }
  0x8d   :  { %1399 = vmatprep.subr.bf16.mxu0 %v6251_v39  ;;  %v6327_v39 = vld [vmem:[%s9136_s2 + $0x5c8] ss:$16 sps:$4 sm:$0xff]  }
  0x8f   :  { %1547 = vmatpush1.bf16.msra.mxu1 %v6240_v37  ;;  %v6329_v37 = vld [vmem:[%s9136_s2 + $0x5cc] ss:$16 sps:$4 sm:$0xff]  }
  0x90   :  { %1557 = vmatprep.subr.bf16.mxu1 %v6248_v40  ;;  %1400 = vmatpush1.bf16.msra.mxu0 %v6249_v42  ;;  %v6350_v40 = vld [vmem:[%s9138_s4 + $0x44] ss:$16 sps:$4 sm:$0xff]   ;;  %v6348_v42 = vld [vmem:[%s9138_s4 + $0x40] ss:$16 sps:$4 sm:$0xff]  }
  0x91   :  { %1401 = vmatprep.subr.bf16.mxu0 %v6257_v43  ;;  %v6330_v43 = vld [vmem:[%s9136_s2 + $0x5e8] ss:$16 sps:$4 sm:$0xff]  }
  0x92   :  { %1549 = vmatmul.mubr.bf16.vlgmr.msra.gmra.mrb[4].mxu1 %v318_v30  ;;  %v6323_v30 = vld [vmem:[%s9136_s2 + $0x5e4] ss:$16 sps:$4 sm:$0xff]  }
  0x93   :  { %1558 = vmatpush1.bf16.msra.mxu1 %v6246_v41  ;;  %1589 = vmatprep.mubr.bf16.mxu1 %v317_v31  ;;  %v6321_v31 = vld [vmem:[%s9136_s2 + $0x5e0] ss:$16 sps:$4 sm:$0xff]   ;;  %v6332_v41 = vld [vmem:[%s9136_s2 + $0x5ec] ss:$16 sps:$4 sm:$0xff]  }
  0x94   :  { %1559 = vmatprep.subr.bf16.mxu1 %v6254_v44  ;;  %1402 = vmatpush1.bf16.msra.mxu0 %v6255_v46  ;;  %v6356_v44 = vld [vmem:[%s9138_s4 + $0x64] ss:$16 sps:$4 sm:$0xff]   ;;  %v6354_v46 = vld [vmem:[%s9138_s4 + $0x60] ss:$16 sps:$4 sm:$0xff]  }
  0x95   :  { %1403 = vmatprep.subr.bf16.mxu0 %v6263_v47  ;;  %v6333_v47 = vld [vmem:[%s9136_s2 + $0x608] ss:$16 sps:$4 sm:$0xff]  }
  0x97   :  { %1560 = vmatpush1.bf16.msra.mxu1 %v6252_v45  ;;  %v6335_v45 = vld [vmem:[%s9136_s2 + $0x60c] ss:$16 sps:$4 sm:$0xff]  }
  0x98   :  { %1561 = vmatprep.subr.bf16.mxu1 %v6260_v48  ;;  %1404 = vmatpush1.bf16.msra.mxu0 %v6261_v50  ;;  %v6341_v48 = vld [vmem:[%s9138_s4 + $0xc] ss:$16 sps:$4 sm:$0xff]   ;;  %v6360_v50 = vld [vmem:[%s9138_s4 + $0x80] ss:$16 sps:$4 sm:$0xff]  }
  0x99   :  { %1405 = vmatprep.subr.bf16.mxu0 %v6269_v51  ;;  %v6368_v51 = vld [vmem:[%s9138_s4 + $0xa4] ss:$16 sps:$4 sm:$0xff]  }
  0x9b   :  { %1562 = vmatpush1.bf16.msra.mxu1 %v6258_v49  ;;  %v6362_v49 = vld [vmem:[%s9138_s4 + $0x84] ss:$16 sps:$4 sm:$0xff]  }
  0x9c   :  { %1563 = vmatprep.subr.bf16.mxu1 %v6266_v52  ;;  %1406 = vmatpush1.bf16.msra.mxu0 %v6267_v54  ;;  %v6366_v52 = vld [vmem:[%s9138_s4 + $0xa0] ss:$16 sps:$4 sm:$0xff]   ;;  %v6339_v54 = vld [vmem:[%s9138_s4 + $0x8] ss:$16 sps:$4 sm:$0xff]  }
  0x9d   :  { %1407 = vmatprep.subr.bf16.mxu0 %v6275_v55  ;;  %v6380_v55 = vld [vmem:[%s9138_s4 + $0xe4] ss:$16 sps:$4 sm:$0xff]  }
  0x9f   :  { %1564 = vmatpush1.bf16.msra.mxu1 %v6264_v53  ;;  %v6374_v53 = vld [vmem:[%s9138_s4 + $0xc4] ss:$16 sps:$4 sm:$0xff]  }
  0xa0   :  { %1565 = vmatprep.subr.bf16.mxu1 %v6272_v56  ;;  %1408 = vmatpush1.bf16.msra.mxu0 %v6273_v58  ;;  %v6347_v56 = vld [vmem:[%s9138_s4 + $0x2c] ss:$16 sps:$4 sm:$0xff]   ;;  %v6345_v58 = vld [vmem:[%s9138_s4 + $0x28] ss:$16 sps:$4 sm:$0xff]  }
  0xa1   :  { %1409 = vmatprep.subr.bf16.mxu0 %v6281_v59  ;;  %v6386_v59 = vld [vmem:[%s9138_s4 + $0x104] ss:$16 sps:$4 sm:$0xff]  }
  0xa3   :  { %1566 = vmatpush1.bf16.msra.mxu1 %v6270_v57  ;;  %v6378_v57 = vld [vmem:[%s9138_s4 + $0xe0] ss:$16 sps:$4 sm:$0xff]  }
  0xa4   :  { %1567 = vmatprep.subr.bf16.mxu1 %v6278_v60  ;;  %1410 = vmatpush1.bf16.msra.mxu0 %v6279_v62  ;;  %v6353_v60 = vld [vmem:[%s9138_s4 + $0x4c] ss:$16 sps:$4 sm:$0xff]   ;;  %v6351_v62 = vld [vmem:[%s9138_s4 + $0x48] ss:$16 sps:$4 sm:$0xff]  }
  0xa5   :  { %1411 = vmatprep.subr.bf16.mxu0 %v6287_v63  ;;  %v6359_v63 = vld [vmem:[%s9138_s4 + $0x6c] ss:$16 sps:$4 sm:$0xff]  }
  0xa7   :  { %1568 = vmatpush1.bf16.msra.mxu1 %v6276_v61  ;;  %v6384_v61 = vld [vmem:[%s9138_s4 + $0x100] ss:$16 sps:$4 sm:$0xff]  }
  0xa8   :  { %1569 = vmatprep.subr.bf16.mxu1 %v6284_v0  ;;  %1412 = vmatpush1.bf16.msra.mxu0 %v6285_v2  ;;  %v6390_v0 = vld [vmem:[%s9138_s4 + $0x120] ss:$16 sps:$4 sm:$0xff]   ;;  %v6357_v2 = vld [vmem:[%s9138_s4 + $0x68] ss:$16 sps:$4 sm:$0xff]  }
  0xa9   :  { %1413 = vmatprep.subr.bf16.mxu0 %v6293_v4  ;;  %v6398_v4 = vld [vmem:[%s9138_s4 + $0x144] ss:$16 sps:$4 sm:$0xff]  }
  0xab   :  { %1570 = vmatpush1.bf16.msra.mxu1 %v6282_v1 }
  0xac   :  { %1571 = vmatprep.subr.bf16.mxu1 %v6290_v5  ;;  %1414 = vmatpush1.bf16.msra.mxu0 %v6291_v8 }
  0xad   :  { %1415 = vmatprep.subr.bf16.mxu0 %v6299_v10  ;;  %v6396_v10 = vld [vmem:[%s9138_s4 + $0x140] ss:$16 sps:$4 sm:$0xff]  }
  0xaf   :  { %1572 = vmatpush1.bf16.msra.mxu1 %v6288_v7  ;;  %v6365_v7 = vld [vmem:[%s9138_s4 + $0x8c] ss:$16 sps:$4 sm:$0xff]  }
  0xb0   :  { %1573 = vmatprep.subr.bf16.mxu1 %v6296_v9  ;;  %1416 = vmatpush1.bf16.msra.mxu0 %v6297_v11  ;;  %v6363_v11 = vld [vmem:[%s9138_s4 + $0x88] ss:$16 sps:$4 sm:$0xff]  }
  0xb1   :  { %1417 = vmatprep.subr.bf16.mxu0 %v6305_v13  ;;  %v6371_v13 = vld [vmem:[%s9138_s4 + $0xac] ss:$16 sps:$4 sm:$0xff]  }
  0xb3   :  { %1574 = vmatpush1.bf16.msra.mxu1 %v6294_v12  ;;  %v6404_v12 = vld [vmem:[%s9138_s4 + $0x164] ss:$16 sps:$4 sm:$0xff]  }
  0xb4   :  { %1575 = vmatprep.subr.bf16.mxu1 %v6302_v14  ;;  %1418 = vmatpush1.bf16.msra.mxu0 %v6303_v16  ;;  %v6402_v14 = vld [vmem:[%s9138_s4 + $0x160] ss:$16 sps:$4 sm:$0xff]   ;;  %v6369_v16 = vld [vmem:[%s9138_s4 + $0xa8] ss:$16 sps:$4 sm:$0xff]  }
  0xb5   :  { %1419 = vmatprep.subr.bf16.mxu0 %v6311_v21  ;;  %v6377_v21 = vld [vmem:[%s9138_s4 + $0xcc] ss:$16 sps:$4 sm:$0xff]  }
  0xb7   :  { %1576 = vmatpush1.bf16.msra.mxu1 %v6300_v18  ;;  %v6410_v18 = vld [vmem:[%s9138_s4 + $0x184] ss:$16 sps:$4 sm:$0xff]  }
  0xb8   :  { %1577 = vmatprep.subr.bf16.mxu1 %v6308_v22  ;;  %1420 = vmatpush1.bf16.msra.mxu0 %v6309_v19  ;;  %v6408_v22 = vld [vmem:[%s9138_s4 + $0x180] ss:$16 sps:$4 sm:$0xff]   ;;  %v6375_v19 = vld [vmem:[%s9138_s4 + $0xc8] ss:$16 sps:$4 sm:$0xff]  }
  0xb9   :  { %1421 = vmatprep.subr.bf16.mxu0 %v6317_v25  ;;  %v6383_v25 = vld [vmem:[%s9138_s4 + $0xec] ss:$16 sps:$4 sm:$0xff]  }
  0xbb   :  { %1578 = vmatpush1.bf16.msra.mxu1 %v6306_v24  ;;  %v6416_v24 = vld [vmem:[%s9138_s4 + $0x1a4] ss:$16 sps:$4 sm:$0xff]  }
  0xbc   :  { %1579 = vmatprep.subr.bf16.mxu1 %v6314_v26  ;;  %1422 = vmatpush1.bf16.msra.mxu0 %v6315_v28  ;;  %v6414_v26 = vld [vmem:[%s9138_s4 + $0x1a0] ss:$16 sps:$4 sm:$0xff]   ;;  %v6381_v28 = vld [vmem:[%s9138_s4 + $0xe8] ss:$16 sps:$4 sm:$0xff]  }
  0xbd   :  { %1423 = vmatprep.subr.bf16.mxu0 %v6323_v30  ;;  %v6387_v30 = vld [vmem:[%s9138_s4 + $0x108] ss:$16 sps:$4 sm:$0xff]  }
  0xbf   :  { %1580 = vmatpush1.bf16.msra.mxu1 %v6312_v29  ;;  %v6389_v29 = vld [vmem:[%s9138_s4 + $0x10c] ss:$16 sps:$4 sm:$0xff]  }
  0xc0   :  { %1581 = vmatprep.subr.bf16.mxu1 %v6320_v20  ;;  %1424 = vmatpush1.bf16.msra.mxu0 %v6321_v31  ;;  %v6395_v20 = vld [vmem:[%s9138_s4 + $0x12c] ss:$16 sps:$4 sm:$0xff]   ;;  %v6393_v31 = vld [vmem:[%s9138_s4 + $0x128] ss:$16 sps:$4 sm:$0xff]  }
  0xc1   :  { %2272 = vmatprep.subr.bf16.mxu0 %v6338_v33  ;;  %v6399_v33 = vld [vmem:[%s9138_s4 + $0x148] ss:$16 sps:$4 sm:$0xff]  }
  0xc3   :  { %1582 = vmatpush1.bf16.msra.mxu1 %v6318_v32  ;;  %1426 = vmatmul.mubr.bf16.vlgmr.msra.gmra.mrb[0].mxu0 %v7137_v23  ;;  %v6401_v32 = vld [vmem:[%s9138_s4 + $0x14c] ss:$16 sps:$4 sm:$0xff]  }
  0xc4   :  { %1583 = vmatprep.subr.bf16.mxu1 %v6326_v17  ;;  %2273 = vmatpush1.bf16.msra.mxu0 %v6336_v34  ;;  %v6407_v17 = vld [vmem:[%s9138_s4 + $0x16c] ss:$16 sps:$4 sm:$0xff]   ;;  %v6405_v34 = vld [vmem:[%s9138_s4 + $0x168] ss:$16 sps:$4 sm:$0xff]  }
  0xc5   :  { %2274 = vmatprep.subr.bf16.mxu0 %v6344_v36  ;;  %v6411_v36 = vld [vmem:[%s9138_s4 + $0x188] ss:$16 sps:$4 sm:$0xff]  }
  0xc7   :  { %1584 = vmatpush1.bf16.msra.mxu1 %v6324_v35  ;;  %v6413_v35 = vld [vmem:[%s9138_s4 + $0x18c] ss:$16 sps:$4 sm:$0xff]  }
  0xc8   :  { %1585 = vmatprep.subr.bf16.mxu1 %v6329_v37  ;;  %2275 = vmatpush1.bf16.msra.mxu0 %v6342_v38  ;;  %v6419_v37 = vld [vmem:[%s9138_s4 + $0x1ac] ss:$16 sps:$4 sm:$0xff]   ;;  %v6417_v38 = vld [vmem:[%s9138_s4 + $0x1a8] ss:$16 sps:$4 sm:$0xff]  }
  0xc9   :  { %2276 = vmatprep.subr.bf16.mxu0 %v6350_v40  ;;  %v6425_v40 = vld [vmem:[%s9138_s4 + $0x1cc] ss:$16 sps:$4 sm:$0xff]  }
  0xcb   :  { %1586 = vmatpush1.bf16.msra.mxu1 %v6327_v39  ;;  %v6422_v39 = vld [vmem:[%s9138_s4 + $0x1c4] ss:$16 sps:$4 sm:$0xff]  }
  0xcc   :  { %1587 = vmatprep.subr.bf16.mxu1 %v6332_v41  ;;  %2277 = vmatpush1.bf16.msra.mxu0 %v6348_v42  ;;  %v6420_v41 = vld [vmem:[%s9138_s4 + $0x1c0] ss:$16 sps:$4 sm:$0xff]   ;;  %v6423_v42 = vld [vmem:[%s9138_s4 + $0x1c8] ss:$16 sps:$4 sm:$0xff]  }
  0xcd   :  { %2278 = vmatprep.subr.bf16.mxu0 %v6356_v44  ;;  %v6431_v44 = vld [vmem:[%s9138_s4 + $0x1ec] ss:$16 sps:$4 sm:$0xff]  }
  0xcf   :  { %1588 = vmatpush1.bf16.msra.mxu1 %v6330_v43  ;;  %v6428_v43 = vld [vmem:[%s9138_s4 + $0x1e4] ss:$16 sps:$4 sm:$0xff]  }
  0xd0   :  { %1598 = vmatprep.subr.bf16.mxu1 %v6335_v45  ;;  %2279 = vmatpush1.bf16.msra.mxu0 %v6354_v46  ;;  %v6426_v45 = vld [vmem:[%s9138_s4 + $0x1e0] ss:$16 sps:$4 sm:$0xff]   ;;  %v6429_v46 = vld [vmem:[%s9138_s4 + $0x1e8] ss:$16 sps:$4 sm:$0xff]  }
  0xd1   :  { %2280 = vmatprep.subr.bf16.mxu0 %v6362_v49 }
  0xd2   :  { %1590 = vmatmul.mubr.bf16.vlgmr.msra.gmra.mrb[4].mxu1 %v7137_v23  ;;  %v6372_v23 = vld [vmem:[%s9138_s4 + $0xc0] ss:$16 sps:$4 sm:$0xff]  }
  0xd3   :  { %1599 = vmatpush1.bf16.msra.mxu1 %v6333_v47  ;;  %1630 = vmatprep.mubr.bf16.mxu1 %v6993_v3  ;;  %v6434_v47 = vld [vmem:[%s9138_s4 + $0x204] ss:$16 sps:$4 sm:$0xff]  }
  0xd4   :  { %2354 = vmatprep.subr.bf16.mxu1 %v6341_v48  ;;  %2281 = vmatpush1.bf16.msra.mxu0 %v6360_v50  ;;  %v6437_v48 = vld [vmem:[%s9138_s4 + $0x20c] ss:$16 sps:$4 sm:$0xff]  }
  0xd5   :  { %2282 = vmatprep.subr.bf16.mxu0 %v6368_v51 }
  0xd8   :  { %2283 = vmatpush1.bf16.msra.mxu0 %v6366_v52 }
  0xd9   :  { %2284 = vmatprep.subr.bf16.mxu0 %v6374_v53 }
  0xdc   :  { %2285 = vmatpush1.bf16.msra.mxu0 %v6372_v23 }
  0xdd   :  { %2286 = vmatprep.subr.bf16.mxu0 %v6380_v55 }
  0xde   :  { %5496 = vmatmul.mubr.msk.bf16.vlgmr.msra.gmra.mrb[4].mxu1 %vm1307_vm0, %v7150_v27  ;;  %v6392_v27 = vld [vmem:[%s9138_s4 + $0x124] ss:$16 sps:$4 sm:$0xff]  }
  0xdf   :  { %2355 = vmatpush1.bf16.msra.mxu1 %v6339_v54 }
  0xe0   :  { %2356 = vmatprep.subr.bf16.mxu1 %v6347_v56  ;;  %2287 = vmatpush1.bf16.msra.mxu0 %v6378_v57 }
  0xe1   :  { %2288 = vmatprep.subr.bf16.mxu0 %v6386_v59 }
  0xe3   :  { %2357 = vmatpush1.bf16.msra.mxu1 %v6345_v58 }
  0xe4   :  { %2358 = vmatprep.subr.bf16.mxu1 %v6353_v60  ;;  %2289 = vmatpush1.bf16.msra.mxu0 %v6384_v61 }
  0xe5   :  { %v7804_v1 = vpop.f32.mrb[0].mxu1  ;;  %2290 = vmatprep.subr.bf16.mxu0 %v6392_v27 }
  0xe6   :  { %v7812_v5 = vpop.f32.mrb[1].mxu1 }
  0xe7   :  { %v1472_v8 = vpop.f32.mrb[2].mxu1  ;;  %2359 = vmatpush1.bf16.msra.mxu1 %v6351_v62 }
  0xe8   :  { %v1473_v9 = vpop.f32.mrb[3].mxu1  ;;  %2360 = vmatprep.subr.bf16.mxu1 %v6359_v63  ;;  %2291 = vmatpush1.bf16.msra.mxu0 %v6390_v0 }
  0xe9   :  { %2292 = vmatprep.subr.bf16.mxu0 %v6398_v4 }
  0xeb   :  { %2361 = vmatpush1.bf16.msra.mxu1 %v6357_v2 }
  0xec   :  { %2362 = vmatprep.subr.bf16.mxu1 %v6365_v7  ;;  %2293 = vmatpush1.bf16.msra.mxu0 %v6396_v10 }
  0xed   :  { %2294 = vmatprep.subr.bf16.mxu0 %v6404_v12 }
  0xef   :  { %2363 = vmatpush1.bf16.msra.mxu1 %v6363_v11 }
  0xf0   :  { %2364 = vmatprep.subr.bf16.mxu1 %v6371_v13  ;;  %2295 = vmatpush1.bf16.msra.mxu0 %v6402_v14 }
  0xf1   :  { %2296 = vmatprep.subr.bf16.mxu0 %v6410_v18 }
  0xf3   :  { %2365 = vmatpush1.bf16.msra.mxu1 %v6369_v16 }
  0xf4   :  { %2366 = vmatprep.subr.bf16.mxu1 %v6377_v21  ;;  %2297 = vmatpush1.bf16.msra.mxu0 %v6408_v22 }
  0xf5   :  { %2298 = vmatprep.subr.bf16.mxu0 %v6416_v24 }
  0xf7   :  { %2367 = vmatpush1.bf16.msra.mxu1 %v6375_v19 }
  0xf8   :  { %2368 = vmatprep.subr.bf16.mxu1 %v6383_v25  ;;  %2299 = vmatpush1.bf16.msra.mxu0 %v6414_v26 }
  0xf9   :  { %2300 = vmatprep.subr.bf16.mxu0 %v6422_v39 }
  0xfb   :  { %2369 = vmatpush1.bf16.msra.mxu1 %v6381_v28 }
  0xfc   :  { %2370 = vmatprep.subr.bf16.mxu1 %v6389_v29  ;;  %2301 = vmatpush1.bf16.msra.mxu0 %v6420_v41 }
  0xfd   :  { %2302 = vmatprep.subr.bf16.mxu0 %v6428_v43 }
  0xff   :  { %2371 = vmatpush1.bf16.msra.mxu1 %v6387_v30 }
 0x100   :  { %2372 = vmatprep.subr.bf16.mxu1 %v6395_v20  ;;  %2303 = vmatpush1.bf16.msra.mxu0 %v6426_v45 }
 0x101   :  { %2313 = vmatprep.subr.bf16.mxu0 %v6434_v47 }
 0x103   :  { %2373 = vmatpush1.bf16.msra.mxu1 %v6393_v31 }
 0x104   :  { %2374 = vmatprep.subr.bf16.mxu1 %v6401_v32 }
 0x107   :  { %2375 = vmatpush1.bf16.msra.mxu1 %v6399_v33 }
 0x108   :  { %2376 = vmatprep.subr.bf16.mxu1 %v6407_v17 }
 0x10b   :  { %2377 = vmatpush1.bf16.msra.mxu1 %v6405_v34 }
 0x10c   :  { %2378 = vmatprep.subr.bf16.mxu1 %v6413_v35 }
 0x10f   :  { %2379 = vmatpush1.bf16.msra.mxu1 %v6411_v36 }
 0x110   :  { %2380 = vmatprep.subr.bf16.mxu1 %v6419_v37 }
 0x113   :  { %2381 = vmatpush1.bf16.msra.mxu1 %v6417_v38 }
 0x114   :  { %2382 = vmatprep.subr.bf16.mxu1 %v6425_v40 }
 0x117   :  { %2383 = vmatpush1.bf16.msra.mxu1 %v6423_v42 }
 0x118   :  { %2384 = vmatprep.subr.bf16.mxu1 %v6431_v44 }
 0x11b   :  { %2385 = vmatpush1.bf16.msra.mxu1 %v6429_v46 }
 0x11c   :  { %2395 = vmatprep.subr.bf16.mxu1 %v6437_v48 }
 0x11d   :  { %23 = vsyncpa [#allocation5], 0  ;;  %v7926_v49 = vsub.s32 0, %v7098_v6  ;;  %v7931_v50 = vld [vmem:[%s9137_s3] sm:$0xf]  ;;  %v7934_v51 = vsub.s32 1, %v7098_v6 }
 0x11e   :  { %v6432_v63 = vld [vmem:[%s9138_s4 + $0x200] ss:$16 sps:$4 sm:$0xff]   ;;  %v6435_v0 = vld [vmem:[%s9138_s4 + $0x208] ss:$16 sps:$4 sm:$0xff]   ;;  %v6440_v4 = vld [vmem:[%s9138_s4 + $0x224] ss:$16 sps:$4 sm:$0xff]  }
 0x11f   :  { %v255_v52 = vrot.slane %v7931_v50, %v7926_v49  ;;  %v259_v53 = vrot.slane %v7931_v50, %v7934_v51  ;;  %v6441_v7 = vld [vmem:[%s9138_s4 + $0x228] ss:$16 sps:$4 sm:$0xff]   ;;  %v6446_v8 = vld [vmem:[%s9138_s4 + $0x244] ss:$16 sps:$4 sm:$0xff]   ;;  %v6449_v9 = vld [vmem:[%s9138_s4 + $0x24c] ss:$16 sps:$4 sm:$0xff]  }
 0x120   :  { %v6444_v10 = vld [vmem:[%s9138_s4 + $0x240] ss:$16 sps:$4 sm:$0xff]   ;;  %v6447_v11 = vld [vmem:[%s9138_s4 + $0x248] ss:$16 sps:$4 sm:$0xff]   ;;  %v6452_v12 = vld [vmem:[%s9138_s4 + $0x264] ss:$16 sps:$4 sm:$0xff]  }
 0x121   :  { %v6455_v13 = vld [vmem:[%s9138_s4 + $0x26c] ss:$16 sps:$4 sm:$0xff]   ;;  %v7979_v14 = vsub.s32 3, %v7098_v6  ;;  %v6450_v16 = vld [vmem:[%s9138_s4 + $0x260] ss:$16 sps:$4 sm:$0xff]   ;;  %v8014_v34 = vsub.s32 2, %v7098_v6 }
 0x122   :  { %v6453_v18 = vld [vmem:[%s9138_s4 + $0x268] ss:$16 sps:$4 sm:$0xff]   ;;  %v6458_v21 = vld [vmem:[%s9138_s4 + $0x284] ss:$16 sps:$4 sm:$0xff]   ;;  %v6461_v22 = vld [vmem:[%s9138_s4 + $0x28c] ss:$16 sps:$4 sm:$0xff]  }
 0x123   :  { %v267_v19 = vrot.slane %v7931_v50, %v7979_v14  ;;  %v6456_v24 = vld [vmem:[%s9138_s4 + $0x280] ss:$16 sps:$4 sm:$0xff]   ;;  %v6459_v25 = vld [vmem:[%s9138_s4 + $0x288] ss:$16 sps:$4 sm:$0xff]   ;;  %v6464_v28 = vld [vmem:[%s9138_s4 + $0x2a4] ss:$16 sps:$4 sm:$0xff]   ;;  %v263_v41 = vrot.slane %v7931_v50, %v8014_v34 }
 0x124   :  { %v6467_v29 = vld [vmem:[%s9138_s4 + $0x2ac] ss:$16 sps:$4 sm:$0xff]   ;;  %v6462_v33 = vld [vmem:[%s9138_s4 + $0x2a0] ss:$16 sps:$4 sm:$0xff]   ;;  %v6465_v17 = vld [vmem:[%s9138_s4 + $0x2a8] ss:$16 sps:$4 sm:$0xff]  }
 0x125   :  { %v6470_v36 = vld [vmem:[%s9138_s4 + $0x2c4] ss:$16 sps:$4 sm:$0xff]   ;;  %v6473_v37 = vld [vmem:[%s9138_s4 + $0x2cc] ss:$16 sps:$4 sm:$0xff]   ;;  %v6468_v39 = vld [vmem:[%s9138_s4 + $0x2c0] ss:$16 sps:$4 sm:$0xff]  }
 0x126   :  { %v6471_v40 = vld [vmem:[%s9138_s4 + $0x2c8] ss:$16 sps:$4 sm:$0xff]   ;;  %v6476_v42 = vld [vmem:[%s9138_s4 + $0x2e4] ss:$16 sps:$4 sm:$0xff]   ;;  %v6479_v43 = vld [vmem:[%s9138_s4 + $0x2ec] ss:$16 sps:$4 sm:$0xff]  }
 0x127   :  { %v6474_v44 = vld [vmem:[%s9138_s4 + $0x2e0] ss:$16 sps:$4 sm:$0xff]   ;;  %v6477_v45 = vld [vmem:[%s9138_s4 + $0x2e8] ss:$16 sps:$4 sm:$0xff]   ;;  %v6482_v47 = vld [vmem:[%s9138_s4 + $0x304] ss:$16 sps:$4 sm:$0xff]  }
 0x128   :  { %v6485_v48 = vld [vmem:[%s9138_s4 + $0x30c] ss:$16 sps:$4 sm:$0xff]   ;;  %v6480_v50 = vld [vmem:[%s9138_s4 + $0x300] ss:$16 sps:$4 sm:$0xff]   ;;  %s6995_s0 = smov 20   ;;  %vm2815_vm1 = vcmask 1041408  }
 0x129   :  { %vm2736_vm2 = vcmask 162816   ;;  %vm2738_vm3 = vcmask 320512   ;;  %s6996_s26 = smov 108   ;;  %vm2751_vm4 = vcmask 156672   ;;  %s6997_s18 = smov [#allocation4]  }
 0x12a   :  { %s5274_s19 = sshll.u32 %s6997_s18, 4  ;;  %s6998_s2 = smov [#allocation2]   ;;  %s5275_s19 = int_to_ptr.vmem [resolvable:$true] %s5274_s19 }
 0x12b   :  { %s5264_s20 = sshll.u32 %s6998_s2, 4  ;;  %s6923_s21 = scalar_lea.vmem %s5275_s19, 32  ;;  %s5265_s20 = int_to_ptr.vmem [resolvable:$true] %s5264_s20 }
 0x12c   :  { %p6924_p0 = scmp.ne.s32.totalorder %s5275_s19, %s6923_s21  ;;  %p6928_p1 = scmp.lt.s32.totalorder %s5275_s19, %s5275_s19 }
 0x12d   :  { %p6929_p2 = scmp.lt.s32.totalorder %s6923_s21, %s6923_s21 }
 0x12f   :  { %p6930_p3 = por %p6929_p2, %p6928_p1 }
 0x131   :  { %p6931_p4 = pnand %p6930_p3, %p6924_p0 }
 0x196   :  { %v1427_v23 = vpop.f32.mrb[0].mxu0 }
 0x197   :  { %v5966_v54 = vadd.f32 %v1427_v23, %v255_v52  ;;  %v1429_v55 = vpop.f32.mrb[1].mxu0  ;;  %v6483_v52 = vld [vmem:[%s9138_s4 + $0x308] ss:$16 sps:$4 sm:$0xff]   ;;  %v6487_v23 = vld [vmem:[%s9140_s6 + $0x40] sm:$0xff]  }
 0x198   :  { %v5968_v56 = vadd.f32 %v1429_v55, %v259_v53  ;;  %v1431_v57 = vpop.f32.mrb[2].mxu0  ;;  %v6488_v55 = vld [vmem:[%s9140_s6] sm:$0xff]  }
 0x199   :  { %v5967_v58 = vadd.f32 %v5966_v54, %v7804_v1  ;;  %v1432_v59 = vpop.f32.mrb[3].mxu0  ;;  %v6443_v1 = vld [vmem:[%s9138_s4 + $0x22c] ss:$16 sps:$4 sm:$0xff]   ;;  %v6486_v54 = vld [vmem:[%s9140_s6 + $0x80] sm:$0xff]  }
 0x19a   :  { %v5969_v60 = vadd.f32 %v5968_v56, %v7812_v5  ;;  %v6438_v5 = vld [vmem:[%s9138_s4 + $0x220] ss:$16 sps:$4 sm:$0xff]   ;;  %v6490_v57 = vld [vmem:[%s9140_s6 + $0x48] sm:$0xff]  }
 0x19b   :  { %v1639_v61 = vmax.f32 %v5967_v58, 0.0  ;;  %v6489_v58 = vld [vmem:[%s9140_s6 + $0x88] sm:$0xff]  }
 0x19c   :  { %v1640_v62 = vmax.f32 %v5969_v60, 0.0  ;;  %v6491_v59 = vld [vmem:[%s9140_s6 + $0x8] sm:$0xff]   ;;  %v6493_v60 = vld [vmem:[%s9140_s6 + $0x50] sm:$0xff]  }
 0x19d   :  { %v1643_v2 = vpack.c.bf16 %v1639_v61, %v1639_v61  ;;  %v6492_v61 = vld [vmem:[%s9140_s6 + $0x90] sm:$0xff]  }
 0x19e   :  { %v1644_v27 = vpack.c.bf16 %v1640_v62, %v1640_v62  ;;  %v6494_v62 = vld [vmem:[%s9140_s6 + $0x10] sm:$0xff]  }
 0x1a0   :  { %2304 = vmatprep.mubr.bf16.mxu0 %v1644_v27  ;;  %2386 = vmatprep.mubr.bf16.mxu1 %v1644_v27  ;;  %v6496_v27 = vld [vmem:[%s9140_s6 + $0x58] sm:$0xff]  }
 0x1a1   :  { %2305 = vmatmul.mubr.bf16.vlgmr.msra.gmra.mrb[4].mxu0 %v1643_v2  ;;  %2387 = vmatmul.mubr.bf16.vlgmr.msra.gmra.mrb[8].mxu1 %v1643_v2  ;;  %v6499_v2 = vld [vmem:[%s9140_s6 + $0x60] sm:$0xff]  }
 0x1a2   :  { %2314 = vmatpush1.bf16.msra.mxu0 %v6432_v63  ;;  %2396 = vmatpush1.bf16.msra.mxu1 %v6435_v0  ;;  %v6495_v63 = vld [vmem:[%s9140_s6 + $0x98] sm:$0xff]  }
 0x1a3   :  { %2315 = vmatprep.subr.bf16.mxu0 %v6440_v4  ;;  %2397 = vmatprep.subr.bf16.mxu1 %v6443_v1  ;;  %v6497_v0 = vld [vmem:[%s9140_s6 + $0x18] sm:$0xff]   ;;  %v6498_v4 = vld [vmem:[%s9140_s6 + $0xa0] sm:$0xff]  }
 0x1a4   :  { %v6500_v1 = vld [vmem:[%s9140_s6 + $0x20] sm:$0xff]  }
 0x1a6   :  { %2316 = vmatpush1.bf16.msra.mxu0 %v6438_v5  ;;  %2398 = vmatpush1.bf16.msra.mxu1 %v6441_v7  ;;  %v6502_v5 = vld [vmem:[%s9140_s6 + $0x68] sm:$0xff]  }
 0x1a7   :  { %2317 = vmatprep.subr.bf16.mxu0 %v6446_v8  ;;  %2399 = vmatprep.subr.bf16.mxu1 %v6449_v9  ;;  %v6501_v7 = vld [vmem:[%s9140_s6 + $0xa8] sm:$0xff]   ;;  %v6504_v9 = vld [vmem:[%s9140_s6 + $0xb0] sm:$0xff]  }
 0x1a8   :  { %v6503_v8 = vld [vmem:[%s9140_s6 + $0x28] sm:$0xff]  }
 0x1aa   :  { %2318 = vmatpush1.bf16.msra.mxu0 %v6444_v10  ;;  %2400 = vmatpush1.bf16.msra.mxu1 %v6447_v11  ;;  %v6505_v10 = vld [vmem:[%s9140_s6 + $0x70] sm:$0xff]  }
 0x1ab   :  { %2319 = vmatprep.subr.bf16.mxu0 %v6452_v12  ;;  %2401 = vmatprep.subr.bf16.mxu1 %v6455_v13  ;;  %v6506_v11 = vld [vmem:[%s9140_s6 + $0x30] sm:$0xff]   ;;  %v6507_v12 = vld [vmem:[%s9140_s6 + $0xb8] sm:$0xff]  }
 0x1ac   :  { %v6508_v13 = vld [vmem:[%s9140_s6 + $0x78] sm:$0xff]  }
 0x1ae   :  { %2320 = vmatpush1.bf16.msra.mxu0 %v6450_v16  ;;  %2402 = vmatpush1.bf16.msra.mxu1 %v6453_v18  ;;  %v6509_v16 = vld [vmem:[%s9140_s6 + $0x38] sm:$0xff]   ;;  %v6510_v18 = vld [vmem:[%s9140_s6 + $0xc0] sm:$0xff]  }
 0x1af   :  { %2321 = vmatprep.subr.bf16.mxu0 %v6458_v21  ;;  %2403 = vmatprep.subr.bf16.mxu1 %v6461_v22  ;;  %v2740_v21 = vld [vmem:[%s9135_s1] sm:$0x3] }
 0x1b0   :  { %2742 = vrot.lane.b32.xlu0 %v2740_v21, %s6995_s0  ;;  %v1747_v22 = vld [vmem:[%s9139_s5] sm:$0xf] }
 0x1b1   :  { %v1632_v26 = vpop.f32.mrb[4].mxu1  ;;  %v6539_v21 = vld [vmem:[%s9144_s10 + $0x60] ss:$16 sps:$4 sm:$0xff]  }
 0x1b2   :  { %v1634_v30 = vpop.f32.mrb[5].mxu1  ;;  %2322 = vmatpush1.bf16.msra.mxu0 %v6456_v24  ;;  %2404 = vmatpush1.bf16.msra.mxu1 %v6459_v25  ;;  %v5970_v46 = vadd.f32 %v1632_v26, %v263_v41  ;;  %v1760_v24 = vrot.slane %v1747_v22, %v8014_v34  ;;  %v1756_v25 = vrot.slane %v1747_v22, %v7934_v51 }
 0x1b3   :  { %v5971_v20 = vadd.f32 %v1634_v30, %v267_v19  ;;  %v1636_v31 = vpop.f32.mrb[6].mxu1  ;;  %2323 = vmatprep.subr.bf16.mxu0 %v6464_v28  ;;  %2405 = vmatprep.subr.bf16.mxu1 %v6467_v29  ;;  %v1752_v19 = vrot.slane %v1747_v22, %v7926_v49  ;;  %v1764_v26 = vrot.slane %v1747_v22, %v7979_v14  ;;  %v6547_v22 = vld [vmem:[%s9144_s10 + $0x84] ss:$16 sps:$4 sm:$0xff]  }
 0x1b4   :  { %v1637_v32 = vpop.f32.mrb[7].mxu1  ;;  %v1641_v53 = vmax.f32 %v5970_v46, 0.0 }
 0x1b5   :  { %v1642_v35 = vmax.f32 %v5971_v20, 0.0 }
 0x1b6   :  { %2324 = vmatpush1.bf16.msra.mxu0 %v6462_v33  ;;  %2406 = vmatpush1.bf16.msra.mxu1 %v6465_v17  ;;  %v1645_v56 = vpack.c.bf16 %v1641_v53, %v1641_v53 }
 0x1b7   :  { %v1646_v38 = vpack.c.bf16 %v1642_v35, %v1642_v35  ;;  %2325 = vmatprep.subr.bf16.mxu0 %v6470_v36  ;;  %2407 = vmatprep.subr.bf16.mxu1 %v6473_v37 }
 0x1b9   :  { %5597 = vmatprep.mubr.msk.bf16.mxu0 %vm1307_vm0, %v1646_v38  ;;  %5598 = vmatprep.mubr.msk.bf16.mxu1 %vm1307_vm0, %v1646_v38 }
 0x1ba   :  { %2326 = vmatpush1.bf16.msra.mxu0 %v6468_v39  ;;  %2408 = vmatpush1.bf16.msra.mxu1 %v6471_v40 }
 0x1bb   :  { %2327 = vmatprep.subr.bf16.mxu0 %v6476_v42  ;;  %2409 = vmatprep.subr.bf16.mxu1 %v6479_v43 }
 0x1be   :  { %2328 = vmatpush1.bf16.msra.mxu0 %v6474_v44  ;;  %2410 = vmatpush1.bf16.msra.mxu1 %v6477_v45 }
 0x1bf   :  { %2329 = vmatprep.subr.bf16.mxu0 %v6482_v47  ;;  %2411 = vmatprep.subr.bf16.mxu1 %v6485_v48  ;;  %v6511_v47 = vld [vmem:[%s9142_s8] ss:$16 sps:$4 sm:$0xff]   ;;  %v6513_v48 = vld [vmem:[%s9142_s8 + $0x4] ss:$16 sps:$4 sm:$0xff]  }
 0x1c2   :  { %2330 = vmatpush1.bf16.msra.mxu0 %v6480_v50  ;;  %2412 = vmatpush1.bf16.msra.mxu1 %v6483_v52  ;;  %v2758_v50 = vld [vmem:[%s9142_s8 + $0x20] sm:$0x33] }
 0x1c3   :  { %2694 = vmatprep.subr.bf16.mxu1 %v6993_v3  ;;  %5922 = vmatprep.subr.bf16.mxu0 %v6487_v23  ;;  %v5631_v52 = vcombine.high %v2758_v50, %v2758_v50 }
 0x1c5   :  { %2346 = vmatmul.mubr.bf16.vlgmr.msra.gmra.mrb[4].mxu0 %v1645_v56  ;;  %2428 = vmatmul.mubr.bf16.vlgmr.msra.gmra.mrb[8].mxu1 %v1645_v56 }
 0x1c6   :  { %2695 = vmatpush1.bf16.msra.mxu1 %v6486_v54  ;;  %5923 = vmatpush3.bf16.msra.mxu0 %v6488_v55  ;;  %v5599_v54 = vld [vmem:[%s9141_s7] ss:$0 sm:$0xff] }
 0x1c7   :  { %2696 = vmatprep.subr.bf16.mxu1 %v6993_v3  ;;  %5924 = vmatprep.subr.bf16.mxu0 %v6490_v57 }
 0x1ca   :  { %2697 = vmatpush1.bf16.msra.mxu1 %v6489_v58  ;;  %5925 = vmatpush3.bf16.msra.mxu0 %v6491_v59 }
 0x1cb   :  { %2698 = vmatprep.subr.bf16.mxu1 %v6993_v3  ;;  %5926 = vmatprep.subr.bf16.mxu0 %v6493_v60 }
 0x1ce   :  { %2699 = vmatpush1.bf16.msra.mxu1 %v6492_v61  ;;  %5927 = vmatpush3.bf16.msra.mxu0 %v6494_v62 }
 0x1cf   :  { %2700 = vmatprep.subr.bf16.mxu1 %v6993_v3  ;;  %5928 = vmatprep.subr.bf16.mxu0 %v6496_v27 }
 0x1d2   :  { %2701 = vmatpush1.bf16.msra.mxu1 %v6495_v63  ;;  %5929 = vmatpush3.bf16.msra.mxu0 %v6497_v0  ;;  %v5630_v0 = vcombine.low %v2758_v50, %v2758_v50 }
 0x1d3   :  { %2702 = vmatprep.subr.bf16.mxu1 %v6993_v3  ;;  %5930 = vmatprep.subr.bf16.mxu0 %v6499_v2 }
 0x1d4   :  { %v2817_v2 = vsel %vm2815_vm1, %v5630_v0, 0  ;;  %v6568_v0 = vld [vmem:[%s9144_s10 + $0xec] ss:$16 sps:$4 sm:$0xff]  }
 0x1d6   :  { %2703 = vmatpush1.bf16.msra.mxu1 %v6498_v4  ;;  %5931 = vmatpush3.bf16.msra.mxu0 %v6500_v1  ;;  %v6518_v4 = vld [vmem:[%s9142_s8 + $0xc] ss:$16 sps:$4 sm:$0xff]  }
 0x1d7   :  { %2704 = vmatprep.subr.bf16.mxu1 %v6993_v3  ;;  %5932 = vmatprep.subr.bf16.mxu0 %v6502_v5 }
 0x1da   :  { %2705 = vmatpush1.bf16.msra.mxu1 %v6501_v7  ;;  %5933 = vmatpush3.bf16.msra.mxu0 %v6503_v8 }
 0x1db   :  { %2706 = vmatprep.subr.bf16.mxu1 %v6993_v3  ;;  %5934 = vmatprep.subr.bf16.mxu0 %v6505_v10  ;;  %v6523_v10 = vld [vmem:[%s9144_s10 + $0x4] ss:$16 sps:$4 sm:$0xff]  }
 0x1de   :  { %2707 = vmatpush1.bf16.msra.mxu1 %v6504_v9  ;;  %5935 = vmatpush3.bf16.msra.mxu0 %v6506_v11  ;;  %v6521_v9 = vld [vmem:[%s9144_s10] ss:$16 sps:$4 sm:$0xff]   ;;  %v6529_v11 = vld [vmem:[%s9144_s10 + $0x24] ss:$16 sps:$4 sm:$0xff]  }
 0x1df   :  { %2708 = vmatprep.subr.bf16.mxu1 %v6993_v3  ;;  %5936 = vmatprep.subr.bf16.mxu0 %v6508_v13  ;;  %v6535_v13 = vld [vmem:[%s9144_s10 + $0x44] ss:$16 sps:$4 sm:$0xff]  }
 0x1e2   :  { %2709 = vmatpush1.bf16.msra.mxu1 %v6507_v12  ;;  %5937 = vmatpush3.bf16.msra.mxu0 %v6509_v16  ;;  %v6527_v12 = vld [vmem:[%s9144_s10 + $0x20] ss:$16 sps:$4 sm:$0xff]  }
 0x1e3   :  { %2710 = vmatprep.subr.bf16.mxu1 %v6993_v3  ;;  %3543 = vmatprep.subr.bf16.mxu0 %v6523_v10  ;;  %v6533_v16 = vld [vmem:[%s9144_s10 + $0x40] ss:$16 sps:$4 sm:$0xff]   ;;  %v6592_v10 = vld [vmem:[%s9144_s10 + $0x16c] ss:$16 sps:$4 sm:$0xff]  }
 0x1e6   :  { %2711 = vmatpush1.bf16.msra.mxu1 %v6510_v18  ;;  %v6541_v18 = vld [vmem:[%s9144_s10 + $0x64] ss:$16 sps:$4 sm:$0xff]  }
 0x1e7   :  { %2828 = vmatprep.subr.bf16.mxu1 %v6513_v48 }
 0x222   :  { %v2743_v1 = vpop.permute.xlu0 %2742 }
 0x298   :  { %v2347_v28 = vpop.f32.mrb[4].mxu0  ;;  %v2429_v29 = vpop.f32.mrb[8].mxu1 }
 0x299   :  { %v5972_v30 = vadd.f32 %v2347_v28, %v1752_v19  ;;  %v5974_v20 = vadd.f32 %v2429_v29, %v1760_v24  ;;  %v2349_v31 = vpop.f32.mrb[5].mxu0  ;;  %v2431_v32 = vpop.f32.mrb[9].mxu1  ;;  %v6545_v19 = vld [vmem:[%s9144_s10 + $0x80] ss:$16 sps:$4 sm:$0xff]   ;;  %v6553_v24 = vld [vmem:[%s9144_s10 + $0xa4] ss:$16 sps:$4 sm:$0xff]  }
 0x29a   :  { %v5973_v33 = vadd.f32 %v2349_v31, %v1756_v25  ;;  %v5975_v17 = vadd.f32 %v2431_v32, %v1764_v26  ;;  %v2351_v35 = vpop.f32.mrb[6].mxu0  ;;  %v2433_v36 = vpop.f32.mrb[10].mxu1  ;;  %v6551_v25 = vld [vmem:[%s9144_s10 + $0xa0] ss:$16 sps:$4 sm:$0xff]   ;;  %v6559_v26 = vld [vmem:[%s9144_s10 + $0xc4] ss:$16 sps:$4 sm:$0xff]  }
 0x29b   :  { %v2436_v37 = vmax.f32 %v5972_v30, 0.0  ;;  %v2438_v38 = vmax.f32 %v5974_v20, 0.0  ;;  %v2352_v39 = vpop.f32.mrb[7].mxu0  ;;  %v2434_v40 = vpop.f32.mrb[11].mxu1  ;;  %v6557_v28 = vld [vmem:[%s9144_s10 + $0xc0] ss:$16 sps:$4 sm:$0xff]  }
 0x29c   :  { %v2437_v41 = vmax.f32 %v5973_v33, 0.0  ;;  %v2439_v42 = vmax.f32 %v5975_v17, 0.0  ;;  %v6565_v29 = vld [vmem:[%s9144_s10 + $0xe4] ss:$16 sps:$4 sm:$0xff]   ;;  %v6563_v30 = vld [vmem:[%s9144_s10 + $0xe0] ss:$16 sps:$4 sm:$0xff]  }
 0x29d   :  { %v2440_v45 = vpack.c.bf16 %v2436_v37, %v2436_v37  ;;  %v2442_v46 = vpack.c.bf16 %v2438_v38, %v2438_v38  ;;  %v6571_v20 = vld [vmem:[%s9144_s10 + $0x104] ss:$16 sps:$4 sm:$0xff]   ;;  %v6569_v31 = vld [vmem:[%s9144_s10 + $0x100] ss:$16 sps:$4 sm:$0xff]  }
 0x29e   :  { %v2441_v43 = vpack.c.bf16 %v2437_v41, %v2437_v41  ;;  %v2443_v44 = vpack.c.bf16 %v2439_v42, %v2439_v42  ;;  %v6577_v32 = vld [vmem:[%s9144_s10 + $0x124] ss:$16 sps:$4 sm:$0xff]   ;;  %v6575_v33 = vld [vmem:[%s9144_s10 + $0x120] ss:$16 sps:$4 sm:$0xff]  }
 0x29f   :  { %v6583_v17 = vld [vmem:[%s9144_s10 + $0x144] ss:$16 sps:$4 sm:$0xff]   ;;  %v6581_v35 = vld [vmem:[%s9144_s10 + $0x140] ss:$16 sps:$4 sm:$0xff]  }
 0x2a0   :  { %2686 = vmatprep.mubr.bf16.mxu0 %v2441_v43  ;;  %5625 = vmatprep.mubr.msk.bf16.mxu1 %vm1307_vm0, %v2443_v44  ;;  %v6589_v36 = vld [vmem:[%s9144_s10 + $0x164] ss:$16 sps:$4 sm:$0xff]   ;;  %v6587_v37 = vld [vmem:[%s9144_s10 + $0x160] ss:$16 sps:$4 sm:$0xff]   ;;  %v2759_v43 = vld [vmem:[%s9142_s8 + $0x28] sm:$0x33] }
 0x2a1   :  { %2687 = vmatmul.mubr.bf16.vlgmr.msra.gmra.mrb[8].mxu0 %v2440_v45  ;;  %2727 = vmatmul.mubr.bf16.vlgmr.msra.gmra.mrb[12].mxu1 %v2442_v46  ;;  %v6595_v38 = vld [vmem:[%s9144_s10 + $0x184] ss:$16 sps:$4 sm:$0xff]   ;;  %v6593_v39 = vld [vmem:[%s9144_s10 + $0x180] ss:$16 sps:$4 sm:$0xff]   ;;  %v6516_v45 = vld [vmem:[%s9142_s8 + $0x8] ss:$16 sps:$4 sm:$0xff]   ;;  %v5632_v48 = vcombine.low %v2759_v43, %v2759_v43 }
 0x2a2   :  { %2860 = vmatprep.mubr.bf16.mxu1 %v6993_v3  ;;  %2829 = vmatpush1.bf16.msra.mxu1 %v6511_v47  ;;  %v6601_v40 = vld [vmem:[%s9144_s10 + $0x1a4] ss:$16 sps:$4 sm:$0xff]   ;;  %v6599_v41 = vld [vmem:[%s9144_s10 + $0x1a0] ss:$16 sps:$4 sm:$0xff]   ;;  %v5633_v47 = vcombine.high %v2759_v43, %v2759_v43 }
 0x2a3   :  { %5634 = vmatprep.subr.msk.bf16.mxu1 %vm2815_vm1, %v5631_v52  ;;  %3544 = vmatpush1.bf16.msra.mxu0 %v6521_v9  ;;  %v2823_v50 = vsel %vm2815_vm1, %v5632_v48, 0  ;;  %v6526_v52 = vld [vmem:[%s9144_s10 + $0xc] ss:$16 sps:$4 sm:$0xff]   ;;  %v6584_v9 = vld [vmem:[%s9144_s10 + $0x148] ss:$16 sps:$4 sm:$0xff]  }
 0x2a4   :  { %3545 = vmatprep.subr.bf16.mxu0 %v6529_v11  ;;  %v6590_v11 = vld [vmem:[%s9144_s10 + $0x168] ss:$16 sps:$4 sm:$0xff]   ;;  %v6617_v43 = vld [vmem:[%s9144_s10 + $0x200] ss:$16 sps:$4 sm:$0xff]   ;;  %v6628_v48 = vld [vmem:[%s9144_s10 + $0x22c] ss:$16 sps:$4 sm:$0xff]  }
 0x2a6   :  { %2831 = vmatpush1.bf16.msra.mxu1 %v2817_v2  ;;  %v6566_v2 = vld [vmem:[%s9144_s10 + $0xe8] ss:$16 sps:$4 sm:$0xff]  }
 0x2a7   :  { %2869 = vmatprep.subr.bf16.mxu1 %v6518_v4  ;;  %3546 = vmatpush1.bf16.msra.mxu0 %v6527_v12  ;;  %v6574_v4 = vld [vmem:[%s9144_s10 + $0x10c] ss:$16 sps:$4 sm:$0xff]  }
 0x2a8   :  { %3547 = vmatprep.subr.bf16.mxu0 %v6535_v13  ;;  %v6598_v12 = vld [vmem:[%s9144_s10 + $0x18c] ss:$16 sps:$4 sm:$0xff]   ;;  %v6596_v13 = vld [vmem:[%s9144_s10 + $0x188] ss:$16 sps:$4 sm:$0xff]  }
 0x2ab   :  { %3548 = vmatpush1.bf16.msra.mxu0 %v6533_v16  ;;  %v6604_v16 = vld [vmem:[%s9144_s10 + $0x1ac] ss:$16 sps:$4 sm:$0xff]  }
 0x2ac   :  { %3549 = vmatprep.subr.bf16.mxu0 %v6541_v18  ;;  %v6602_v18 = vld [vmem:[%s9144_s10 + $0x1a8] ss:$16 sps:$4 sm:$0xff]  }
 0x2af   :  { %3550 = vmatpush1.bf16.msra.mxu0 %v6539_v21  ;;  %v6607_v21 = vld [vmem:[%s9144_s10 + $0x1c4] ss:$16 sps:$4 sm:$0xff]  }
 0x2b0   :  { %3551 = vmatprep.subr.bf16.mxu0 %v6547_v22  ;;  %v6610_v22 = vld [vmem:[%s9144_s10 + $0x1cc] ss:$16 sps:$4 sm:$0xff]  }
 0x2b3   :  { %3552 = vmatpush1.bf16.msra.mxu0 %v6545_v19  ;;  %v6605_v19 = vld [vmem:[%s9144_s10 + $0x1c0] ss:$16 sps:$4 sm:$0xff]  }
 0x2b4   :  { %3553 = vmatprep.subr.bf16.mxu0 %v6553_v24  ;;  %v6608_v24 = vld [vmem:[%s9144_s10 + $0x1c8] ss:$16 sps:$4 sm:$0xff]  }
 0x2b7   :  { %3554 = vmatpush1.bf16.msra.mxu0 %v6551_v25  ;;  %v6613_v25 = vld [vmem:[%s9144_s10 + $0x1e4] ss:$16 sps:$4 sm:$0xff]  }
 0x2b8   :  { %3555 = vmatprep.subr.bf16.mxu0 %v6559_v26  ;;  %v6616_v26 = vld [vmem:[%s9144_s10 + $0x1ec] ss:$16 sps:$4 sm:$0xff]  }
 0x2bb   :  { %3556 = vmatpush1.bf16.msra.mxu0 %v6557_v28  ;;  %v6611_v28 = vld [vmem:[%s9144_s10 + $0x1e0] ss:$16 sps:$4 sm:$0xff]  }
 0x2bc   :  { %3557 = vmatprep.subr.bf16.mxu0 %v6565_v29  ;;  %v6614_v29 = vld [vmem:[%s9144_s10 + $0x1e8] ss:$16 sps:$4 sm:$0xff]  }
 0x2bf   :  { %3558 = vmatpush1.bf16.msra.mxu0 %v6563_v30  ;;  %v6619_v30 = vld [vmem:[%s9144_s10 + $0x204] ss:$16 sps:$4 sm:$0xff]  }
 0x2c0   :  { %3559 = vmatprep.subr.bf16.mxu0 %v6571_v20  ;;  %v6622_v20 = vld [vmem:[%s9144_s10 + $0x20c] ss:$16 sps:$4 sm:$0xff]  }
 0x2c3   :  { %3560 = vmatpush1.bf16.msra.mxu0 %v6569_v31  ;;  %v8387_v31 = vld [vmem:[%s9143_s9] sm:$0xf] }
 0x2c4   :  { %3561 = vmatprep.subr.bf16.mxu0 %v6577_v32  ;;  %v2765_v32 = vrot.slane %v8387_v31, %v7926_v49 }
 0x2c7   :  { %3562 = vmatpush1.bf16.msra.mxu0 %v6575_v33  ;;  %v2769_v33 = vrot.slane %v8387_v31, %v7934_v51 }
 0x2c8   :  { %3563 = vmatprep.subr.bf16.mxu0 %v6583_v17 }
 0x2cb   :  { %3564 = vmatpush1.bf16.msra.mxu0 %v6581_v35 }
 0x2cc   :  { %3565 = vmatprep.subr.bf16.mxu0 %v6589_v36 }
 0x2cf   :  { %3566 = vmatpush1.bf16.msra.mxu0 %v6587_v37 }
 0x2d0   :  { %3567 = vmatprep.subr.bf16.mxu0 %v6595_v38 }
 0x2d3   :  { %3568 = vmatpush1.bf16.msra.mxu0 %v6593_v39 }
 0x2d4   :  { %3569 = vmatprep.subr.bf16.mxu0 %v6601_v40 }
 0x2d7   :  { %3570 = vmatpush1.bf16.msra.mxu0 %v6599_v41 }
 0x2d8   :  { %3571 = vmatprep.subr.bf16.mxu0 %v6607_v21  ;;  %v2773_v21 = vrot.slane %v8387_v31, %v8014_v34 }
 0x2db   :  { %3572 = vmatpush1.bf16.msra.mxu0 %v6605_v19  ;;  %v6664_v19 = vld [vmem:[%s9144_s10 + $0x2ec] ss:$16 sps:$4 sm:$0xff]  }
 0x2dc   :  { %3573 = vmatprep.subr.bf16.mxu0 %v6613_v25  ;;  %v6662_v25 = vld [vmem:[%s9144_s10 + $0x2e8] ss:$16 sps:$4 sm:$0xff]  }
 0x2df   :  { %3574 = vmatpush1.bf16.msra.mxu0 %v6611_v28  ;;  %v6667_v28 = vld [vmem:[%s9144_s10 + $0x304] ss:$16 sps:$4 sm:$0xff]  }
 0x2e0   :  { %3584 = vmatprep.subr.bf16.mxu0 %v6619_v30  ;;  %v6665_v30 = vld [vmem:[%s9144_s10 + $0x300] ss:$16 sps:$4 sm:$0xff]  }
 0x374   :  { %v5938_v53 = vpop.f32.mrb[8].mxu0  ;;  %v2728_v23 = vpop.f32.mrb[12].mxu1 }
 0x375   :  { %v5939_v55 = vpop.f32.mrb[9].mxu0  ;;  %v2730_v56 = vpop.f32.mrb[13].mxu1 }
 0x376   :  { %v5940_v57 = vadd.f32 %v5939_v55, %v5938_v53  ;;  %v5941_v58 = vpop.f32.mrb[10].mxu0  ;;  %v2731_v59 = vpop.f32.mrb[14].mxu1  ;;  %v6524_v53 = vld [vmem:[%s9144_s10 + $0x8] ss:$16 sps:$4 sm:$0xff]   ;;  %v6538_v55 = vld [vmem:[%s9144_s10 + $0x4c] ss:$16 sps:$4 sm:$0xff]  }
 0x377   :  { %v5942_v60 = vpop.f32.mrb[11].mxu0  ;;  %v2732_v61 = vpop.f32.mrb[15].mxu1  ;;  %v6536_v56 = vld [vmem:[%s9144_s10 + $0x48] ss:$16 sps:$4 sm:$0xff]   ;;  %v6550_v59 = vld [vmem:[%s9144_s10 + $0x8c] ss:$16 sps:$4 sm:$0xff]  }
 0x378   :  { %v2689_v62 = vadd.f32 %v5940_v57, %v5599_v54  ;;  %v6530_v54 = vld [vmem:[%s9144_s10 + $0x28] ss:$16 sps:$4 sm:$0xff]   ;;  %v6544_v57 = vld [vmem:[%s9144_s10 + $0x6c] ss:$16 sps:$4 sm:$0xff]  }
 0x379   :  { %v6542_v58 = vld [vmem:[%s9144_s10 + $0x68] ss:$16 sps:$4 sm:$0xff]   ;;  %v6556_v61 = vld [vmem:[%s9144_s10 + $0xac] ss:$16 sps:$4 sm:$0xff]  }
 0x37a   :  { %v8165_v27 = vadd.f32 %v2728_v23, %v2689_v62  ;;  %v6532_v23 = vld [vmem:[%s9144_s10 + $0x2c] ss:$16 sps:$4 sm:$0xff]   ;;  %v6548_v60 = vld [vmem:[%s9144_s10 + $0x88] ss:$16 sps:$4 sm:$0xff]  }
 0x37b   :  { %v6554_v62 = vld [vmem:[%s9144_s10 + $0xa8] ss:$16 sps:$4 sm:$0xff]  }
 0x37c   :  { %v2734_v63 = vmul.f32 1.442695, %v8165_v27 }
 0x37e   :  { %6921 = vpow2.f32 %v2734_v63  ;;  %v6560_v63 = vld [vmem:[%s9144_s10 + $0xc8] ss:$16 sps:$4 sm:$0xff]  }
 0x388   :  { %v6922_v5 = vpop.eup %6921 }
 0x389   :  { %v2745_v7 = vmul.f32 %v6922_v5, %v2743_v1  ;;  %v2737_v8 = vsel %vm2736_vm2, %v8165_v27, %v6922_v5  ;;  %v6572_v1 = vld [vmem:[%s9144_s10 + $0x108] ss:$16 sps:$4 sm:$0xff]   ;;  %v6580_v5 = vld [vmem:[%s9144_s10 + $0x12c] ss:$16 sps:$4 sm:$0xff]  }
 0x38a   :  { %2739 = vst.msk [vmem:[#allocation2] sm:$0x3] %vm2738_vm3, %v2737_v8  ;;  %v6586_v8 = vld [vmem:[%s9144_s10 + $0x14c] ss:$16 sps:$4 sm:$0xff]  }
 0x38b   :  { %2747 = vrot.lane.b32.xlu0 %v2745_v7, %s6996_s26  ;;  %v6578_v7 = vld [vmem:[%s9144_s10 + $0x128] ss:$16 sps:$4 sm:$0xff]  }
 0x3fd   :  { %v2748_v42 = vpop.permute.xlu0 %2747 }
 0x3fe   :  { %v2750_v44 = vadd.f32 %v2748_v42, %v8165_v27  ;;  %v6562_v27 = vld [vmem:[%s9144_s10 + $0xcc] ss:$16 sps:$4 sm:$0xff]  }
 0x400   :  { %v2753_v46 = vpack.c.bf16 %v2750_v44, %v2750_v44  ;;  %2752 = vst.msk [vmem:[#allocation4] sm:$0x3] %vm2751_vm4, %v2750_v44  ;;  %v6620_v44 = vld [vmem:[%s9144_s10 + $0x208] ss:$16 sps:$4 sm:$0xff]  }
 0x402   :  { %5635 = vmatmul.mubr.msk.bf16.vlgmr.msra.gmra.mrb[16].mxu1 %vm2736_vm2, %v2753_v46 }
 0x403   :  { %2870 = vmatpush1.bf16.msra.mxu1 %v6516_v45  ;;  %2901 = vmatprep.mubr.bf16.mxu1 %v6993_v3  ;;  %v2777_v45 = vrot.slane %v8387_v31, %v7979_v14 }
 0x404   :  { %5636 = vmatprep.subr.msk.bf16.mxu1 %vm2815_vm1, %v5633_v47  ;;  %v6625_v47 = vld [vmem:[%s9144_s10 + $0x224] ss:$16 sps:$4 sm:$0xff]  }
 0x407   :  { %2872 = vmatpush1.bf16.msra.mxu1 %v2823_v50 }
 0x408   :  { %3625 = vmatprep.subr.bf16.mxu1 %v6526_v52 }
 0x40a   :  { %5637 = vmatmul.mubr.msk.bf16.vlgmr.msra.gmra.mrb[20].mxu1 %vm2736_vm2, %v2753_v46 }
 0x40b   :  { %3626 = vmatpush1.bf16.msra.mxu1 %v6524_v53 }
 0x40c   :  { %3627 = vmatprep.subr.bf16.mxu1 %v6532_v23 }
 0x40f   :  { %3628 = vmatpush1.bf16.msra.mxu1 %v6530_v54  ;;  %v6623_v54 = vld [vmem:[%s9144_s10 + $0x220] ss:$16 sps:$4 sm:$0xff]  }
 0x410   :  { %3629 = vmatprep.subr.bf16.mxu1 %v6538_v55  ;;  %v6626_v55 = vld [vmem:[%s9144_s10 + $0x228] ss:$16 sps:$4 sm:$0xff]  }
 0x413   :  { %3630 = vmatpush1.bf16.msra.mxu1 %v6536_v56 }
 0x414   :  { %3631 = vmatprep.subr.bf16.mxu1 %v6544_v57  ;;  %v6631_v57 = vld [vmem:[%s9144_s10 + $0x244] ss:$16 sps:$4 sm:$0xff]  }
 0x417   :  { %3632 = vmatpush1.bf16.msra.mxu1 %v6542_v58  ;;  %v6634_v58 = vld [vmem:[%s9144_s10 + $0x24c] ss:$16 sps:$4 sm:$0xff]  }
 0x418   :  { %3633 = vmatprep.subr.bf16.mxu1 %v6550_v59 }
 0x41b   :  { %3634 = vmatpush1.bf16.msra.mxu1 %v6548_v60 }
 0x41c   :  { %3635 = vmatprep.subr.bf16.mxu1 %v6556_v61  ;;  %v6629_v61 = vld [vmem:[%s9144_s10 + $0x240] ss:$16 sps:$4 sm:$0xff]  }
 0x41f   :  { %3636 = vmatpush1.bf16.msra.mxu1 %v6554_v62  ;;  %v6632_v62 = vld [vmem:[%s9144_s10 + $0x248] ss:$16 sps:$4 sm:$0xff]  }
 0x420   :  { %3637 = vmatprep.subr.bf16.mxu1 %v6562_v27  ;;  %v6637_v27 = vld [vmem:[%s9144_s10 + $0x264] ss:$16 sps:$4 sm:$0xff]  }
 0x423   :  { %3638 = vmatpush1.bf16.msra.mxu1 %v6560_v63  ;;  %v6640_v63 = vld [vmem:[%s9144_s10 + $0x26c] ss:$16 sps:$4 sm:$0xff]  }
 0x424   :  { %3639 = vmatprep.subr.bf16.mxu1 %v6568_v0  ;;  %v6635_v0 = vld [vmem:[%s9144_s10 + $0x260] ss:$16 sps:$4 sm:$0xff]  }
 0x427   :  { %3640 = vmatpush1.bf16.msra.mxu1 %v6566_v2  ;;  %v6638_v2 = vld [vmem:[%s9144_s10 + $0x268] ss:$16 sps:$4 sm:$0xff]  }
 0x428   :  { %3641 = vmatprep.subr.bf16.mxu1 %v6574_v4  ;;  %v6643_v4 = vld [vmem:[%s9144_s10 + $0x284] ss:$16 sps:$4 sm:$0xff]  }
 0x42b   :  { %3642 = vmatpush1.bf16.msra.mxu1 %v6572_v1  ;;  %v6646_v1 = vld [vmem:[%s9144_s10 + $0x28c] ss:$16 sps:$4 sm:$0xff]  }
 0x42c   :  { %3643 = vmatprep.subr.bf16.mxu1 %v6580_v5  ;;  %v6641_v5 = vld [vmem:[%s9144_s10 + $0x280] ss:$16 sps:$4 sm:$0xff]  }
 0x42f   :  { %3644 = vmatpush1.bf16.msra.mxu1 %v6578_v7  ;;  %v6644_v7 = vld [vmem:[%s9144_s10 + $0x288] ss:$16 sps:$4 sm:$0xff]  }
 0x430   :  { %3645 = vmatprep.subr.bf16.mxu1 %v6586_v8  ;;  %v6649_v8 = vld [vmem:[%s9144_s10 + $0x2a4] ss:$16 sps:$4 sm:$0xff]  }
 0x433   :  { %3646 = vmatpush1.bf16.msra.mxu1 %v6584_v9  ;;  %v6652_v9 = vld [vmem:[%s9144_s10 + $0x2ac] ss:$16 sps:$4 sm:$0xff]  }
 0x434   :  { %3647 = vmatprep.subr.bf16.mxu1 %v6592_v10  ;;  %v6647_v10 = vld [vmem:[%s9144_s10 + $0x2a0] ss:$16 sps:$4 sm:$0xff]  }
 0x437   :  { %3648 = vmatpush1.bf16.msra.mxu1 %v6590_v11  ;;  %v6650_v11 = vld [vmem:[%s9144_s10 + $0x2a8] ss:$16 sps:$4 sm:$0xff]  }
 0x438   :  { %3649 = vmatprep.subr.bf16.mxu1 %v6598_v12  ;;  %v6655_v12 = vld [vmem:[%s9144_s10 + $0x2c4] ss:$16 sps:$4 sm:$0xff]  }
 0x43b   :  { %3650 = vmatpush1.bf16.msra.mxu1 %v6596_v13  ;;  %v6658_v13 = vld [vmem:[%s9144_s10 + $0x2cc] ss:$16 sps:$4 sm:$0xff]  }
 0x43c   :  { %3651 = vmatprep.subr.bf16.mxu1 %v6604_v16  ;;  %v6653_v16 = vld [vmem:[%s9144_s10 + $0x2c0] ss:$16 sps:$4 sm:$0xff]  }
 0x43f   :  { %3652 = vmatpush1.bf16.msra.mxu1 %v6602_v18  ;;  %v6656_v18 = vld [vmem:[%s9144_s10 + $0x2c8] ss:$16 sps:$4 sm:$0xff]  }
 0x440   :  { %3653 = vmatprep.subr.bf16.mxu1 %v6610_v22  ;;  %v6661_v22 = vld [vmem:[%s9144_s10 + $0x2e4] ss:$16 sps:$4 sm:$0xff]  }
 0x443   :  { %3654 = vmatpush1.bf16.msra.mxu1 %v6608_v24  ;;  %v6659_v24 = vld [vmem:[%s9144_s10 + $0x2e0] ss:$16 sps:$4 sm:$0xff]  }
 0x444   :  { %3655 = vmatprep.subr.bf16.mxu1 %v6616_v26 }
 0x447   :  { %3656 = vmatpush1.bf16.msra.mxu1 %v6614_v29  ;;  %v6670_v29 = vld [vmem:[%s9144_s10 + $0x30c] ss:$16 sps:$4 sm:$0xff]  }
 0x448   :  { %3666 = vmatprep.subr.bf16.mxu1 %v6622_v20  ;;  %v6668_v20 = vld [vmem:[%s9144_s10 + $0x308] ss:$16 sps:$4 sm:$0xff]  }
 0x4d5   :  { %v2862_v17 = vpop.f32.mrb[16].mxu1 }
 0x4d6   :  { %v2863_v35 = vadd.f32 %v2862_v17, %v2765_v32  ;;  %v2864_v36 = vpop.f32.mrb[17].mxu1  ;;  %v6673_v32 = vld [vmem:[%s9146_s12 + $0x4] ss:$28 sps:$4 sm:$0xff]  }
 0x4d7   :  { %v2865_v37 = vadd.f32 %v2864_v36, %v2769_v33  ;;  %v2866_v38 = vpop.f32.mrb[18].mxu1  ;;  %v6676_v33 = vld [vmem:[%s9146_s12 + $0xc] ss:$28 sps:$4 sm:$0xff]   ;;  %v6671_v17 = vld [vmem:[%s9146_s12] ss:$28 sps:$4 sm:$0xff]  }
 0x4d8   :  { %v2910_v39 = vmax.f32 %v2863_v35, 0.0  ;;  %v2867_v40 = vpop.f32.mrb[19].mxu1  ;;  %v6674_v35 = vld [vmem:[%s9146_s12 + $0x8] ss:$28 sps:$4 sm:$0xff]  }
 0x4d9   :  { %v2911_v41 = vmax.f32 %v2865_v37, 0.0  ;;  %v6679_v37 = vld [vmem:[%s9146_s12 + $0x3c] ss:$28 sps:$4 sm:$0xff]   ;;  %v6682_v38 = vld [vmem:[%s9146_s12 + $0x44] ss:$28 sps:$4 sm:$0xff]  }
 0x4da   :  { %v2914_v46 = vpack.c.bf16 %v2910_v39, %v2910_v39  ;;  %v6677_v39 = vld [vmem:[%s9146_s12 + $0x38] ss:$28 sps:$4 sm:$0xff]   ;;  %v6680_v40 = vld [vmem:[%s9146_s12 + $0x40] ss:$28 sps:$4 sm:$0xff]  }
 0x4db   :  { %v2915_v42 = vpack.c.bf16 %v2911_v41, %v2911_v41  ;;  %v6685_v41 = vld [vmem:[%s9146_s12 + $0x74] ss:$28 sps:$4 sm:$0xff]  }
 0x4dd   :  { %v8407_v50 = vpop.f32.mrb[20].mxu1  ;;  %3575 = vmatprep.mubr.bf16.mxu0 %v2915_v42  ;;  %3657 = vmatprep.mubr.bf16.mxu1 %v2915_v42  ;;  %v6688_v42 = vld [vmem:[%s9146_s12 + $0x7c] ss:$28 sps:$4 sm:$0xff]  }
 0x4de   :  { %v2905_v52 = vpop.f32.mrb[21].mxu1  ;;  %3576 = vmatmul.mubr.bf16.vlgmr.msra.gmra.mrb[12].mxu0 %v2914_v46  ;;  %3658 = vmatmul.mubr.bf16.vlgmr.msra.gmra.mrb[24].mxu1 %v2914_v46  ;;  %v2904_v26 = vadd.f32 %v8407_v50, %v2773_v21  ;;  %v6694_v46 = vld [vmem:[%s9146_s12 + $0xb4] ss:$28 sps:$4 sm:$0xff]   ;;  %v6697_v50 = vld [vmem:[%s9146_s12 + $0xe4] ss:$28 sps:$4 sm:$0xff]  }
 0x4df   :  { %v2906_v53 = vadd.f32 %v2905_v52, %v2777_v45  ;;  %3585 = vmatpush1.bf16.msra.mxu0 %v6617_v43  ;;  %3667 = vmatpush1.bf16.msra.mxu1 %v6620_v44  ;;  %v2907_v23 = vpop.f32.mrb[22].mxu1  ;;  %v6683_v43 = vld [vmem:[%s9146_s12 + $0x70] ss:$28 sps:$4 sm:$0xff]   ;;  %v6686_v44 = vld [vmem:[%s9146_s12 + $0x78] ss:$28 sps:$4 sm:$0xff]  }
 0x4e0   :  { %v2908_v56 = vpop.f32.mrb[23].mxu1  ;;  %3586 = vmatprep.subr.bf16.mxu0 %v6625_v47  ;;  %3668 = vmatprep.subr.bf16.mxu1 %v6628_v48  ;;  %v2912_v31 = vmax.f32 %v2904_v26, 0.0  ;;  %v6691_v45 = vld [vmem:[%s9146_s12 + $0xac] ss:$28 sps:$4 sm:$0xff]   ;;  %v6742_v21 = vld [vmem:[%s9146_s12 + $0x274] ss:$28 sps:$4 sm:$0xff]  }
 0x4e1   :  { %v2913_v59 = vmax.f32 %v2906_v53, 0.0  ;;  %v6689_v47 = vld [vmem:[%s9146_s12 + $0xa8] ss:$28 sps:$4 sm:$0xff]   ;;  %v6692_v48 = vld [vmem:[%s9146_s12 + $0xb0] ss:$28 sps:$4 sm:$0xff]  }
 0x4e2   :  { %v2916_v36 = vpack.c.bf16 %v2912_v31, %v2912_v31  ;;  %v6700_v52 = vld [vmem:[%s9146_s12 + $0xec] ss:$28 sps:$4 sm:$0xff]   ;;  %v6695_v53 = vld [vmem:[%s9146_s12 + $0xe0] ss:$28 sps:$4 sm:$0xff]   ;;  %v6701_v56 = vld [vmem:[%s9146_s12 + $0x118] ss:$28 sps:$4 sm:$0xff]  }
 0x4e3   :  { %v2917_v60 = vpack.c.bf16 %v2913_v59, %v2913_v59  ;;  %3587 = vmatpush1.bf16.msra.mxu0 %v6623_v54  ;;  %3669 = vmatpush1.bf16.msra.mxu1 %v6626_v55  ;;  %v6698_v23 = vld [vmem:[%s9146_s12 + $0xe8] ss:$28 sps:$4 sm:$0xff]   ;;  %v6703_v54 = vld [vmem:[%s9146_s12 + $0x11c] ss:$28 sps:$4 sm:$0xff]  }
 0x4e4   :  { %3588 = vmatprep.subr.bf16.mxu0 %v6631_v57  ;;  %3670 = vmatprep.subr.bf16.mxu1 %v6634_v58  ;;  %v6706_v55 = vld [vmem:[%s9146_s12 + $0x124] ss:$28 sps:$4 sm:$0xff]   ;;  %v6709_v58 = vld [vmem:[%s9146_s12 + $0x154] ss:$28 sps:$4 sm:$0xff]   ;;  %v6712_v59 = vld [vmem:[%s9146_s12 + $0x15c] ss:$28 sps:$4 sm:$0xff]  }
 0x4e5   :  { %5738 = vmatprep.mubr.msk.bf16.mxu0 %vm1307_vm0, %v2917_v60  ;;  %5739 = vmatprep.mubr.msk.bf16.mxu1 %vm1307_vm0, %v2917_v60  ;;  %v6704_v57 = vld [vmem:[%s9146_s12 + $0x120] ss:$28 sps:$4 sm:$0xff]   ;;  %v6707_v60 = vld [vmem:[%s9146_s12 + $0x150] ss:$28 sps:$4 sm:$0xff]  }
 0x4e6   :  { %v6743_v26 = vld [vmem:[%s9146_s12 + $0x2a0] ss:$28 sps:$4 sm:$0xff]  }
 0x4e7   :  { %3589 = vmatpush1.bf16.msra.mxu0 %v6629_v61  ;;  %3671 = vmatpush1.bf16.msra.mxu1 %v6632_v62  ;;  %v6710_v61 = vld [vmem:[%s9146_s12 + $0x158] ss:$28 sps:$4 sm:$0xff]   ;;  %v6715_v62 = vld [vmem:[%s9146_s12 + $0x18c] ss:$28 sps:$4 sm:$0xff]   ;;  %v6752_v31 = vld [vmem:[%s9146_s12 + $0x2e0] ss:$28 sps:$4 sm:$0xff]  }
 0x4e8   :  { %3590 = vmatprep.subr.bf16.mxu0 %v6637_v27  ;;  %3672 = vmatprep.subr.bf16.mxu1 %v6640_v63  ;;  %v6718_v27 = vld [vmem:[%s9146_s12 + $0x194] ss:$28 sps:$4 sm:$0xff]   ;;  %v6713_v63 = vld [vmem:[%s9146_s12 + $0x188] ss:$28 sps:$4 sm:$0xff]  }
 0x4eb   :  { %3591 = vmatpush1.bf16.msra.mxu0 %v6635_v0  ;;  %3673 = vmatpush1.bf16.msra.mxu1 %v6638_v2  ;;  %v6716_v0 = vld [vmem:[%s9146_s12 + $0x190] ss:$28 sps:$4 sm:$0xff]   ;;  %v6721_v2 = vld [vmem:[%s9146_s12 + $0x1c4] ss:$28 sps:$4 sm:$0xff]  }
 0x4ec   :  { %3592 = vmatprep.subr.bf16.mxu0 %v6643_v4  ;;  %3674 = vmatprep.subr.bf16.mxu1 %v6646_v1  ;;  %v6724_v4 = vld [vmem:[%s9146_s12 + $0x1cc] ss:$28 sps:$4 sm:$0xff]   ;;  %v6719_v1 = vld [vmem:[%s9146_s12 + $0x1c0] ss:$28 sps:$4 sm:$0xff]  }
 0x4ef   :  { %3593 = vmatpush1.bf16.msra.mxu0 %v6641_v5  ;;  %3675 = vmatpush1.bf16.msra.mxu1 %v6644_v7  ;;  %v6722_v5 = vld [vmem:[%s9146_s12 + $0x1c8] ss:$28 sps:$4 sm:$0xff]   ;;  %v6727_v7 = vld [vmem:[%s9146_s12 + $0x1fc] ss:$28 sps:$4 sm:$0xff]  }
 0x4f0   :  { %3594 = vmatprep.subr.bf16.mxu0 %v6649_v8  ;;  %3676 = vmatprep.subr.bf16.mxu1 %v6652_v9  ;;  %v6730_v8 = vld [vmem:[%s9146_s12 + $0x204] ss:$28 sps:$4 sm:$0xff]   ;;  %v6725_v9 = vld [vmem:[%s9146_s12 + $0x1f8] ss:$28 sps:$4 sm:$0xff]  }
 0x4f3   :  { %3595 = vmatpush1.bf16.msra.mxu0 %v6647_v10  ;;  %3677 = vmatpush1.bf16.msra.mxu1 %v6650_v11  ;;  %v6728_v10 = vld [vmem:[%s9146_s12 + $0x200] ss:$28 sps:$4 sm:$0xff]   ;;  %v6733_v11 = vld [vmem:[%s9146_s12 + $0x234] ss:$28 sps:$4 sm:$0xff]  }
 0x4f4   :  { %3596 = vmatprep.subr.bf16.mxu0 %v6655_v12  ;;  %3678 = vmatprep.subr.bf16.mxu1 %v6658_v13  ;;  %v6736_v12 = vld [vmem:[%s9146_s12 + $0x23c] ss:$28 sps:$4 sm:$0xff]   ;;  %v6731_v13 = vld [vmem:[%s9146_s12 + $0x230] ss:$28 sps:$4 sm:$0xff]  }
 0x4f7   :  { %3597 = vmatpush1.bf16.msra.mxu0 %v6653_v16  ;;  %3679 = vmatpush1.bf16.msra.mxu1 %v6656_v18  ;;  %v6734_v16 = vld [vmem:[%s9146_s12 + $0x238] ss:$28 sps:$4 sm:$0xff]   ;;  %v6739_v18 = vld [vmem:[%s9146_s12 + $0x26c] ss:$28 sps:$4 sm:$0xff]  }
 0x4f8   :  { %3598 = vmatprep.subr.bf16.mxu0 %v6661_v22  ;;  %3680 = vmatprep.subr.bf16.mxu1 %v6664_v19  ;;  %v6737_v22 = vld [vmem:[%s9146_s12 + $0x268] ss:$28 sps:$4 sm:$0xff]   ;;  %v6740_v19 = vld [vmem:[%s9146_s12 + $0x270] ss:$28 sps:$4 sm:$0xff]  }
 0x4fb   :  { %3599 = vmatpush1.bf16.msra.mxu0 %v6659_v24  ;;  %3681 = vmatpush1.bf16.msra.mxu1 %v6662_v25  ;;  %v6745_v24 = vld [vmem:[%s9146_s12 + $0x2a4] ss:$28 sps:$4 sm:$0xff]   ;;  %v6748_v25 = vld [vmem:[%s9146_s12 + $0x2ac] ss:$28 sps:$4 sm:$0xff]  }
 0x4fc   :  { %3600 = vmatprep.subr.bf16.mxu0 %v6667_v28  ;;  %3682 = vmatprep.subr.bf16.mxu1 %v6670_v29  ;;  %v6746_v28 = vld [vmem:[%s9146_s12 + $0x2a8] ss:$28 sps:$4 sm:$0xff]   ;;  %v6751_v29 = vld [vmem:[%s9146_s12 + $0x2dc] ss:$28 sps:$4 sm:$0xff]  }
 0x4ff   :  { %3601 = vmatpush1.bf16.msra.mxu0 %v6665_v30  ;;  %3683 = vmatpush1.bf16.msra.mxu1 %v6668_v20  ;;  %v6754_v30 = vld [vmem:[%s9146_s12 + $0x2e4] ss:$28 sps:$4 sm:$0xff]   ;;  %v6749_v20 = vld [vmem:[%s9146_s12 + $0x2d8] ss:$28 sps:$4 sm:$0xff]  }
 0x500   :  { %4855 = vmatprep.subr.bf16.mxu0 %v6673_v32  ;;  %4937 = vmatprep.subr.bf16.mxu1 %v6676_v33  ;;  %v6757_v32 = vld [vmem:[%s9146_s12 + $0x314] ss:$28 sps:$4 sm:$0xff]   ;;  %v6760_v33 = vld [vmem:[%s9146_s12 + $0x31c] ss:$28 sps:$4 sm:$0xff]  }
 0x502   :  { %3617 = vmatmul.mubr.bf16.vlgmr.msra.gmra.mrb[12].mxu0 %v2916_v36  ;;  %3699 = vmatmul.mubr.bf16.vlgmr.msra.gmra.mrb[24].mxu1 %v2916_v36  ;;  %v6763_v36 = vld [vmem:[%s9146_s12 + $0x34c] ss:$28 sps:$4 sm:$0xff]  }
 0x503   :  { %4856 = vmatpush1.bf16.msra.mxu0 %v6671_v17  ;;  %4938 = vmatpush1.bf16.msra.mxu1 %v6674_v35  ;;  %v6755_v17 = vld [vmem:[%s9146_s12 + $0x310] ss:$28 sps:$4 sm:$0xff]   ;;  %v6758_v35 = vld [vmem:[%s9146_s12 + $0x318] ss:$28 sps:$4 sm:$0xff]  }
 0x504   :  { %4857 = vmatprep.subr.bf16.mxu0 %v6679_v37  ;;  %4939 = vmatprep.subr.bf16.mxu1 %v6682_v38  ;;  %v6766_v37 = vld [vmem:[%s9146_s12 + $0x354] ss:$28 sps:$4 sm:$0xff]   ;;  %v6761_v38 = vld [vmem:[%s9146_s12 + $0x348] ss:$28 sps:$4 sm:$0xff]  }
 0x507   :  { %4858 = vmatpush1.bf16.msra.mxu0 %v6677_v39  ;;  %4940 = vmatpush1.bf16.msra.mxu1 %v6680_v40  ;;  %v6764_v39 = vld [vmem:[%s9146_s12 + $0x350] ss:$28 sps:$4 sm:$0xff]   ;;  %v6769_v40 = vld [vmem:[%s9146_s12 + $0x384] ss:$28 sps:$4 sm:$0xff]  }
 0x508   :  { %4859 = vmatprep.subr.bf16.mxu0 %v6685_v41  ;;  %4941 = vmatprep.subr.bf16.mxu1 %v6688_v42  ;;  %v6772_v41 = vld [vmem:[%s9146_s12 + $0x38c] ss:$28 sps:$4 sm:$0xff]   ;;  %v8705_v42 = vld [vmem:[%s9145_s11] sm:$0xf] }
 0x50b   :  { %4860 = vmatpush1.bf16.msra.mxu0 %v6683_v43  ;;  %4942 = vmatpush1.bf16.msra.mxu1 %v6686_v44  ;;  %v3023_v43 = vrot.slane %v8705_v42, %v7926_v49  ;;  %v3027_v44 = vrot.slane %v8705_v42, %v7934_v51 }
 0x50c   :  { %4861 = vmatprep.subr.bf16.mxu0 %v6691_v45  ;;  %4943 = vmatprep.subr.bf16.mxu1 %v6694_v46  ;;  %v3035_v45 = vrot.slane %v8705_v42, %v7979_v14 }
 0x50f   :  { %4862 = vmatpush1.bf16.msra.mxu0 %v6689_v47  ;;  %4944 = vmatpush1.bf16.msra.mxu1 %v6692_v48 }
 0x510   :  { %4863 = vmatprep.subr.bf16.mxu0 %v6697_v50  ;;  %4945 = vmatprep.subr.bf16.mxu1 %v6700_v52 }
 0x513   :  { %4864 = vmatpush1.bf16.msra.mxu0 %v6695_v53  ;;  %4946 = vmatpush1.bf16.msra.mxu1 %v6698_v23 }
 0x514   :  { %4865 = vmatprep.subr.bf16.mxu0 %v6703_v54  ;;  %4947 = vmatprep.subr.bf16.mxu1 %v6706_v55 }
 0x517   :  { %4866 = vmatpush1.bf16.msra.mxu0 %v6701_v56  ;;  %4948 = vmatpush1.bf16.msra.mxu1 %v6704_v57 }
 0x518   :  { %4867 = vmatprep.subr.bf16.mxu0 %v6709_v58  ;;  %4949 = vmatprep.subr.bf16.mxu1 %v6712_v59 }
 0x51b   :  { %4868 = vmatpush1.bf16.msra.mxu0 %v6707_v60  ;;  %4950 = vmatpush1.bf16.msra.mxu1 %v6710_v61 }
 0x51c   :  { %4869 = vmatprep.subr.bf16.mxu0 %v6715_v62  ;;  %4951 = vmatprep.subr.bf16.mxu1 %v6718_v27  ;;  %v6767_v62 = vld [vmem:[%s9146_s12 + $0x380] ss:$28 sps:$4 sm:$0xff]   ;;  %v6770_v27 = vld [vmem:[%s9146_s12 + $0x388] ss:$28 sps:$4 sm:$0xff]  }
 0x51f   :  { %4870 = vmatpush1.bf16.msra.mxu0 %v6713_v63  ;;  %4952 = vmatpush1.bf16.msra.mxu1 %v6716_v0  ;;  %v6775_v0 = vld [vmem:[%s9146_s12 + $0x3bc] ss:$28 sps:$4 sm:$0xff]  }
 0x520   :  { %4871 = vmatprep.subr.bf16.mxu0 %v6721_v2  ;;  %4953 = vmatprep.subr.bf16.mxu1 %v6724_v4  ;;  %v6778_v2 = vld [vmem:[%s9146_s12 + $0x3c4] ss:$28 sps:$4 sm:$0xff]  }
 0x523   :  { %4872 = vmatpush1.bf16.msra.mxu0 %v6719_v1  ;;  %4954 = vmatpush1.bf16.msra.mxu1 %v6722_v5  ;;  %v6773_v1 = vld [vmem:[%s9146_s12 + $0x3b8] ss:$28 sps:$4 sm:$0xff]   ;;  %v6776_v5 = vld [vmem:[%s9146_s12 + $0x3c0] ss:$28 sps:$4 sm:$0xff]  }
 0x524   :  { %4873 = vmatprep.subr.bf16.mxu0 %v6727_v7  ;;  %4955 = vmatprep.subr.bf16.mxu1 %v6730_v8  ;;  %v6781_v7 = vld [vmem:[%s9146_s12 + $0x3f4] ss:$28 sps:$4 sm:$0xff]   ;;  %v6784_v8 = vld [vmem:[%s9146_s12 + $0x3fc] ss:$28 sps:$4 sm:$0xff]  }
 0x527   :  { %4874 = vmatpush1.bf16.msra.mxu0 %v6725_v9  ;;  %4956 = vmatpush1.bf16.msra.mxu1 %v6728_v10  ;;  %v6779_v9 = vld [vmem:[%s9146_s12 + $0x3f0] ss:$28 sps:$4 sm:$0xff]   ;;  %v6782_v10 = vld [vmem:[%s9146_s12 + $0x3f8] ss:$28 sps:$4 sm:$0xff]  }
 0x528   :  { %4875 = vmatprep.subr.bf16.mxu0 %v6733_v11  ;;  %4957 = vmatprep.subr.bf16.mxu1 %v6736_v12  ;;  %v6787_v11 = vld [vmem:[%s9146_s12 + $0x42c] ss:$28 sps:$4 sm:$0xff]   ;;  %v6790_v12 = vld [vmem:[%s9146_s12 + $0x434] ss:$28 sps:$4 sm:$0xff]  }
 0x52b   :  { %4876 = vmatpush1.bf16.msra.mxu0 %v6731_v13  ;;  %4958 = vmatpush1.bf16.msra.mxu1 %v6734_v16  ;;  %v6785_v13 = vld [vmem:[%s9146_s12 + $0x428] ss:$28 sps:$4 sm:$0xff]   ;;  %v6788_v16 = vld [vmem:[%s9146_s12 + $0x430] ss:$28 sps:$4 sm:$0xff]  }
 0x52c   :  { %4877 = vmatprep.subr.bf16.mxu0 %v6739_v18  ;;  %4959 = vmatprep.subr.bf16.mxu1 %v6742_v21  ;;  %v6793_v18 = vld [vmem:[%s9146_s12 + $0x464] ss:$28 sps:$4 sm:$0xff]   ;;  %v6796_v21 = vld [vmem:[%s9146_s12 + $0x46c] ss:$28 sps:$4 sm:$0xff]  }
 0x52f   :  { %4878 = vmatpush1.bf16.msra.mxu0 %v6737_v22  ;;  %4960 = vmatpush1.bf16.msra.mxu1 %v6740_v19  ;;  %v6791_v22 = vld [vmem:[%s9146_s12 + $0x460] ss:$28 sps:$4 sm:$0xff]   ;;  %v6794_v19 = vld [vmem:[%s9146_s12 + $0x468] ss:$28 sps:$4 sm:$0xff]  }
 0x530   :  { %4879 = vmatprep.subr.bf16.mxu0 %v6745_v24  ;;  %4961 = vmatprep.subr.bf16.mxu1 %v6748_v25  ;;  %v6799_v24 = vld [vmem:[%s9146_s12 + $0x49c] ss:$28 sps:$4 sm:$0xff]   ;;  %v6802_v25 = vld [vmem:[%s9146_s12 + $0x4a4] ss:$28 sps:$4 sm:$0xff]  }
 0x533   :  { %4880 = vmatpush1.bf16.msra.mxu0 %v6743_v26  ;;  %4962 = vmatpush1.bf16.msra.mxu1 %v6746_v28  ;;  %v6797_v26 = vld [vmem:[%s9146_s12 + $0x498] ss:$28 sps:$4 sm:$0xff]   ;;  %v6800_v28 = vld [vmem:[%s9146_s12 + $0x4a0] ss:$28 sps:$4 sm:$0xff]  }
 0x534   :  { %4881 = vmatprep.subr.bf16.mxu0 %v6751_v29  ;;  %4963 = vmatprep.subr.bf16.mxu1 %v6754_v30  ;;  %v6805_v29 = vld [vmem:[%s9146_s12 + $0x4d4] ss:$28 sps:$4 sm:$0xff]   ;;  %v6808_v30 = vld [vmem:[%s9146_s12 + $0x4dc] ss:$28 sps:$4 sm:$0xff]  }
 0x537   :  { %4882 = vmatpush1.bf16.msra.mxu0 %v6749_v20  ;;  %4964 = vmatpush1.bf16.msra.mxu1 %v6752_v31  ;;  %v6803_v20 = vld [vmem:[%s9146_s12 + $0x4d0] ss:$28 sps:$4 sm:$0xff]   ;;  %v6806_v31 = vld [vmem:[%s9146_s12 + $0x4d8] ss:$28 sps:$4 sm:$0xff]  }
 0x538   :  { %4883 = vmatprep.subr.bf16.mxu0 %v6757_v32  ;;  %4965 = vmatprep.subr.bf16.mxu1 %v6760_v33  ;;  %v3031_v32 = vrot.slane %v8705_v42, %v8014_v34  ;;  %v6811_v33 = vld [vmem:[%s9146_s12 + $0x50c] ss:$28 sps:$4 sm:$0xff]  }
 0x53b   :  { %4884 = vmatpush1.bf16.msra.mxu0 %v6755_v17  ;;  %4966 = vmatpush1.bf16.msra.mxu1 %v6758_v35  ;;  %v6814_v17 = vld [vmem:[%s9146_s12 + $0x514] ss:$28 sps:$4 sm:$0xff]   ;;  %v6809_v35 = vld [vmem:[%s9146_s12 + $0x508] ss:$28 sps:$4 sm:$0xff]  }
 0x53c   :  { %4885 = vmatprep.subr.bf16.mxu0 %v6763_v36  ;;  %4967 = vmatprep.subr.bf16.mxu1 %v6766_v37  ;;  %v6812_v36 = vld [vmem:[%s9146_s12 + $0x510] ss:$28 sps:$4 sm:$0xff]  }
 0x53f   :  { %4886 = vmatpush1.bf16.msra.mxu0 %v6761_v38  ;;  %4968 = vmatpush1.bf16.msra.mxu1 %v6764_v39  ;;  %v6817_v38 = vld [vmem:[%s9146_s12 + $0x544] ss:$28 sps:$4 sm:$0xff]   ;;  %v6820_v39 = vld [vmem:[%s9146_s12 + $0x54c] ss:$28 sps:$4 sm:$0xff]  }
 0x540   :  { %4896 = vmatprep.subr.bf16.mxu0 %v6769_v40  ;;  %4978 = vmatprep.subr.bf16.mxu1 %v6772_v41  ;;  %v6815_v40 = vld [vmem:[%s9146_s12 + $0x540] ss:$28 sps:$4 sm:$0xff]   ;;  %v6818_v41 = vld [vmem:[%s9146_s12 + $0x548] ss:$28 sps:$4 sm:$0xff]  }
 0x5d5   :  { %v3618_v46 = vpop.f32.mrb[12].mxu0  ;;  %v8713_v47 = vpop.f32.mrb[24].mxu1 }
 0x5d6   :  { %v5976_v48 = vadd.f32 %v3618_v46, %v3023_v43  ;;  %v3620_v50 = vpop.f32.mrb[13].mxu0  ;;  %v3702_v52 = vpop.f32.mrb[25].mxu1  ;;  %v5978_v37 = vadd.f32 %v8713_v47, %v3031_v32  ;;  %v6823_v43 = vld [vmem:[%s9146_s12 + $0x14] ss:$28 sps:$4 sm:$0xff]   ;;  %v6876_v32 = vld [vmem:[%s9146_s12 + $0x440] ss:$28 sps:$4 sm:$0xff]  }
 0x5d7   :  { %v5977_v53 = vadd.f32 %v3620_v50, %v3027_v44  ;;  %v5979_v23 = vadd.f32 %v3702_v52, %v3035_v45  ;;  %v3622_v54 = vpop.f32.mrb[14].mxu0  ;;  %v3704_v55 = vpop.f32.mrb[26].mxu1  ;;  %v6824_v44 = vld [vmem:[%s9146_s12 + $0x1d8] ss:$28 sps:$4 sm:$0xff]   ;;  %v6821_v45 = vld [vmem:[%s9146_s12 + $0x10] ss:$28 sps:$4 sm:$0xff]  }
 0x5d8   :  { %v3707_v56 = vmax.f32 %v5976_v48, 0.0  ;;  %v3623_v57 = vpop.f32.mrb[15].mxu0  ;;  %v3705_v58 = vpop.f32.mrb[27].mxu1  ;;  %v3709_v42 = vmax.f32 %v5978_v37, 0.0  ;;  %v6825_v47 = vld [vmem:[%s9146_s12 + $0x18] ss:$28 sps:$4 sm:$0xff]  }
 0x5d9   :  { %v3708_v59 = vmax.f32 %v5977_v53, 0.0  ;;  %v3710_v60 = vmax.f32 %v5979_v23, 0.0  ;;  %v6828_v48 = vld [vmem:[%s9146_s12 + $0x4c] ss:$28 sps:$4 sm:$0xff]   ;;  %v6833_v23 = vld [vmem:[%s9146_s12 + $0x84] ss:$28 sps:$4 sm:$0xff]  }
 0x5da   :  { %v8723_v63 = vpack.c.bf16 %v3707_v56, %v3707_v56  ;;  %v8843_v46 = vpack.c.bf16 %v3709_v42, %v3709_v42  ;;  %v6829_v50 = vld [vmem:[%s9146_s12 + $0x210] ss:$28 sps:$4 sm:$0xff]   ;;  %v6826_v52 = vld [vmem:[%s9146_s12 + $0x48] ss:$28 sps:$4 sm:$0xff]   ;;  %v6831_v55 = vld [vmem:[%s9146_s12 + $0x80] ss:$28 sps:$4 sm:$0xff]  }
 0x5db   :  { %v8715_v61 = vpack.c.bf16 %v3708_v59, %v3708_v59  ;;  %v8733_v4 = vpack.c.bf16 %v3710_v60, %v3710_v60  ;;  %v6830_v53 = vld [vmem:[%s9146_s12 + $0x50] ss:$28 sps:$4 sm:$0xff]   ;;  %v6834_v54 = vld [vmem:[%s9146_s12 + $0x248] ss:$28 sps:$4 sm:$0xff]   ;;  %v6838_v57 = vld [vmem:[%s9146_s12 + $0xbc] ss:$28 sps:$4 sm:$0xff]  }
 0x5dc   :  { %v6835_v56 = vld [vmem:[%s9146_s12 + $0x88] ss:$28 sps:$4 sm:$0xff]   ;;  %v6839_v58 = vld [vmem:[%s9146_s12 + $0x280] ss:$28 sps:$4 sm:$0xff]   ;;  %v6836_v59 = vld [vmem:[%s9146_s12 + $0xb8] ss:$28 sps:$4 sm:$0xff]  }
 0x5dd   :  { %4887 = vmatprep.mubr.bf16.mxu0 %v8715_v61  ;;  %4969 = vmatprep.mubr.bf16.mxu1 %v8715_v61  ;;  %v6840_v60 = vld [vmem:[%s9146_s12 + $0xc0] ss:$28 sps:$4 sm:$0xff]   ;;  %v6881_v37 = vld [vmem:[%s9146_s12 + $0x2e8] ss:$28 sps:$4 sm:$0xff]  }
 0x5de   :  { %4888 = vmatmul.mubr.bf16.vlgmr.msra.gmra.mrb[16].mxu0 %v8723_v63  ;;  %4970 = vmatmul.mubr.bf16.vlgmr.msra.gmra.mrb[28].mxu1 %v8723_v63  ;;  %v6891_v42 = vld [vmem:[%s9146_s12 + $0x35c] ss:$28 sps:$4 sm:$0xff]  }
 0x5df   :  { %4897 = vmatpush1.bf16.msra.mxu0 %v6767_v62  ;;  %4979 = vmatpush1.bf16.msra.mxu1 %v6770_v27  ;;  %v6844_v62 = vld [vmem:[%s9146_s12 + $0x2b8] ss:$28 sps:$4 sm:$0xff]   ;;  %v6841_v27 = vld [vmem:[%s9146_s12 + $0xf0] ss:$28 sps:$4 sm:$0xff]  }
 0x5e0   :  { %5915 = vmatprep.mubr.msk.bf16.mxu0 %vm1307_vm0, %v8733_v4  ;;  %5916 = vmatprep.mubr.msk.bf16.mxu1 %vm1307_vm0, %v8733_v4 }
 0x5e1   :  { %4898 = vmatprep.subr.bf16.mxu0 %v6775_v0  ;;  %4980 = vmatprep.subr.bf16.mxu1 %v6778_v2  ;;  %v6845_v0 = vld [vmem:[%s9146_s12 + $0xf8] ss:$28 sps:$4 sm:$0xff]   ;;  %v6848_v2 = vld [vmem:[%s9146_s12 + $0x12c] ss:$28 sps:$4 sm:$0xff]  }
 0x5e3   :  { %4899 = vmatpush1.bf16.msra.mxu0 %v6773_v1  ;;  %4981 = vmatpush1.bf16.msra.mxu1 %v6776_v5  ;;  %v6849_v1 = vld [vmem:[%s9146_s12 + $0x2f0] ss:$28 sps:$4 sm:$0xff]   ;;  %v6846_v5 = vld [vmem:[%s9146_s12 + $0x128] ss:$28 sps:$4 sm:$0xff]  }
 0x5e4   :  { %4900 = vmatprep.subr.bf16.mxu0 %v6781_v7  ;;  %4982 = vmatprep.subr.bf16.mxu1 %v6784_v8  ;;  %v6850_v7 = vld [vmem:[%s9146_s12 + $0x130] ss:$28 sps:$4 sm:$0xff]   ;;  %v6853_v8 = vld [vmem:[%s9146_s12 + $0x164] ss:$28 sps:$4 sm:$0xff]  }
 0x5e7   :  { %4901 = vmatpush1.bf16.msra.mxu0 %v6779_v9  ;;  %4983 = vmatpush1.bf16.msra.mxu1 %v6782_v10  ;;  %v6854_v9 = vld [vmem:[%s9146_s12 + $0x328] ss:$28 sps:$4 sm:$0xff]   ;;  %v6851_v10 = vld [vmem:[%s9146_s12 + $0x160] ss:$28 sps:$4 sm:$0xff]  }
 0x5e8   :  { %4902 = vmatprep.subr.bf16.mxu0 %v6787_v11  ;;  %4984 = vmatprep.subr.bf16.mxu1 %v6790_v12  ;;  %v6855_v11 = vld [vmem:[%s9146_s12 + $0x168] ss:$28 sps:$4 sm:$0xff]   ;;  %v6858_v12 = vld [vmem:[%s9146_s12 + $0x19c] ss:$28 sps:$4 sm:$0xff]  }
 0x5eb   :  { %4903 = vmatpush1.bf16.msra.mxu0 %v6785_v13  ;;  %4985 = vmatpush1.bf16.msra.mxu1 %v6788_v16  ;;  %v6859_v13 = vld [vmem:[%s9146_s12 + $0x360] ss:$28 sps:$4 sm:$0xff]   ;;  %v6856_v16 = vld [vmem:[%s9146_s12 + $0x198] ss:$28 sps:$4 sm:$0xff]  }
 0x5ec   :  { %4904 = vmatprep.subr.bf16.mxu0 %v6793_v18  ;;  %4986 = vmatprep.subr.bf16.mxu1 %v6796_v21  ;;  %v6860_v18 = vld [vmem:[%s9146_s12 + $0x1a0] ss:$28 sps:$4 sm:$0xff]   ;;  %v6863_v21 = vld [vmem:[%s9146_s12 + $0x1d4] ss:$28 sps:$4 sm:$0xff]  }
 0x5ef   :  { %4905 = vmatpush1.bf16.msra.mxu0 %v6791_v22  ;;  %4987 = vmatpush1.bf16.msra.mxu1 %v6794_v19  ;;  %v6861_v22 = vld [vmem:[%s9146_s12 + $0x1d0] ss:$28 sps:$4 sm:$0xff]   ;;  %v6864_v19 = vld [vmem:[%s9146_s12 + $0x398] ss:$28 sps:$4 sm:$0xff]  }
 0x5f0   :  { %4906 = vmatprep.subr.bf16.mxu0 %v6799_v24  ;;  %4988 = vmatprep.subr.bf16.mxu1 %v6802_v25  ;;  %v6867_v24 = vld [vmem:[%s9146_s12 + $0x20c] ss:$28 sps:$4 sm:$0xff]  }
 0x5f1   :  { %v6865_v25 = vld [vmem:[%s9146_s12 + $0x208] ss:$28 sps:$4 sm:$0xff]  }
 0x5f3   :  { %4907 = vmatpush1.bf16.msra.mxu0 %v6797_v26  ;;  %4989 = vmatpush1.bf16.msra.mxu1 %v6800_v28  ;;  %v6868_v26 = vld [vmem:[%s9146_s12 + $0x3d0] ss:$28 sps:$4 sm:$0xff]   ;;  %v6871_v28 = vld [vmem:[%s9146_s12 + $0x244] ss:$28 sps:$4 sm:$0xff]  }
 0x5f4   :  { %4908 = vmatprep.subr.bf16.mxu0 %v6805_v29  ;;  %4990 = vmatprep.subr.bf16.mxu1 %v6808_v30  ;;  %v6869_v29 = vld [vmem:[%s9146_s12 + $0x240] ss:$28 sps:$4 sm:$0xff]   ;;  %v6872_v30 = vld [vmem:[%s9146_s12 + $0x408] ss:$28 sps:$4 sm:$0xff]  }
 0x5f7   :  { %4909 = vmatpush1.bf16.msra.mxu0 %v6803_v20  ;;  %4991 = vmatpush1.bf16.msra.mxu1 %v6806_v31  ;;  %v6875_v20 = vld [vmem:[%s9146_s12 + $0x27c] ss:$28 sps:$4 sm:$0xff]  }
 0x5f8   :  { %4910 = vmatprep.subr.bf16.mxu0 %v6811_v33  ;;  %4992 = vmatprep.subr.bf16.mxu1 %v6814_v17  ;;  %v6873_v31 = vld [vmem:[%s9146_s12 + $0x278] ss:$28 sps:$4 sm:$0xff]   ;;  %v6877_v17 = vld [vmem:[%s9146_s12 + $0x2b0] ss:$28 sps:$4 sm:$0xff]  }
 0x5f9   :  { %v6879_v33 = vld [vmem:[%s9146_s12 + $0x2b4] ss:$28 sps:$4 sm:$0xff]  }
 0x5fb   :  { %4911 = vmatpush1.bf16.msra.mxu0 %v6809_v35  ;;  %4993 = vmatpush1.bf16.msra.mxu1 %v6812_v36  ;;  %v6880_v35 = vld [vmem:[%s9146_s12 + $0x478] ss:$28 sps:$4 sm:$0xff]   ;;  %v6883_v36 = vld [vmem:[%s9146_s12 + $0x2ec] ss:$28 sps:$4 sm:$0xff]  }
 0x5fc   :  { %4912 = vmatprep.subr.bf16.mxu0 %v6817_v38  ;;  %4994 = vmatprep.subr.bf16.mxu1 %v6820_v39  ;;  %v6884_v38 = vld [vmem:[%s9146_s12 + $0x4b0] ss:$28 sps:$4 sm:$0xff]   ;;  %v6887_v39 = vld [vmem:[%s9146_s12 + $0x324] ss:$28 sps:$4 sm:$0xff]  }
 0x5ff   :  { %4913 = vmatpush1.bf16.msra.mxu0 %v6815_v40  ;;  %4995 = vmatpush1.bf16.msra.mxu1 %v6818_v41  ;;  %v6885_v40 = vld [vmem:[%s9146_s12 + $0x320] ss:$28 sps:$4 sm:$0xff]   ;;  %v6888_v41 = vld [vmem:[%s9146_s12 + $0x4e8] ss:$28 sps:$4 sm:$0xff]  }
 0x600   :  { %5019 = vmatprep.subr.bf16.mxu0 %v6823_v43  ;;  %5944 = vmatprep.subr.bf16.mxu1 %v6824_v44  ;;  %v6889_v43 = vld [vmem:[%s9146_s12 + $0x358] ss:$28 sps:$4 sm:$0xff]   ;;  %v6892_v44 = vld [vmem:[%s9146_s12 + $0x520] ss:$28 sps:$4 sm:$0xff]  }
 0x602   :  { %4929 = vmatmul.mubr.bf16.vlgmr.msra.gmra.mrb[16].mxu0 %v8843_v46  ;;  %5011 = vmatmul.mubr.bf16.vlgmr.msra.gmra.mrb[28].mxu1 %v8843_v46 }
 0x603   :  { %5020 = vmatpush1.bf16.msra.mxu0 %v6821_v45  ;;  %5051 = vmatprep.mubr.bf16.mxu0 %v8715_v61  ;;  %v6895_v45 = vld [vmem:[%s9146_s12 + $0x394] ss:$28 sps:$4 sm:$0xff]  }
 0x604   :  { %5945 = vmatpush3.bf16.msra.mxu1 %v6825_v47  ;;  %5133 = vmatprep.mubr.bf16.mxu1 %v8715_v61  ;;  %v6843_v61 = vld [vmem:[%s9146_s12 + $0xf4] ss:$28 sps:$4 sm:$0xff]  }
 0x605   :  { %5021 = vmatprep.subr.bf16.mxu0 %v6828_v48  ;;  %5946 = vmatprep.subr.bf16.mxu1 %v6829_v50  ;;  %v6893_v47 = vld [vmem:[%s9146_s12 + $0x390] ss:$28 sps:$4 sm:$0xff]   ;;  %v6896_v48 = vld [vmem:[%s9146_s12 + $0x558] ss:$28 sps:$4 sm:$0xff]  }
 0x606   :  { %v6899_v50 = vld [vmem:[%s9146_s12 + $0x3cc] ss:$28 sps:$4 sm:$0xff]  }
 0x607   :  { %5022 = vmatpush1.bf16.msra.mxu0 %v6826_v52  ;;  %v6897_v52 = vld [vmem:[%s9146_s12 + $0x3c8] ss:$28 sps:$4 sm:$0xff]  }
 0x608   :  { %5947 = vmatpush3.bf16.msra.mxu1 %v6830_v53  ;;  %5023 = vmatprep.subr.bf16.mxu0 %v6833_v23  ;;  %v6902_v53 = vld [vmem:[%s9146_s12 + $0x404] ss:$28 sps:$4 sm:$0xff]   ;;  %v6908_v23 = vld [vmem:[%s9146_s12 + $0x474] ss:$28 sps:$4 sm:$0xff]  }
 0x609   :  { %5948 = vmatprep.subr.bf16.mxu1 %v6834_v54  ;;  %v6906_v54 = vld [vmem:[%s9146_s12 + $0x470] ss:$28 sps:$4 sm:$0xff]  }
 0x60b   :  { %5024 = vmatpush1.bf16.msra.mxu0 %v6831_v55  ;;  %v6911_v55 = vld [vmem:[%s9146_s12 + $0x4ac] ss:$28 sps:$4 sm:$0xff]  }
 0x60c   :  { %5949 = vmatpush3.bf16.msra.mxu1 %v6835_v56  ;;  %5025 = vmatprep.subr.bf16.mxu0 %v6838_v57  ;;  %v6909_v56 = vld [vmem:[%s9146_s12 + $0x4a8] ss:$28 sps:$4 sm:$0xff]  }
 0x60d   :  { %5950 = vmatprep.subr.bf16.mxu1 %v6839_v58  ;;  %v6914_v57 = vld [vmem:[%s9146_s12 + $0x4e4] ss:$28 sps:$4 sm:$0xff]  }
 0x60e   :  { %v6912_v58 = vld [vmem:[%s9146_s12 + $0x4e0] ss:$28 sps:$4 sm:$0xff]  }
 0x60f   :  { %5026 = vmatpush1.bf16.msra.mxu0 %v6836_v59  ;;  %v6917_v59 = vld [vmem:[%s9146_s12 + $0x51c] ss:$28 sps:$4 sm:$0xff]  }
 0x610   :  { %5951 = vmatpush3.bf16.msra.mxu1 %v6840_v60  ;;  %5027 = vmatprep.subr.bf16.mxu0 %v6843_v61  ;;  %v6915_v60 = vld [vmem:[%s9146_s12 + $0x518] ss:$28 sps:$4 sm:$0xff]  }
 0x611   :  { %5952 = vmatprep.subr.bf16.mxu1 %v6844_v62  ;;  %v6920_v61 = vld [vmem:[%s9146_s12 + $0x554] ss:$28 sps:$4 sm:$0xff]  }
 0x612   :  { %v6918_v62 = vld [vmem:[%s9146_s12 + $0x550] ss:$28 sps:$4 sm:$0xff]  }
 0x613   :  { %5028 = vmatpush1.bf16.msra.mxu0 %v6841_v27 }
 0x614   :  { %5953 = vmatpush3.bf16.msra.mxu1 %v6845_v0  ;;  %5029 = vmatprep.subr.bf16.mxu0 %v6848_v2 }
 0x615   :  { %5954 = vmatprep.subr.bf16.mxu1 %v6849_v1 }
 0x617   :  { %5030 = vmatpush1.bf16.msra.mxu0 %v6846_v5 }
 0x618   :  { %5955 = vmatpush3.bf16.msra.mxu1 %v6850_v7  ;;  %5031 = vmatprep.subr.bf16.mxu0 %v6853_v8 }
 0x619   :  { %5956 = vmatprep.subr.bf16.mxu1 %v6854_v9 }
 0x61b   :  { %5032 = vmatpush1.bf16.msra.mxu0 %v6851_v10 }
 0x61c   :  { %5957 = vmatpush3.bf16.msra.mxu1 %v6855_v11  ;;  %5033 = vmatprep.subr.bf16.mxu0 %v6858_v12 }
 0x61d   :  { %5958 = vmatprep.subr.bf16.mxu1 %v6859_v13 }
 0x61f   :  { %5034 = vmatpush1.bf16.msra.mxu0 %v6856_v16 }
 0x620   :  { %5959 = vmatpush3.bf16.msra.mxu1 %v6860_v18  ;;  %5035 = vmatprep.subr.bf16.mxu0 %v6863_v21 }
 0x621   :  { %5141 = vmatprep.subr.bf16.mxu1 %v6993_v3 }
 0x623   :  { %5134 = vmatmul.mubr.bf16.vlgmr.msra.gmra.mrb[32].mxu1 %v8723_v63  ;;  %5036 = vmatpush1.bf16.msra.mxu0 %v6861_v22 }
 0x624   :  { %5142 = vmatpush1.bf16.msra.mxu1 %v6864_v19  ;;  %5918 = vmatprep.mubr.msk.bf16.mxu1 %vm1307_vm0, %v8733_v4 }
 0x625   :  { %5037 = vmatprep.subr.bf16.mxu0 %v6867_v24  ;;  %5143 = vmatprep.subr.bf16.mxu1 %v6993_v3 }
 0x627   :  { %5038 = vmatpush1.bf16.msra.mxu0 %v6865_v25 }
 0x628   :  { %5144 = vmatpush1.bf16.msra.mxu1 %v6868_v26  ;;  %5039 = vmatprep.subr.bf16.mxu0 %v6871_v28 }
 0x629   :  { %5145 = vmatprep.subr.bf16.mxu1 %v6993_v3 }
 0x62b   :  { %5040 = vmatpush1.bf16.msra.mxu0 %v6869_v29 }
 0x62c   :  { %5146 = vmatpush1.bf16.msra.mxu1 %v6872_v30  ;;  %5041 = vmatprep.subr.bf16.mxu0 %v6875_v20 }
 0x62d   :  { %5147 = vmatprep.subr.bf16.mxu1 %v6993_v3 }
 0x62f   :  { %5042 = vmatpush1.bf16.msra.mxu0 %v6873_v31 }
 0x630   :  { %5148 = vmatpush1.bf16.msra.mxu1 %v6876_v32  ;;  %5043 = vmatprep.subr.bf16.mxu0 %v6879_v33 }
 0x631   :  { %5149 = vmatprep.subr.bf16.mxu1 %v6993_v3 }
 0x633   :  { %5044 = vmatpush1.bf16.msra.mxu0 %v6877_v17 }
 0x634   :  { %5150 = vmatpush1.bf16.msra.mxu1 %v6880_v35  ;;  %5045 = vmatprep.subr.bf16.mxu0 %v6883_v36 }
 0x635   :  { %5151 = vmatprep.subr.bf16.mxu1 %v6993_v3 }
 0x637   :  { %5046 = vmatpush1.bf16.msra.mxu0 %v6881_v37 }
 0x638   :  { %5152 = vmatpush1.bf16.msra.mxu1 %v6884_v38  ;;  %5047 = vmatprep.subr.bf16.mxu0 %v6887_v39 }
 0x639   :  { %5153 = vmatprep.subr.bf16.mxu1 %v6993_v3 }
 0x63b   :  { %5048 = vmatpush1.bf16.msra.mxu0 %v6885_v40 }
 0x63c   :  { %5154 = vmatpush1.bf16.msra.mxu1 %v6888_v41  ;;  %5049 = vmatprep.subr.bf16.mxu0 %v6891_v42 }
 0x63d   :  { %5155 = vmatprep.subr.bf16.mxu1 %v6993_v3 }
 0x63f   :  { %5050 = vmatpush1.bf16.msra.mxu0 %v6889_v43 }
 0x640   :  { %5156 = vmatpush1.bf16.msra.mxu1 %v6892_v44  ;;  %5060 = vmatprep.subr.bf16.mxu0 %v6895_v45 }
 0x641   :  { %5157 = vmatprep.subr.bf16.mxu1 %v6993_v3  ;;  %v6900_v3 = vld [vmem:[%s9146_s12 + $0x400] ss:$28 sps:$4 sm:$0xff]  }
 0x642   :  { %5052 = vmatmul.mubr.bf16.vlgmr.msra.gmra.mrb[20].mxu0 %v8723_v63  ;;  %v6905_v63 = vld [vmem:[%s9146_s12 + $0x43c] ss:$28 sps:$4 sm:$0xff]  }
 0x643   :  { %5061 = vmatpush1.bf16.msra.mxu0 %v6893_v47  ;;  %5917 = vmatprep.mubr.msk.bf16.mxu0 %vm1307_vm0, %v8733_v4  ;;  %v6903_v4 = vld [vmem:[%s9146_s12 + $0x438] ss:$28 sps:$4 sm:$0xff]  }
 0x644   :  { %5158 = vmatpush1.bf16.msra.mxu1 %v6896_v48  ;;  %5062 = vmatprep.subr.bf16.mxu0 %v6899_v50 }
 0x647   :  { %5174 = vmatmul.mubr.bf16.vlgmr.msra.gmra.mrb[36].mxu1 %v8843_v46  ;;  %5063 = vmatpush1.bf16.msra.mxu0 %v6897_v52 }
 0x648   :  { %5064 = vmatprep.subr.bf16.mxu0 %v6902_v53 }
 0x64b   :  { %5065 = vmatpush1.bf16.msra.mxu0 %v6900_v3 }
 0x64c   :  { %5066 = vmatprep.subr.bf16.mxu0 %v6905_v63 }
 0x64f   :  { %5067 = vmatpush1.bf16.msra.mxu0 %v6903_v4 }
 0x650   :  { %5068 = vmatprep.subr.bf16.mxu0 %v6908_v23 }
 0x653   :  { %5069 = vmatpush1.bf16.msra.mxu0 %v6906_v54 }
 0x654   :  { %5070 = vmatprep.subr.bf16.mxu0 %v6911_v55 }
 0x657   :  { %5071 = vmatpush1.bf16.msra.mxu0 %v6909_v56 }
 0x658   :  { %5072 = vmatprep.subr.bf16.mxu0 %v6914_v57 }
 0x65b   :  { %5073 = vmatpush1.bf16.msra.mxu0 %v6912_v58 }
 0x65c   :  { %5074 = vmatprep.subr.bf16.mxu0 %v6917_v59 }
 0x65f   :  { %5075 = vmatpush1.bf16.msra.mxu0 %v6915_v60 }
 0x660   :  { %5076 = vmatprep.subr.bf16.mxu0 %v6920_v61 }
 0x663   :  { %5077 = vmatpush1.bf16.msra.mxu0 %v6918_v62 }
 0x666   :  { %5093 = vmatmul.mubr.bf16.vlgmr.msra.gmra.mrb[20].mxu0 %v8843_v46 }
 0x667   :  { %6934 = shalt.err (!%p6931_p4)
}
 0x668   :  { %s6935_s12 = scalar_lea.hbm %s9149_s15, 32 }
 0x669   :  { %p6936_p5 = scmp.ne.s32.totalorder %s9149_s15, %s6935_s12  ;;  %p6939_p6 = scmp.lt.u32.totalorder %s6935_s12, %s9149_s15 }
 0x66b   :  { %p6941_p7 = pnand %p6939_p6, %p6936_p5 }
 0x66d   :  { %6944 = shalt.err (!%p6941_p7)
}
 0x66e   :  { %5277 = dma.vmem_to_hbm [thread:$0]  %s5275_s19, 32, %s9149_s15, [#allocation5]  }
 0x66f   :  { %s6945_s9 = scalar_lea.vmem %s5265_s20, 32  ;;  %p6950_p9 = scmp.lt.s32.totalorder %s5265_s20, %s5265_s20 }
 0x670   :  { %p6946_p8 = scmp.ne.s32.totalorder %s5265_s20, %s6945_s9  ;;  %p6951_p10 = scmp.lt.s32.totalorder %s6945_s9, %s6945_s9 }
 0x672   :  { %p6952_p11 = por %p6951_p10, %p6950_p9 }
 0x674   :  { %p6953_p12 = pnand %p6952_p11, %p6946_p8 }
 0x676   :  { %6956 = shalt.err (!%p6953_p12)
}
 0x677   :  { %s6957_s11 = scalar_lea.hbm %s9148_s14, 32 }
 0x678   :  { %p6958_p13 = scmp.ne.s32.totalorder %s9148_s14, %s6957_s11  ;;  %p6961_p0 = scmp.lt.u32.totalorder %s6957_s11, %s9148_s14 }
 0x67a   :  { %p6963_p1 = pnand %p6961_p0, %p6958_p13 }
 0x67c   :  { %6966 = shalt.err (!%p6963_p1)
}
 0x67d   :  { %5267 = dma.vmem_to_hbm [thread:$0]  %s5265_s20, 32, %s9148_s14, [#allocation3]   ;;  %v3915_v46 = vld [vmem:[%s9147_s13] sm:$0x7f]  ;;  %v3943_v30 = vsub.s32 6, %v7098_v6  ;;  %v3935_v37 = vsub.s32 4, %v7098_v6 }
 0x67e   :  { %v3920_v27 = vrot.slane %v3915_v46, %v7926_v49  ;;  %v3928_v0 = vrot.slane %v3915_v46, %v8014_v34  ;;  %v3924_v2 = vrot.slane %v3915_v46, %v7934_v51  ;;  %v3932_v1 = vrot.slane %v3915_v46, %v7979_v14  ;;  %s6999_s13 = smov [#allocation6]  }
 0x67f   :  { %v3944_v20 = vrot.slane %v3915_v46, %v3943_v30  ;;  %vm5244_vm5 = vcmask 1040384   ;;  %vm5245_vm6 = vcmask 1041409   ;;  %v3939_v38 = vsub.s32 5, %v7098_v6  ;;  %s5284_s14 = sshll.u32 %s6999_s13, 4  ;;  %s5285_s14 = int_to_ptr.vmem [resolvable:$true] %s5284_s14 }
 0x680   :  { %vm5246_vm7 = vmor %vm5245_vm6, %vm5244_vm5  ;;  %vm5247_vm8 = vcmask 1042434   ;;  %v3936_v39 = vrot.slane %v3915_v46, %v3935_v37  ;;  %vm5249_vm10 = vcmask 1043459   ;;  %vm5251_vm12 = vcmask 1044484   ;;  %s6967_s5 = scalar_lea.vmem %s5285_s14, 112  ;;  %s6971_s6 = scalar_lea.vmem %s5285_s14, 128 }
 0x681   :  { %v3940_v40 = vrot.slane %v3915_v46, %v3939_v38  ;;  %vm5248_vm9 = vmor %vm5247_vm8, %vm5246_vm7  ;;  %vm5253_vm14 = vcmask 1045509   ;;  %vm5255_vm0 = vcmask 129030   ;;  %p6968_p2 = scmp.ne.s32.totalorder %s5285_s14, %s6967_s5  ;;  %p6972_p3 = scmp.lt.s32.totalorder %s5285_s14, %s5285_s14 }
 0x682   :  { %vm5250_vm11 = vmor %vm5249_vm10, %vm5248_vm9  ;;  %p6973_p4 = scmp.lt.s32.totalorder %s6971_s6, %s6967_s5 }
 0x683   :  { %vm5252_vm13 = vmor %vm5251_vm12, %vm5250_vm11 }
 0x684   :  { %vm5254_vm15 = vmor %vm5253_vm14, %vm5252_vm13  ;;  %p6974_p5 = por %p6973_p4, %p6972_p3 }
 0x685   :  { %vm5256_vm1 = vmor %vm5255_vm0, %vm5254_vm15 }
 0x686   :  { %p6975_p6 = pnand %p6974_p5, %p6968_p2 }
 0x6d5   :  { %v4930_v5 = vpop.f32.mrb[16].mxu0  ;;  %v5012_v7 = vpop.f32.mrb[28].mxu1 }
 0x6d6   :  { %v5980_v8 = vadd.f32 %v4930_v5, %v3920_v27  ;;  %v5982_v9 = vadd.f32 %v5012_v7, %v3928_v0  ;;  %v4932_v10 = vpop.f32.mrb[17].mxu0  ;;  %v5014_v11 = vpop.f32.mrb[29].mxu1 }
 0x6d7   :  { %v5981_v12 = vadd.f32 %v4932_v10, %v3924_v2  ;;  %v5983_v13 = vadd.f32 %v5014_v11, %v3932_v1  ;;  %v4934_v16 = vpop.f32.mrb[18].mxu0  ;;  %v5016_v18 = vpop.f32.mrb[30].mxu1 }
 0x6d8   :  { %v4935_v21 = vpop.f32.mrb[19].mxu0  ;;  %v5017_v22 = vpop.f32.mrb[31].mxu1 }
 0x6d9   :  { %v5919_v19 = vpack.c.bf16 %v5981_v12, %v5980_v8  ;;  %v5920_v49 = vpack.c.bf16 %v5983_v13, %v5982_v9 }
 0x6db   :  { %v5204_v34 = vrot.slane %v5919_v19, %v7116_v15  ;;  %v5211_v51 = vrot.slane %v5920_v49, %v7116_v15 }
 0x6dd   :  { %v5226_v24 = vcombine.low %v5204_v34, %v5211_v51 }
 0x6df   :  { %v5234_v3 = vrot.slane %v5226_v24, %v7116_v15 }
 0x6f6   :  { %v5960_v14 = vpop.f32.mrb[32].mxu1 }
 0x6f7   :  { %v5961_v25 = vpop.f32.mrb[33].mxu1 }
 0x6f8   :  { %v5962_v26 = vadd.f32 %v5961_v25, %v5960_v14  ;;  %v5963_v28 = vpop.f32.mrb[34].mxu1 }
 0x6f9   :  { %v5964_v29 = vpop.f32.mrb[35].mxu1 }
 0x6fa   :  { %v5136_v31 = vadd.f32 %v5962_v26, %v3944_v20 }
 0x71a   :  { %v5175_v32 = vpop.f32.mrb[36].mxu1 }
 0x71b   :  { %v5176_v33 = vadd.f32 %v5175_v32, %v5136_v31  ;;  %v5177_v17 = vpop.f32.mrb[37].mxu1 }
 0x71c   :  { %v5178_v35 = vpop.f32.mrb[38].mxu1 }
 0x71d   :  { %v5179_v36 = vpop.f32.mrb[39].mxu1  ;;  %v5187_v44 = vpack.c.bf16 %v5176_v33, %v5176_v33 }
 0x71f   :  { %v5225_v6 = vrot.slane %v5187_v44, %v7116_v15 }
 0x739   :  { %v5094_v41 = vpop.f32.mrb[20].mxu0 }
 0x73a   :  { %v5984_v42 = vadd.f32 %v5094_v41, %v3936_v39  ;;  %v5096_v43 = vpop.f32.mrb[21].mxu0 }
 0x73b   :  { %v5985_v45 = vadd.f32 %v5096_v43, %v3940_v40  ;;  %v5098_v47 = vpop.f32.mrb[22].mxu0 }
 0x73c   :  { %v5099_v48 = vpop.f32.mrb[23].mxu0 }
 0x73d   :  { %v5921_v50 = vpack.c.bf16 %v5985_v45, %v5984_v42 }
 0x73f   :  { %v5218_v52 = vrot.slane %v5921_v50, %v7116_v15 }
 0x741   :  { %v5227_v53 = vcombine.low %v5218_v52, %v5225_v6 }
 0x743   :  { %v5241_v63 = vrot.slane %v5227_v53, %v7116_v15 }
 0x745   :  { %v5242_v4 = vcombine.low %v5234_v3, %v5241_v63 }
 0x747   :  { %5257 = vst.msk [vmem:[#allocation6] sm:$0x7f] %vm5256_vm1, %v5242_v4 }
 0x748   :  { %6978 = shalt.err (!%p6975_p6)
}
 0x749   :  { %s6979_s2 = scalar_lea.hbm %s9150_s16, 112 }
 0x74a   :  { %p6980_p7 = scmp.ne.s32.totalorder %s9150_s16, %s6979_s2  ;;  %p6983_p8 = scmp.lt.u32.totalorder %s6979_s2, %s9150_s16 }
 0x74c   :  { %p6985_p9 = pnand %p6983_p8, %p6980_p7 }
 0x74e   :  { %6988 = shalt.err (!%p6985_p9)
}
 0x74f   :  { %5287 = dma.vmem_to_hbm [thread:$0]  %s5285_s14, 112, %s9150_s16, [#allocation5]  }
 0x750   :  { %6989 = dma.done.wait [#allocation3], 32  }
 0x751   :  { %6990 = vsyncadd [#allocation3], 4294967264 }
 0x752   :  { %6991 = dma.done.wait [#allocation5], 144  }
 0x753   :  { %6992 = vsyncadd [#allocation5], 4294967152 }
 0x754   :  { %5297 = vsyncpa [#allocation3], 1 }
 0x755   :  { %5298 = vsyncpa [#allocation5], 1 }

// kernel: tpu_custom_call.1
= control target key start
LH: loop header
LB: loop body
LE: loop exit
PB: predicated region body
PF: predicated region fallthrough
CT: control target
= control target key end

     0   :  { %s9134_s0 = inlined_call_operand.vmem [shape: bf16[2,784], index: 0, kind: input, shape index: {}]   ;;  %s9135_s1 = inlined_call_operand.vmem [shape: f32[1,2,20], index: 1, kind: input, shape index: {}]   ;;  %s9136_s2 = inlined_call_operand.vmem [shape: bf16[784,400], index: 2, kind: input, shape index: {}]   ;;  %s9137_s3 = inlined_call_operand.vmem [shape: f32[1,400], index: 3, kind: input, shape index: {}]   ;;  %s9138_s4 = inlined_call_operand.vmem [shape: bf16[400,400], index: 4, kind: input, shape index: {}]   ;;  %s9139_s5 = inlined_call_operand.vmem [shape: f32[1,400], index: 5, kind: input, shape index: {}]   ;;  %s9140_s6 = inlined_call_operand.vmem [shape: bf16[400,40], index: 6, kind: input, shape index: {}]   ;;  %s9141_s7 = inlined_call_operand.vmem [shape: f32[1,40], index: 7, kind: input, shape index: {}]   ;;  %s9142_s8 = inlined_call_operand.vmem [shape: bf16[20,400], index: 8, kind: input, shape index: {}]   ;;  %s9143_s9 = inlined_call_operand.vmem [shape: f32[1,400], index: 9, kind: input, shape index: {}]   ;;  %s9144_s10 = inlined_call_operand.vmem [shape: bf16[400,400], index: 10, kind: input, shape index: {}]   ;;  %s9145_s11 = inlined_call_operand.vmem [shape: f32[1,400], index: 11, kind: input, shape index: {}]   ;;  %s9146_s12 = inlined_call_operand.vmem [shape: bf16[400,784], index: 12, kind: input, shape index: {}]   ;;  %s9147_s13 = inlined_call_operand.vmem [shape: f32[1,784], index: 13, kind: input, shape index: {}]   ;;  %s9148_s14 = inlined_call_operand.hbm [shape: f32[2,40], index: 14, kind: output, shape index: {0}]   ;;  %s9149_s15 = inlined_call_operand.hbm [shape: f32[1,2,20], index: 15, kind: output, shape index: {1}]   ;;  %s9150_s16 = inlined_call_operand.hbm [shape: bf16[1,2,784], index: 16, kind: output, shape index: {2}]  }
   0x1   :  { %9151 = sst [smem:[#allocation9_spill]] %s9134_s0 }
   0x2   :  { %22 = vsyncpa [#allocation3], 0  ;;  %v6041_v0 = vld [vmem:[%s9136_s2 + $0x4] ss:$16 sps:$4 sm:$0xff]   ;;  %v252_v1 = vlaneseq  ;;  %v6043_v2 = vld [vmem:[%s9136_s2] ss:$16 sps:$4 sm:$0xff]  }
   0x3   :  { %v6993_v3 = vmov 0   ;;  %1311 = vmatprep.subr.bf16.mxu0 %v6041_v0  ;;  %v6044_v4 = vld [vmem:[%s9136_s2 + $0x24] ss:$16 sps:$4 sm:$0xff]   ;;  %v6046_v5 = vld [vmem:[%s9136_s2 + $0x20] ss:$16 sps:$4 sm:$0xff]   ;;  %s9152_s24 = sld [smem:[#allocation9_spill]] }
   0x4   :  { %1466 = vmatprep.mubr.bf16.mxu1 %v6993_v3  ;;  %v7098_v6 = vshrl.u32 %v252_v1, 7  ;;  %v6994_v7 = vmov 1966171168   ;;  %1312 = vmatpush1.bf16.msra.mxu0 %v6043_v2  ;;  %v6047_v9 = vld [vmem:[%s9136_s2 + $0x604] ss:$16 sps:$4 sm:$0xff]   ;;  %vm1307_vm0 = vcmask 130048  }
   0x5   :  { %v275_v8 = vunpack.c.l.s4 %v6994_v7  ;;  %v6049_v10 = vld [vmem:[%s9136_s2 + $0x600] ss:$16 sps:$4 sm:$0xff]   ;;  %1313 = vmatprep.subr.bf16.mxu0 %v6044_v4  ;;  %v6050_v11 = vld [vmem:[%s9136_s2 + $0x44] ss:$16 sps:$4 sm:$0xff]   ;;  %1434 = vmatprep.subr.bf16.mxu1 %v6047_v9  ;;  %v6055_v13 = vld [vmem:[%s9136_s2 + $0xc] ss:$16 sps:$4 sm:$0xff]  }
   0x6   :  { %1435 = vmatpush1.bf16.msra.mxu1 %v6049_v10  ;;  %v6052_v16 = vld [vmem:[%s9136_s2 + $0x40] ss:$16 sps:$4 sm:$0xff]   ;;  %v6057_v18 = vld [vmem:[%s9136_s2 + $0x64] ss:$16 sps:$4 sm:$0xff]   ;;  %v6053_v21 = vld [vmem:[%s9136_s2 + $0x8] ss:$16 sps:$4 sm:$0xff]  }
   0x7   :  { %v276_v12 = vunpack.c.0.s8 %v275_v8  ;;  %1475 = vmatprep.subr.bf16.mxu1 %v6055_v13  ;;  %v6059_v24 = vld [vmem:[%s9136_s2 + $0x60] ss:$16 sps:$4 sm:$0xff]   ;;  %v6063_v25 = vld [vmem:[%s9136_s2 + $0x84] ss:$16 sps:$4 sm:$0xff]   ;;  %v6062_v28 = vld [vmem:[%s9136_s2 + $0x2c] ss:$16 sps:$4 sm:$0xff]  }
   0x8   :  { %1314 = vmatpush1.bf16.msra.mxu0 %v6046_v5  ;;  %v6060_v29 = vld [vmem:[%s9136_s2 + $0x28] ss:$16 sps:$4 sm:$0xff]   ;;  %v6065_v30 = vld [vmem:[%s9136_s2 + $0x80] ss:$16 sps:$4 sm:$0xff]   ;;  %v6069_v31 = vld [vmem:[%s9136_s2 + $0xa4] ss:$16 sps:$4 sm:$0xff]  }
   0x9   :  { %v53_v14 = vld [vmem:[%s9152_s24] sm:$0x7f]  ;;  %v7116_v15 = vsub.s32 %v276_v12, %v7098_v6  ;;  %1315 = vmatprep.subr.bf16.mxu0 %v6050_v11  ;;  %v6068_v32 = vld [vmem:[%s9136_s2 + $0x4c] ss:$16 sps:$4 sm:$0xff]   ;;  %v6066_v33 = vld [vmem:[%s9136_s2 + $0x48] ss:$16 sps:$4 sm:$0xff]  }
   0xa   :  { %v273_v17 = vcombine.high %v53_v14, %v53_v14  ;;  %v6071_v34 = vld [vmem:[%s9136_s2 + $0xa0] ss:$16 sps:$4 sm:$0xff]   ;;  %v6075_v35 = vld [vmem:[%s9136_s2 + $0xc4] ss:$16 sps:$4 sm:$0xff]   ;;  %v6074_v36 = vld [vmem:[%s9136_s2 + $0x6c] ss:$16 sps:$4 sm:$0xff]  }
   0xb   :  { %v7125_v19 = vrot.slane %v53_v14, %v7116_v15  ;;  %v6072_v37 = vld [vmem:[%s9136_s2 + $0x68] ss:$16 sps:$4 sm:$0xff]   ;;  %v6077_v38 = vld [vmem:[%s9136_s2 + $0xc0] ss:$16 sps:$4 sm:$0xff]   ;;  %v6081_v39 = vld [vmem:[%s9136_s2 + $0xe4] ss:$16 sps:$4 sm:$0xff]  }
   0xc   :  { %v7128_v20 = vrot.slane %v273_v17, %v7116_v15  ;;  %1316 = vmatpush1.bf16.msra.mxu0 %v6052_v16  ;;  %v6080_v40 = vld [vmem:[%s9136_s2 + $0x8c] ss:$16 sps:$4 sm:$0xff]   ;;  %v6078_v41 = vld [vmem:[%s9136_s2 + $0x88] ss:$16 sps:$4 sm:$0xff]   ;;  %v6083_v42 = vld [vmem:[%s9136_s2 + $0xe0] ss:$16 sps:$4 sm:$0xff]  }
   0xd   :  { %v288_v22 = vcombine.high %v7125_v19, %v7125_v19  ;;  %1317 = vmatprep.subr.bf16.mxu0 %v6057_v18  ;;  %v6087_v43 = vld [vmem:[%s9136_s2 + $0x104] ss:$16 sps:$4 sm:$0xff]   ;;  %v6086_v44 = vld [vmem:[%s9136_s2 + $0xac] ss:$16 sps:$4 sm:$0xff]   ;;  %v6084_v45 = vld [vmem:[%s9136_s2 + $0xa8] ss:$16 sps:$4 sm:$0xff]   ;;  %v7308_v17 = vrot.slane %v7125_v19, %v7116_v15 }
   0xe   :  { %v7137_v23 = vrot.slane %v7128_v20, %v7116_v15  ;;  %v6089_v46 = vld [vmem:[%s9136_s2 + $0x100] ss:$16 sps:$4 sm:$0xff]   ;;  %v6093_v47 = vld [vmem:[%s9136_s2 + $0x124] ss:$16 sps:$4 sm:$0xff]   ;;  %v6092_v48 = vld [vmem:[%s9136_s2 + $0xcc] ss:$16 sps:$4 sm:$0xff]  }
   0xf   :  { %v7146_v26 = vrot.slane %v288_v22, %v7116_v15  ;;  %v6090_v49 = vld [vmem:[%s9136_s2 + $0xc8] ss:$16 sps:$4 sm:$0xff]   ;;  %v6095_v50 = vld [vmem:[%s9136_s2 + $0x120] ss:$16 sps:$4 sm:$0xff]   ;;  %v6099_v51 = vld [vmem:[%s9136_s2 + $0x144] ss:$16 sps:$4 sm:$0xff]  }
  0x10   :  { %v7150_v27 = vcombine.high %v7137_v23, %v7137_v23  ;;  %1318 = vmatpush1.bf16.msra.mxu0 %v6059_v24  ;;  %v6098_v52 = vld [vmem:[%s9136_s2 + $0xec] ss:$16 sps:$4 sm:$0xff]   ;;  %v6096_v53 = vld [vmem:[%s9136_s2 + $0xe8] ss:$16 sps:$4 sm:$0xff]   ;;  %v6101_v54 = vld [vmem:[%s9136_s2 + $0x140] ss:$16 sps:$4 sm:$0xff]  }
  0x11   :  { %1343 = vmatprep.mubr.bf16.mxu0 %v7146_v26  ;;  %1319 = vmatprep.subr.bf16.mxu0 %v6063_v25  ;;  %v6105_v55 = vld [vmem:[%s9136_s2 + $0x164] ss:$16 sps:$4 sm:$0xff]   ;;  %v6104_v56 = vld [vmem:[%s9136_s2 + $0x10c] ss:$16 sps:$4 sm:$0xff]   ;;  %v6102_v57 = vld [vmem:[%s9136_s2 + $0x108] ss:$16 sps:$4 sm:$0xff]  }
  0x12   :  { %5495 = vmatmul.mubr.msk.bf16.vlgmr.msra.gmra.mrb[0].mxu1 %vm1307_vm0, %v7150_v27  ;;  %v6107_v58 = vld [vmem:[%s9136_s2 + $0x160] ss:$16 sps:$4 sm:$0xff]   ;;  %v6111_v59 = vld [vmem:[%s9136_s2 + $0x184] ss:$16 sps:$4 sm:$0xff]   ;;  %v6110_v60 = vld [vmem:[%s9136_s2 + $0x12c] ss:$16 sps:$4 sm:$0xff]  }
  0x13   :  { %1476 = vmatpush1.bf16.msra.mxu1 %v6053_v21  ;;  %1507 = vmatprep.mubr.bf16.mxu1 %v7146_v26  ;;  %v6108_v61 = vld [vmem:[%s9136_s2 + $0x128] ss:$16 sps:$4 sm:$0xff]   ;;  %v6113_v62 = vld [vmem:[%s9136_s2 + $0x180] ss:$16 sps:$4 sm:$0xff]   ;;  %v6117_v63 = vld [vmem:[%s9136_s2 + $0x1a4] ss:$16 sps:$4 sm:$0xff]   ;;  %v320_v21 = vcombine.high %v7146_v26, %v7146_v26 }
  0x14   :  { %1477 = vmatprep.subr.bf16.mxu1 %v6062_v28  ;;  %1320 = vmatpush1.bf16.msra.mxu0 %v6065_v30  ;;  %v6116_v0 = vld [vmem:[%s9136_s2 + $0x14c] ss:$16 sps:$4 sm:$0xff]   ;;  %v6114_v1 = vld [vmem:[%s9136_s2 + $0x148] ss:$16 sps:$4 sm:$0xff]   ;;  %v6119_v2 = vld [vmem:[%s9136_s2 + $0x1a0] ss:$16 sps:$4 sm:$0xff]  }
  0x15   :  { %1321 = vmatprep.subr.bf16.mxu0 %v6069_v31  ;;  %v6123_v4 = vld [vmem:[%s9136_s2 + $0x1c4] ss:$16 sps:$4 sm:$0xff]   ;;  %v6122_v5 = vld [vmem:[%s9136_s2 + $0x16c] ss:$16 sps:$4 sm:$0xff]   ;;  %v6120_v7 = vld [vmem:[%s9136_s2 + $0x168] ss:$16 sps:$4 sm:$0xff]  }
  0x16   :  { %v6125_v8 = vld [vmem:[%s9136_s2 + $0x1c0] ss:$16 sps:$4 sm:$0xff]   ;;  %v6129_v9 = vld [vmem:[%s9136_s2 + $0x1e4] ss:$16 sps:$4 sm:$0xff]   ;;  %v6128_v10 = vld [vmem:[%s9136_s2 + $0x18c] ss:$16 sps:$4 sm:$0xff]  }
  0x17   :  { %1478 = vmatpush1.bf16.msra.mxu1 %v6060_v29  ;;  %v6126_v11 = vld [vmem:[%s9136_s2 + $0x188] ss:$16 sps:$4 sm:$0xff]   ;;  %v6131_v12 = vld [vmem:[%s9136_s2 + $0x1e0] ss:$16 sps:$4 sm:$0xff]   ;;  %v6137_v13 = vld [vmem:[%s9136_s2 + $0x204] ss:$16 sps:$4 sm:$0xff]  }
  0x18   :  { %1479 = vmatprep.subr.bf16.mxu1 %v6068_v32  ;;  %1322 = vmatpush1.bf16.msra.mxu0 %v6071_v34  ;;  %v6134_v14 = vld [vmem:[%s9136_s2 + $0x1ac] ss:$16 sps:$4 sm:$0xff]   ;;  %v6132_v16 = vld [vmem:[%s9136_s2 + $0x1a8] ss:$16 sps:$4 sm:$0xff]   ;;  %v6135_v18 = vld [vmem:[%s9136_s2 + $0x200] ss:$16 sps:$4 sm:$0xff]  }
  0x19   :  { %1323 = vmatprep.subr.bf16.mxu0 %v6075_v35  ;;  %v6143_v22 = vld [vmem:[%s9136_s2 + $0x224] ss:$16 sps:$4 sm:$0xff]   ;;  %v6140_v19 = vld [vmem:[%s9136_s2 + $0x1cc] ss:$16 sps:$4 sm:$0xff]   ;;  %v6138_v24 = vld [vmem:[%s9136_s2 + $0x1c8] ss:$16 sps:$4 sm:$0xff]  }
  0x1a   :  { %v6141_v25 = vld [vmem:[%s9136_s2 + $0x220] ss:$16 sps:$4 sm:$0xff]   ;;  %v6149_v26 = vld [vmem:[%s9136_s2 + $0x244] ss:$16 sps:$4 sm:$0xff]   ;;  %v6146_v28 = vld [vmem:[%s9136_s2 + $0x1ec] ss:$16 sps:$4 sm:$0xff]  }
  0x1b   :  { %1480 = vmatpush1.bf16.msra.mxu1 %v6066_v33  ;;  %v6144_v29 = vld [vmem:[%s9136_s2 + $0x1e8] ss:$16 sps:$4 sm:$0xff]   ;;  %v6147_v30 = vld [vmem:[%s9136_s2 + $0x240] ss:$16 sps:$4 sm:$0xff]   ;;  %v6155_v31 = vld [vmem:[%s9136_s2 + $0x264] ss:$16 sps:$4 sm:$0xff]  }
  0x1c   :  { %1481 = vmatprep.subr.bf16.mxu1 %v6074_v36  ;;  %1324 = vmatpush1.bf16.msra.mxu0 %v6077_v38  ;;  %v6152_v32 = vld [vmem:[%s9136_s2 + $0x20c] ss:$16 sps:$4 sm:$0xff]   ;;  %v6150_v33 = vld [vmem:[%s9136_s2 + $0x208] ss:$16 sps:$4 sm:$0xff]   ;;  %v6153_v34 = vld [vmem:[%s9136_s2 + $0x260] ss:$16 sps:$4 sm:$0xff]  }
  0x1d   :  { %1325 = vmatprep.subr.bf16.mxu0 %v6081_v39  ;;  %v6161_v35 = vld [vmem:[%s9136_s2 + $0x284] ss:$16 sps:$4 sm:$0xff]   ;;  %v6158_v36 = vld [vmem:[%s9136_s2 + $0x22c] ss:$16 sps:$4 sm:$0xff]   ;;  %v6159_v38 = vld [vmem:[%s9136_s2 + $0x280] ss:$16 sps:$4 sm:$0xff]  }
  0x1e   :  { %v6167_v39 = vld [vmem:[%s9136_s2 + $0x2a4] ss:$16 sps:$4 sm:$0xff]  }
  0x1f   :  { %1482 = vmatpush1.bf16.msra.mxu1 %v6072_v37  ;;  %v6156_v37 = vld [vmem:[%s9136_s2 + $0x228] ss:$16 sps:$4 sm:$0xff]  }
  0x20   :  { %1483 = vmatprep.subr.bf16.mxu1 %v6080_v40  ;;  %1326 = vmatpush1.bf16.msra.mxu0 %v6083_v42  ;;  %v6164_v40 = vld [vmem:[%s9136_s2 + $0x24c] ss:$16 sps:$4 sm:$0xff]   ;;  %v6165_v42 = vld [vmem:[%s9136_s2 + $0x2a0] ss:$16 sps:$4 sm:$0xff]  }
  0x21   :  { %1327 = vmatprep.subr.bf16.mxu0 %v6087_v43  ;;  %v6173_v43 = vld [vmem:[%s9136_s2 + $0x2c4] ss:$16 sps:$4 sm:$0xff]  }
  0x23   :  { %1484 = vmatpush1.bf16.msra.mxu1 %v6078_v41  ;;  %v6162_v41 = vld [vmem:[%s9136_s2 + $0x248] ss:$16 sps:$4 sm:$0xff]  }
  0x24   :  { %1485 = vmatprep.subr.bf16.mxu1 %v6086_v44  ;;  %1328 = vmatpush1.bf16.msra.mxu0 %v6089_v46  ;;  %v6170_v44 = vld [vmem:[%s9136_s2 + $0x26c] ss:$16 sps:$4 sm:$0xff]   ;;  %v6171_v46 = vld [vmem:[%s9136_s2 + $0x2c0] ss:$16 sps:$4 sm:$0xff]  }
  0x25   :  { %1329 = vmatprep.subr.bf16.mxu0 %v6093_v47  ;;  %v6179_v47 = vld [vmem:[%s9136_s2 + $0x2e4] ss:$16 sps:$4 sm:$0xff]  }
  0x27   :  { %1486 = vmatpush1.bf16.msra.mxu1 %v6084_v45  ;;  %v6168_v45 = vld [vmem:[%s9136_s2 + $0x268] ss:$16 sps:$4 sm:$0xff]  }
  0x28   :  { %1487 = vmatprep.subr.bf16.mxu1 %v6092_v48  ;;  %1330 = vmatpush1.bf16.msra.mxu0 %v6095_v50  ;;  %v6176_v48 = vld [vmem:[%s9136_s2 + $0x28c] ss:$16 sps:$4 sm:$0xff]   ;;  %v6177_v50 = vld [vmem:[%s9136_s2 + $0x2e0] ss:$16 sps:$4 sm:$0xff]  }
  0x29   :  { %1331 = vmatprep.subr.bf16.mxu0 %v6099_v51  ;;  %v6185_v51 = vld [vmem:[%s9136_s2 + $0x304] ss:$16 sps:$4 sm:$0xff]  }
  0x2b   :  { %1488 = vmatpush1.bf16.msra.mxu1 %v6090_v49  ;;  %v6174_v49 = vld [vmem:[%s9136_s2 + $0x288] ss:$16 sps:$4 sm:$0xff]  }
  0x2c   :  { %1489 = vmatprep.subr.bf16.mxu1 %v6098_v52  ;;  %1332 = vmatpush1.bf16.msra.mxu0 %v6101_v54  ;;  %v6182_v52 = vld [vmem:[%s9136_s2 + $0x2ac] ss:$16 sps:$4 sm:$0xff]   ;;  %v6183_v54 = vld [vmem:[%s9136_s2 + $0x300] ss:$16 sps:$4 sm:$0xff]  }
  0x2d   :  { %1333 = vmatprep.subr.bf16.mxu0 %v6105_v55  ;;  %v6191_v55 = vld [vmem:[%s9136_s2 + $0x324] ss:$16 sps:$4 sm:$0xff]  }
  0x2f   :  { %1490 = vmatpush1.bf16.msra.mxu1 %v6096_v53  ;;  %v6180_v53 = vld [vmem:[%s9136_s2 + $0x2a8] ss:$16 sps:$4 sm:$0xff]  }
  0x30   :  { %1491 = vmatprep.subr.bf16.mxu1 %v6104_v56  ;;  %1334 = vmatpush1.bf16.msra.mxu0 %v6107_v58  ;;  %v6188_v56 = vld [vmem:[%s9136_s2 + $0x2cc] ss:$16 sps:$4 sm:$0xff]   ;;  %v6189_v58 = vld [vmem:[%s9136_s2 + $0x320] ss:$16 sps:$4 sm:$0xff]  }
  0x31   :  { %1335 = vmatprep.subr.bf16.mxu0 %v6111_v59  ;;  %v6197_v59 = vld [vmem:[%s9136_s2 + $0x344] ss:$16 sps:$4 sm:$0xff]  }
  0x33   :  { %1492 = vmatpush1.bf16.msra.mxu1 %v6102_v57  ;;  %v6186_v57 = vld [vmem:[%s9136_s2 + $0x2c8] ss:$16 sps:$4 sm:$0xff]  }
  0x34   :  { %1493 = vmatprep.subr.bf16.mxu1 %v6110_v60  ;;  %1336 = vmatpush1.bf16.msra.mxu0 %v6113_v62  ;;  %v6194_v60 = vld [vmem:[%s9136_s2 + $0x2ec] ss:$16 sps:$4 sm:$0xff]   ;;  %v6195_v62 = vld [vmem:[%s9136_s2 + $0x340] ss:$16 sps:$4 sm:$0xff]  }
  0x35   :  { %1337 = vmatprep.subr.bf16.mxu0 %v6117_v63  ;;  %v6203_v63 = vld [vmem:[%s9136_s2 + $0x364] ss:$16 sps:$4 sm:$0xff]  }
  0x37   :  { %1494 = vmatpush1.bf16.msra.mxu1 %v6108_v61  ;;  %v6192_v61 = vld [vmem:[%s9136_s2 + $0x2e8] ss:$16 sps:$4 sm:$0xff]  }
  0x38   :  { %1495 = vmatprep.subr.bf16.mxu1 %v6116_v0  ;;  %1338 = vmatpush1.bf16.msra.mxu0 %v6119_v2  ;;  %v6200_v0 = vld [vmem:[%s9136_s2 + $0x30c] ss:$16 sps:$4 sm:$0xff]   ;;  %v6201_v2 = vld [vmem:[%s9136_s2 + $0x360] ss:$16 sps:$4 sm:$0xff]  }
  0x39   :  { %1339 = vmatprep.subr.bf16.mxu0 %v6123_v4  ;;  %v6209_v4 = vld [vmem:[%s9136_s2 + $0x384] ss:$16 sps:$4 sm:$0xff]  }
  0x3b   :  { %1496 = vmatpush1.bf16.msra.mxu1 %v6114_v1  ;;  %v6198_v1 = vld [vmem:[%s9136_s2 + $0x308] ss:$16 sps:$4 sm:$0xff]  }
  0x3c   :  { %1497 = vmatprep.subr.bf16.mxu1 %v6122_v5  ;;  %1340 = vmatpush1.bf16.msra.mxu0 %v6125_v8  ;;  %v6206_v5 = vld [vmem:[%s9136_s2 + $0x32c] ss:$16 sps:$4 sm:$0xff]   ;;  %v6207_v8 = vld [vmem:[%s9136_s2 + $0x380] ss:$16 sps:$4 sm:$0xff]  }
  0x3d   :  { %1341 = vmatprep.subr.bf16.mxu0 %v6129_v9  ;;  %v6215_v9 = vld [vmem:[%s9136_s2 + $0x3a4] ss:$16 sps:$4 sm:$0xff]  }
  0x3f   :  { %1498 = vmatpush1.bf16.msra.mxu1 %v6120_v7  ;;  %v6204_v7 = vld [vmem:[%s9136_s2 + $0x328] ss:$16 sps:$4 sm:$0xff]  }
  0x40   :  { %1499 = vmatprep.subr.bf16.mxu1 %v6128_v10  ;;  %1342 = vmatpush1.bf16.msra.mxu0 %v6131_v12  ;;  %v6212_v10 = vld [vmem:[%s9136_s2 + $0x34c] ss:$16 sps:$4 sm:$0xff]   ;;  %v6213_v12 = vld [vmem:[%s9136_s2 + $0x3a0] ss:$16 sps:$4 sm:$0xff]  }
  0x41   :  { %1352 = vmatprep.subr.bf16.mxu0 %v6137_v13  ;;  %v6221_v13 = vld [vmem:[%s9136_s2 + $0x3c4] ss:$16 sps:$4 sm:$0xff]  }
  0x43   :  { %1500 = vmatpush1.bf16.msra.mxu1 %v6126_v11  ;;  %1344 = vmatmul.mubr.bf16.vlgmr.msra.gmra.mrb[0].mxu0 %v7308_v17  ;;  %v6210_v11 = vld [vmem:[%s9136_s2 + $0x348] ss:$16 sps:$4 sm:$0xff]  }
  0x44   :  { %1501 = vmatprep.subr.bf16.mxu1 %v6134_v14  ;;  %1353 = vmatpush1.bf16.msra.mxu0 %v6135_v18  ;;  %v6218_v14 = vld [vmem:[%s9136_s2 + $0x36c] ss:$16 sps:$4 sm:$0xff]   ;;  %v6219_v18 = vld [vmem:[%s9136_s2 + $0x3c0] ss:$16 sps:$4 sm:$0xff]  }
  0x45   :  { %1384 = vmatprep.mubr.bf16.mxu0 %v320_v21  ;;  %1354 = vmatprep.subr.bf16.mxu0 %v6143_v22  ;;  %v6224_v22 = vld [vmem:[%s9136_s2 + $0x38c] ss:$16 sps:$4 sm:$0xff]  }
  0x47   :  { %1502 = vmatpush1.bf16.msra.mxu1 %v6132_v16  ;;  %v6216_v16 = vld [vmem:[%s9136_s2 + $0x368] ss:$16 sps:$4 sm:$0xff]  }
  0x48   :  { %1503 = vmatprep.subr.bf16.mxu1 %v6140_v19  ;;  %1355 = vmatpush1.bf16.msra.mxu0 %v6141_v25  ;;  %v6222_v19 = vld [vmem:[%s9136_s2 + $0x388] ss:$16 sps:$4 sm:$0xff]   ;;  %v289_v25 = vcombine.high %v7128_v20, %v7128_v20  ;;  %v6231_v20 = vld [vmem:[%s9136_s2 + $0x400] ss:$16 sps:$4 sm:$0xff]  }
  0x49   :  { %1356 = vmatprep.subr.bf16.mxu0 %v6149_v26  ;;  %v6233_v26 = vld [vmem:[%s9136_s2 + $0x404] ss:$16 sps:$4 sm:$0xff]  }
  0x4b   :  { %1504 = vmatpush1.bf16.msra.mxu1 %v6138_v24  ;;  %v6225_v24 = vld [vmem:[%s9136_s2 + $0x3e0] ss:$16 sps:$4 sm:$0xff]  }
  0x4c   :  { %1505 = vmatprep.subr.bf16.mxu1 %v6146_v28  ;;  %1357 = vmatpush1.bf16.msra.mxu0 %v6147_v30  ;;  %v6230_v28 = vld [vmem:[%s9136_s2 + $0x3ac] ss:$16 sps:$4 sm:$0xff]   ;;  %v318_v30 = vcombine.high %v7308_v17, %v7308_v17 }
  0x4d   :  { %1358 = vmatprep.subr.bf16.mxu0 %v6155_v31  ;;  %v317_v31 = vrot.slane %v289_v25, %v7116_v15  ;;  %v6317_v25 = vld [vmem:[%s9136_s2 + $0x5c4] ss:$16 sps:$4 sm:$0xff]  }
  0x4f   :  { %1506 = vmatpush1.bf16.msra.mxu1 %v6144_v29  ;;  %v6228_v29 = vld [vmem:[%s9136_s2 + $0x3a8] ss:$16 sps:$4 sm:$0xff]  }
  0x50   :  { %1516 = vmatprep.subr.bf16.mxu1 %v6152_v32  ;;  %1359 = vmatpush1.bf16.msra.mxu0 %v6153_v34  ;;  %v6239_v32 = vld [vmem:[%s9136_s2 + $0x424] ss:$16 sps:$4 sm:$0xff]   ;;  %v6237_v34 = vld [vmem:[%s9136_s2 + $0x420] ss:$16 sps:$4 sm:$0xff]  }
  0x51   :  { %1360 = vmatprep.subr.bf16.mxu0 %v6161_v35  ;;  %v6245_v35 = vld [vmem:[%s9136_s2 + $0x444] ss:$16 sps:$4 sm:$0xff]  }
  0x52   :  { %1508 = vmatmul.mubr.bf16.vlgmr.msra.gmra.mrb[4].mxu1 %v7308_v17  ;;  %v6234_v17 = vld [vmem:[%s9136_s2 + $0x3c8] ss:$16 sps:$4 sm:$0xff]  }
  0x53   :  { %1517 = vmatpush1.bf16.msra.mxu1 %v6150_v33  ;;  %1548 = vmatprep.mubr.bf16.mxu1 %v320_v21  ;;  %v6227_v21 = vld [vmem:[%s9136_s2 + $0x3e4] ss:$16 sps:$4 sm:$0xff]   ;;  %v6236_v33 = vld [vmem:[%s9136_s2 + $0x3cc] ss:$16 sps:$4 sm:$0xff]  }
  0x54   :  { %1518 = vmatprep.subr.bf16.mxu1 %v6158_v36  ;;  %1361 = vmatpush1.bf16.msra.mxu0 %v6159_v38  ;;  %v6242_v36 = vld [vmem:[%s9136_s2 + $0x3ec] ss:$16 sps:$4 sm:$0xff]   ;;  %v6243_v38 = vld [vmem:[%s9136_s2 + $0x440] ss:$16 sps:$4 sm:$0xff]  }
  0x55   :  { %1362 = vmatprep.subr.bf16.mxu0 %v6167_v39  ;;  %v6251_v39 = vld [vmem:[%s9136_s2 + $0x464] ss:$16 sps:$4 sm:$0xff]  }
  0x57   :  { %1519 = vmatpush1.bf16.msra.mxu1 %v6156_v37  ;;  %v6240_v37 = vld [vmem:[%s9136_s2 + $0x3e8] ss:$16 sps:$4 sm:$0xff]  }
  0x58   :  { %1520 = vmatprep.subr.bf16.mxu1 %v6164_v40  ;;  %1363 = vmatpush1.bf16.msra.mxu0 %v6165_v42  ;;  %v6248_v40 = vld [vmem:[%s9136_s2 + $0x40c] ss:$16 sps:$4 sm:$0xff]   ;;  %v6249_v42 = vld [vmem:[%s9136_s2 + $0x460] ss:$16 sps:$4 sm:$0xff]  }
  0x59   :  { %1364 = vmatprep.subr.bf16.mxu0 %v6173_v43  ;;  %v6257_v43 = vld [vmem:[%s9136_s2 + $0x484] ss:$16 sps:$4 sm:$0xff]  }
  0x5b   :  { %1521 = vmatpush1.bf16.msra.mxu1 %v6162_v41  ;;  %v6246_v41 = vld [vmem:[%s9136_s2 + $0x408] ss:$16 sps:$4 sm:$0xff]  }
  0x5c   :  { %1522 = vmatprep.subr.bf16.mxu1 %v6170_v44  ;;  %1365 = vmatpush1.bf16.msra.mxu0 %v6171_v46  ;;  %v6254_v44 = vld [vmem:[%s9136_s2 + $0x42c] ss:$16 sps:$4 sm:$0xff]   ;;  %v6255_v46 = vld [vmem:[%s9136_s2 + $0x480] ss:$16 sps:$4 sm:$0xff]  }
  0x5d   :  { %1366 = vmatprep.subr.bf16.mxu0 %v6179_v47  ;;  %v6263_v47 = vld [vmem:[%s9136_s2 + $0x4a4] ss:$16 sps:$4 sm:$0xff]  }
  0x5f   :  { %1523 = vmatpush1.bf16.msra.mxu1 %v6168_v45  ;;  %v6252_v45 = vld [vmem:[%s9136_s2 + $0x428] ss:$16 sps:$4 sm:$0xff]  }
  0x60   :  { %1524 = vmatprep.subr.bf16.mxu1 %v6176_v48  ;;  %1367 = vmatpush1.bf16.msra.mxu0 %v6177_v50  ;;  %v6260_v48 = vld [vmem:[%s9136_s2 + $0x44c] ss:$16 sps:$4 sm:$0xff]   ;;  %v6261_v50 = vld [vmem:[%s9136_s2 + $0x4a0] ss:$16 sps:$4 sm:$0xff]  }
  0x61   :  { %1368 = vmatprep.subr.bf16.mxu0 %v6185_v51  ;;  %v6269_v51 = vld [vmem:[%s9136_s2 + $0x4c4] ss:$16 sps:$4 sm:$0xff]  }
  0x63   :  { %1525 = vmatpush1.bf16.msra.mxu1 %v6174_v49  ;;  %v6258_v49 = vld [vmem:[%s9136_s2 + $0x448] ss:$16 sps:$4 sm:$0xff]  }
  0x64   :  { %1526 = vmatprep.subr.bf16.mxu1 %v6182_v52  ;;  %1369 = vmatpush1.bf16.msra.mxu0 %v6183_v54  ;;  %v6266_v52 = vld [vmem:[%s9136_s2 + $0x46c] ss:$16 sps:$4 sm:$0xff]   ;;  %v6267_v54 = vld [vmem:[%s9136_s2 + $0x4c0] ss:$16 sps:$4 sm:$0xff]  }
  0x65   :  { %1370 = vmatprep.subr.bf16.mxu0 %v6191_v55  ;;  %v6275_v55 = vld [vmem:[%s9136_s2 + $0x4e4] ss:$16 sps:$4 sm:$0xff]  }
  0x67   :  { %1527 = vmatpush1.bf16.msra.mxu1 %v6180_v53  ;;  %v6264_v53 = vld [vmem:[%s9136_s2 + $0x468] ss:$16 sps:$4 sm:$0xff]  }
  0x68   :  { %1528 = vmatprep.subr.bf16.mxu1 %v6188_v56  ;;  %1371 = vmatpush1.bf16.msra.mxu0 %v6189_v58  ;;  %v6272_v56 = vld [vmem:[%s9136_s2 + $0x48c] ss:$16 sps:$4 sm:$0xff]   ;;  %v6273_v58 = vld [vmem:[%s9136_s2 + $0x4e0] ss:$16 sps:$4 sm:$0xff]  }
  0x69   :  { %1372 = vmatprep.subr.bf16.mxu0 %v6197_v59  ;;  %v6281_v59 = vld [vmem:[%s9136_s2 + $0x504] ss:$16 sps:$4 sm:$0xff]  }
  0x6b   :  { %1529 = vmatpush1.bf16.msra.mxu1 %v6186_v57  ;;  %v6270_v57 = vld [vmem:[%s9136_s2 + $0x488] ss:$16 sps:$4 sm:$0xff]  }
  0x6c   :  { %1530 = vmatprep.subr.bf16.mxu1 %v6194_v60  ;;  %1373 = vmatpush1.bf16.msra.mxu0 %v6195_v62  ;;  %v6278_v60 = vld [vmem:[%s9136_s2 + $0x4ac] ss:$16 sps:$4 sm:$0xff]   ;;  %v6279_v62 = vld [vmem:[%s9136_s2 + $0x500] ss:$16 sps:$4 sm:$0xff]  }
  0x6d   :  { %1374 = vmatprep.subr.bf16.mxu0 %v6203_v63  ;;  %v6287_v63 = vld [vmem:[%s9136_s2 + $0x524] ss:$16 sps:$4 sm:$0xff]  }
  0x6f   :  { %1531 = vmatpush1.bf16.msra.mxu1 %v6192_v61  ;;  %v6276_v61 = vld [vmem:[%s9136_s2 + $0x4a8] ss:$16 sps:$4 sm:$0xff]  }
  0x70   :  { %1532 = vmatprep.subr.bf16.mxu1 %v6200_v0  ;;  %1375 = vmatpush1.bf16.msra.mxu0 %v6201_v2  ;;  %v6284_v0 = vld [vmem:[%s9136_s2 + $0x4cc] ss:$16 sps:$4 sm:$0xff]   ;;  %v6285_v2 = vld [vmem:[%s9136_s2 + $0x520] ss:$16 sps:$4 sm:$0xff]  }
  0x71   :  { %1376 = vmatprep.subr.bf16.mxu0 %v6209_v4  ;;  %v6293_v4 = vld [vmem:[%s9136_s2 + $0x544] ss:$16 sps:$4 sm:$0xff]  }
  0x73   :  { %1533 = vmatpush1.bf16.msra.mxu1 %v6198_v1  ;;  %v6282_v1 = vld [vmem:[%s9136_s2 + $0x4c8] ss:$16 sps:$4 sm:$0xff]  }
  0x74   :  { %1534 = vmatprep.subr.bf16.mxu1 %v6206_v5  ;;  %1377 = vmatpush1.bf16.msra.mxu0 %v6207_v8  ;;  %v6290_v5 = vld [vmem:[%s9136_s2 + $0x4ec] ss:$16 sps:$4 sm:$0xff]   ;;  %v6291_v8 = vld [vmem:[%s9136_s2 + $0x540] ss:$16 sps:$4 sm:$0xff]  }
  0x75   :  { %1378 = vmatprep.subr.bf16.mxu0 %v6215_v9  ;;  %v6296_v9 = vld [vmem:[%s9136_s2 + $0x50c] ss:$16 sps:$4 sm:$0xff]  }
  0x77   :  { %1535 = vmatpush1.bf16.msra.mxu1 %v6204_v7  ;;  %v6288_v7 = vld [vmem:[%s9136_s2 + $0x4e8] ss:$16 sps:$4 sm:$0xff]  }
  0x78   :  { %1536 = vmatprep.subr.bf16.mxu1 %v6212_v10  ;;  %1379 = vmatpush1.bf16.msra.mxu0 %v6213_v12  ;;  %v6299_v10 = vld [vmem:[%s9136_s2 + $0x564] ss:$16 sps:$4 sm:$0xff]   ;;  %v6294_v12 = vld [vmem:[%s9136_s2 + $0x508] ss:$16 sps:$4 sm:$0xff]  }
  0x79   :  { %1380 = vmatprep.subr.bf16.mxu0 %v6221_v13  ;;  %v6305_v13 = vld [vmem:[%s9136_s2 + $0x584] ss:$16 sps:$4 sm:$0xff]  }
  0x7b   :  { %1537 = vmatpush1.bf16.msra.mxu1 %v6210_v11  ;;  %v6297_v11 = vld [vmem:[%s9136_s2 + $0x560] ss:$16 sps:$4 sm:$0xff]  }
  0x7c   :  { %1538 = vmatprep.subr.bf16.mxu1 %v6218_v14  ;;  %1381 = vmatpush1.bf16.msra.mxu0 %v6219_v18  ;;  %v6302_v14 = vld [vmem:[%s9136_s2 + $0x52c] ss:$16 sps:$4 sm:$0xff]   ;;  %v6300_v18 = vld [vmem:[%s9136_s2 + $0x528] ss:$16 sps:$4 sm:$0xff]  }
  0x7d   :  { %1382 = vmatprep.subr.bf16.mxu0 %v6227_v21  ;;  %v6311_v21 = vld [vmem:[%s9136_s2 + $0x5a4] ss:$16 sps:$4 sm:$0xff]  }
  0x7f   :  { %1539 = vmatpush1.bf16.msra.mxu1 %v6216_v16  ;;  %v6303_v16 = vld [vmem:[%s9136_s2 + $0x580] ss:$16 sps:$4 sm:$0xff]  }
  0x80   :  { %1540 = vmatprep.subr.bf16.mxu1 %v6224_v22  ;;  %1383 = vmatpush1.bf16.msra.mxu0 %v6225_v24  ;;  %v6308_v22 = vld [vmem:[%s9136_s2 + $0x54c] ss:$16 sps:$4 sm:$0xff]   ;;  %v6306_v24 = vld [vmem:[%s9136_s2 + $0x548] ss:$16 sps:$4 sm:$0xff]  }
  0x81   :  { %1393 = vmatprep.subr.bf16.mxu0 %v6233_v26  ;;  %v6314_v26 = vld [vmem:[%s9136_s2 + $0x56c] ss:$16 sps:$4 sm:$0xff]  }
  0x83   :  { %1541 = vmatpush1.bf16.msra.mxu1 %v6222_v19  ;;  %1385 = vmatmul.mubr.bf16.vlgmr.msra.gmra.mrb[0].mxu0 %v318_v30  ;;  %v6309_v19 = vld [vmem:[%s9136_s2 + $0x5a0] ss:$16 sps:$4 sm:$0xff]  }
  0x84   :  { %1542 = vmatprep.subr.bf16.mxu1 %v6230_v28  ;;  %1394 = vmatpush1.bf16.msra.mxu0 %v6231_v20  ;;  %v6315_v28 = vld [vmem:[%s9136_s2 + $0x5c0] ss:$16 sps:$4 sm:$0xff]   ;;  %v6320_v20 = vld [vmem:[%s9136_s2 + $0x58c] ss:$16 sps:$4 sm:$0xff]  }
  0x85   :  { %1425 = vmatprep.mubr.bf16.mxu0 %v317_v31  ;;  %1395 = vmatprep.subr.bf16.mxu0 %v6239_v32  ;;  %v6318_v32 = vld [vmem:[%s9136_s2 + $0x588] ss:$16 sps:$4 sm:$0xff]  }
  0x87   :  { %1543 = vmatpush1.bf16.msra.mxu1 %v6228_v29  ;;  %v6312_v29 = vld [vmem:[%s9136_s2 + $0x568] ss:$16 sps:$4 sm:$0xff]  }
  0x88   :  { %1544 = vmatprep.subr.bf16.mxu1 %v6236_v33  ;;  %1396 = vmatpush1.bf16.msra.mxu0 %v6237_v34  ;;  %v6338_v33 = vld [vmem:[%s9138_s4 + $0x4] ss:$16 sps:$4 sm:$0xff]   ;;  %v6336_v34 = vld [vmem:[%s9138_s4] ss:$16 sps:$4 sm:$0xff]  }
  0x89   :  { %1397 = vmatprep.subr.bf16.mxu0 %v6245_v35  ;;  %v6324_v35 = vld [vmem:[%s9136_s2 + $0x5a8] ss:$16 sps:$4 sm:$0xff]  }
  0x8b   :  { %1545 = vmatpush1.bf16.msra.mxu1 %v6234_v17  ;;  %v6326_v17 = vld [vmem:[%s9136_s2 + $0x5ac] ss:$16 sps:$4 sm:$0xff]  }
  0x8c   :  { %1546 = vmatprep.subr.bf16.mxu1 %v6242_v36  ;;  %1398 = vmatpush1.bf16.msra.mxu0 %v6243_v38  ;;  %v6344_v36 = vld [vmem:[%s9138_s4 + $0x24] ss:$16 sps:$4 sm:$0xff]   ;;  %v6342_v38 = vld [vmem:[%s9138_s4 + $0x20] ss:$16 sps:$4 sm:$0xff]  }
  0x8d   :  { %1399 = vmatprep.subr.bf16.mxu0 %v6251_v39  ;;  %v6327_v39 = vld [vmem:[%s9136_s2 + $0x5c8] ss:$16 sps:$4 sm:$0xff]  }
  0x8f   :  { %1547 = vmatpush1.bf16.msra.mxu1 %v6240_v37  ;;  %v6329_v37 = vld [vmem:[%s9136_s2 + $0x5cc] ss:$16 sps:$4 sm:$0xff]  }
  0x90   :  { %1557 = vmatprep.subr.bf16.mxu1 %v6248_v40  ;;  %1400 = vmatpush1.bf16.msra.mxu0 %v6249_v42  ;;  %v6350_v40 = vld [vmem:[%s9138_s4 + $0x44] ss:$16 sps:$4 sm:$0xff]   ;;  %v6348_v42 = vld [vmem:[%s9138_s4 + $0x40] ss:$16 sps:$4 sm:$0xff]  }
  0x91   :  { %1401 = vmatprep.subr.bf16.mxu0 %v6257_v43  ;;  %v6330_v43 = vld [vmem:[%s9136_s2 + $0x5e8] ss:$16 sps:$4 sm:$0xff]  }
  0x92   :  { %1549 = vmatmul.mubr.bf16.vlgmr.msra.gmra.mrb[4].mxu1 %v318_v30  ;;  %v6323_v30 = vld [vmem:[%s9136_s2 + $0x5e4] ss:$16 sps:$4 sm:$0xff]  }
  0x93   :  { %1558 = vmatpush1.bf16.msra.mxu1 %v6246_v41  ;;  %1589 = vmatprep.mubr.bf16.mxu1 %v317_v31  ;;  %v6321_v31 = vld [vmem:[%s9136_s2 + $0x5e0] ss:$16 sps:$4 sm:$0xff]   ;;  %v6332_v41 = vld [vmem:[%s9136_s2 + $0x5ec] ss:$16 sps:$4 sm:$0xff]  }
  0x94   :  { %1559 = vmatprep.subr.bf16.mxu1 %v6254_v44  ;;  %1402 = vmatpush1.bf16.msra.mxu0 %v6255_v46  ;;  %v6356_v44 = vld [vmem:[%s9138_s4 + $0x64] ss:$16 sps:$4 sm:$0xff]   ;;  %v6354_v46 = vld [vmem:[%s9138_s4 + $0x60] ss:$16 sps:$4 sm:$0xff]  }
  0x95   :  { %1403 = vmatprep.subr.bf16.mxu0 %v6263_v47  ;;  %v6333_v47 = vld [vmem:[%s9136_s2 + $0x608] ss:$16 sps:$4 sm:$0xff]  }
  0x97   :  { %1560 = vmatpush1.bf16.msra.mxu1 %v6252_v45  ;;  %v6335_v45 = vld [vmem:[%s9136_s2 + $0x60c] ss:$16 sps:$4 sm:$0xff]  }
  0x98   :  { %1561 = vmatprep.subr.bf16.mxu1 %v6260_v48  ;;  %1404 = vmatpush1.bf16.msra.mxu0 %v6261_v50  ;;  %v6341_v48 = vld [vmem:[%s9138_s4 + $0xc] ss:$16 sps:$4 sm:$0xff]   ;;  %v6360_v50 = vld [vmem:[%s9138_s4 + $0x80] ss:$16 sps:$4 sm:$0xff]  }
  0x99   :  { %1405 = vmatprep.subr.bf16.mxu0 %v6269_v51  ;;  %v6368_v51 = vld [vmem:[%s9138_s4 + $0xa4] ss:$16 sps:$4 sm:$0xff]  }
  0x9b   :  { %1562 = vmatpush1.bf16.msra.mxu1 %v6258_v49  ;;  %v6362_v49 = vld [vmem:[%s9138_s4 + $0x84] ss:$16 sps:$4 sm:$0xff]  }
  0x9c   :  { %1563 = vmatprep.subr.bf16.mxu1 %v6266_v52  ;;  %1406 = vmatpush1.bf16.msra.mxu0 %v6267_v54  ;;  %v6366_v52 = vld [vmem:[%s9138_s4 + $0xa0] ss:$16 sps:$4 sm:$0xff]   ;;  %v6339_v54 = vld [vmem:[%s9138_s4 + $0x8] ss:$16 sps:$4 sm:$0xff]  }
  0x9d   :  { %1407 = vmatprep.subr.bf16.mxu0 %v6275_v55  ;;  %v6380_v55 = vld [vmem:[%s9138_s4 + $0xe4] ss:$16 sps:$4 sm:$0xff]  }
  0x9f   :  { %1564 = vmatpush1.bf16.msra.mxu1 %v6264_v53  ;;  %v6374_v53 = vld [vmem:[%s9138_s4 + $0xc4] ss:$16 sps:$4 sm:$0xff]  }
  0xa0   :  { %1565 = vmatprep.subr.bf16.mxu1 %v6272_v56  ;;  %1408 = vmatpush1.bf16.msra.mxu0 %v6273_v58  ;;  %v6347_v56 = vld [vmem:[%s9138_s4 + $0x2c] ss:$16 sps:$4 sm:$0xff]   ;;  %v6345_v58 = vld [vmem:[%s9138_s4 + $0x28] ss:$16 sps:$4 sm:$0xff]  }
  0xa1   :  { %1409 = vmatprep.subr.bf16.mxu0 %v6281_v59  ;;  %v6386_v59 = vld [vmem:[%s9138_s4 + $0x104] ss:$16 sps:$4 sm:$0xff]  }
  0xa3   :  { %1566 = vmatpush1.bf16.msra.mxu1 %v6270_v57  ;;  %v6378_v57 = vld [vmem:[%s9138_s4 + $0xe0] ss:$16 sps:$4 sm:$0xff]  }
  0xa4   :  { %1567 = vmatprep.subr.bf16.mxu1 %v6278_v60  ;;  %1410 = vmatpush1.bf16.msra.mxu0 %v6279_v62  ;;  %v6353_v60 = vld [vmem:[%s9138_s4 + $0x4c] ss:$16 sps:$4 sm:$0xff]   ;;  %v6351_v62 = vld [vmem:[%s9138_s4 + $0x48] ss:$16 sps:$4 sm:$0xff]  }
  0xa5   :  { %1411 = vmatprep.subr.bf16.mxu0 %v6287_v63  ;;  %v6359_v63 = vld [vmem:[%s9138_s4 + $0x6c] ss:$16 sps:$4 sm:$0xff]  }
  0xa7   :  { %1568 = vmatpush1.bf16.msra.mxu1 %v6276_v61  ;;  %v6384_v61 = vld [vmem:[%s9138_s4 + $0x100] ss:$16 sps:$4 sm:$0xff]  }
  0xa8   :  { %1569 = vmatprep.subr.bf16.mxu1 %v6284_v0  ;;  %1412 = vmatpush1.bf16.msra.mxu0 %v6285_v2  ;;  %v6390_v0 = vld [vmem:[%s9138_s4 + $0x120] ss:$16 sps:$4 sm:$0xff]   ;;  %v6357_v2 = vld [vmem:[%s9138_s4 + $0x68] ss:$16 sps:$4 sm:$0xff]  }
  0xa9   :  { %1413 = vmatprep.subr.bf16.mxu0 %v6293_v4  ;;  %v6398_v4 = vld [vmem:[%s9138_s4 + $0x144] ss:$16 sps:$4 sm:$0xff]  }
  0xab   :  { %1570 = vmatpush1.bf16.msra.mxu1 %v6282_v1 }
  0xac   :  { %1571 = vmatprep.subr.bf16.mxu1 %v6290_v5  ;;  %1414 = vmatpush1.bf16.msra.mxu0 %v6291_v8 }
  0xad   :  { %1415 = vmatprep.subr.bf16.mxu0 %v6299_v10  ;;  %v6396_v10 = vld [vmem:[%s9138_s4 + $0x140] ss:$16 sps:$4 sm:$0xff]  }
  0xaf   :  { %1572 = vmatpush1.bf16.msra.mxu1 %v6288_v7  ;;  %v6365_v7 = vld [vmem:[%s9138_s4 + $0x8c] ss:$16 sps:$4 sm:$0xff]  }
  0xb0   :  { %1573 = vmatprep.subr.bf16.mxu1 %v6296_v9  ;;  %1416 = vmatpush1.bf16.msra.mxu0 %v6297_v11  ;;  %v6363_v11 = vld [vmem:[%s9138_s4 + $0x88] ss:$16 sps:$4 sm:$0xff]  }
  0xb1   :  { %1417 = vmatprep.subr.bf16.mxu0 %v6305_v13  ;;  %v6371_v13 = vld [vmem:[%s9138_s4 + $0xac] ss:$16 sps:$4 sm:$0xff]  }
  0xb3   :  { %1574 = vmatpush1.bf16.msra.mxu1 %v6294_v12  ;;  %v6404_v12 = vld [vmem:[%s9138_s4 + $0x164] ss:$16 sps:$4 sm:$0xff]  }
  0xb4   :  { %1575 = vmatprep.subr.bf16.mxu1 %v6302_v14  ;;  %1418 = vmatpush1.bf16.msra.mxu0 %v6303_v16  ;;  %v6402_v14 = vld [vmem:[%s9138_s4 + $0x160] ss:$16 sps:$4 sm:$0xff]   ;;  %v6369_v16 = vld [vmem:[%s9138_s4 + $0xa8] ss:$16 sps:$4 sm:$0xff]  }
  0xb5   :  { %1419 = vmatprep.subr.bf16.mxu0 %v6311_v21  ;;  %v6377_v21 = vld [vmem:[%s9138_s4 + $0xcc] ss:$16 sps:$4 sm:$0xff]  }
  0xb7   :  { %1576 = vmatpush1.bf16.msra.mxu1 %v6300_v18  ;;  %v6410_v18 = vld [vmem:[%s9138_s4 + $0x184] ss:$16 sps:$4 sm:$0xff]  }
  0xb8   :  { %1577 = vmatprep.subr.bf16.mxu1 %v6308_v22  ;;  %1420 = vmatpush1.bf16.msra.mxu0 %v6309_v19  ;;  %v6408_v22 = vld [vmem:[%s9138_s4 + $0x180] ss:$16 sps:$4 sm:$0xff]   ;;  %v6375_v19 = vld [vmem:[%s9138_s4 + $0xc8] ss:$16 sps:$4 sm:$0xff]  }
  0xb9   :  { %1421 = vmatprep.subr.bf16.mxu0 %v6317_v25  ;;  %v6383_v25 = vld [vmem:[%s9138_s4 + $0xec] ss:$16 sps:$4 sm:$0xff]  }
  0xbb   :  { %1578 = vmatpush1.bf16.msra.mxu1 %v6306_v24  ;;  %v6416_v24 = vld [vmem:[%s9138_s4 + $0x1a4] ss:$16 sps:$4 sm:$0xff]  }
  0xbc   :  { %1579 = vmatprep.subr.bf16.mxu1 %v6314_v26  ;;  %1422 = vmatpush1.bf16.msra.mxu0 %v6315_v28  ;;  %v6414_v26 = vld [vmem:[%s9138_s4 + $0x1a0] ss:$16 sps:$4 sm:$0xff]   ;;  %v6381_v28 = vld [vmem:[%s9138_s4 + $0xe8] ss:$16 sps:$4 sm:$0xff]  }
  0xbd   :  { %1423 = vmatprep.subr.bf16.mxu0 %v6323_v30  ;;  %v6387_v30 = vld [vmem:[%s9138_s4 + $0x108] ss:$16 sps:$4 sm:$0xff]  }
  0xbf   :  { %1580 = vmatpush1.bf16.msra.mxu1 %v6312_v29  ;;  %v6389_v29 = vld [vmem:[%s9138_s4 + $0x10c] ss:$16 sps:$4 sm:$0xff]  }
  0xc0   :  { %1581 = vmatprep.subr.bf16.mxu1 %v6320_v20  ;;  %1424 = vmatpush1.bf16.msra.mxu0 %v6321_v31  ;;  %v6395_v20 = vld [vmem:[%s9138_s4 + $0x12c] ss:$16 sps:$4 sm:$0xff]   ;;  %v6393_v31 = vld [vmem:[%s9138_s4 + $0x128] ss:$16 sps:$4 sm:$0xff]  }
  0xc1   :  { %2272 = vmatprep.subr.bf16.mxu0 %v6338_v33  ;;  %v6399_v33 = vld [vmem:[%s9138_s4 + $0x148] ss:$16 sps:$4 sm:$0xff]  }
  0xc3   :  { %1582 = vmatpush1.bf16.msra.mxu1 %v6318_v32  ;;  %1426 = vmatmul.mubr.bf16.vlgmr.msra.gmra.mrb[0].mxu0 %v7137_v23  ;;  %v6401_v32 = vld [vmem:[%s9138_s4 + $0x14c] ss:$16 sps:$4 sm:$0xff]  }
  0xc4   :  { %1583 = vmatprep.subr.bf16.mxu1 %v6326_v17  ;;  %2273 = vmatpush1.bf16.msra.mxu0 %v6336_v34  ;;  %v6407_v17 = vld [vmem:[%s9138_s4 + $0x16c] ss:$16 sps:$4 sm:$0xff]   ;;  %v6405_v34 = vld [vmem:[%s9138_s4 + $0x168] ss:$16 sps:$4 sm:$0xff]  }
  0xc5   :  { %2274 = vmatprep.subr.bf16.mxu0 %v6344_v36  ;;  %v6411_v36 = vld [vmem:[%s9138_s4 + $0x188] ss:$16 sps:$4 sm:$0xff]  }
  0xc7   :  { %1584 = vmatpush1.bf16.msra.mxu1 %v6324_v35  ;;  %v6413_v35 = vld [vmem:[%s9138_s4 + $0x18c] ss:$16 sps:$4 sm:$0xff]  }
  0xc8   :  { %1585 = vmatprep.subr.bf16.mxu1 %v6329_v37  ;;  %2275 = vmatpush1.bf16.msra.mxu0 %v6342_v38  ;;  %v6419_v37 = vld [vmem:[%s9138_s4 + $0x1ac] ss:$16 sps:$4 sm:$0xff]   ;;  %v6417_v38 = vld [vmem:[%s9138_s4 + $0x1a8] ss:$16 sps:$4 sm:$0xff]  }
  0xc9   :  { %2276 = vmatprep.subr.bf16.mxu0 %v6350_v40  ;;  %v6425_v40 = vld [vmem:[%s9138_s4 + $0x1cc] ss:$16 sps:$4 sm:$0xff]  }
  0xcb   :  { %1586 = vmatpush1.bf16.msra.mxu1 %v6327_v39  ;;  %v6422_v39 = vld [vmem:[%s9138_s4 + $0x1c4] ss:$16 sps:$4 sm:$0xff]  }
  0xcc   :  { %1587 = vmatprep.subr.bf16.mxu1 %v6332_v41  ;;  %2277 = vmatpush1.bf16.msra.mxu0 %v6348_v42  ;;  %v6420_v41 = vld [vmem:[%s9138_s4 + $0x1c0] ss:$16 sps:$4 sm:$0xff]   ;;  %v6423_v42 = vld [vmem:[%s9138_s4 + $0x1c8] ss:$16 sps:$4 sm:$0xff]  }
  0xcd   :  { %2278 = vmatprep.subr.bf16.mxu0 %v6356_v44  ;;  %v6431_v44 = vld [vmem:[%s9138_s4 + $0x1ec] ss:$16 sps:$4 sm:$0xff]  }
  0xcf   :  { %1588 = vmatpush1.bf16.msra.mxu1 %v6330_v43  ;;  %v6428_v43 = vld [vmem:[%s9138_s4 + $0x1e4] ss:$16 sps:$4 sm:$0xff]  }
  0xd0   :  { %1598 = vmatprep.subr.bf16.mxu1 %v6335_v45  ;;  %2279 = vmatpush1.bf16.msra.mxu0 %v6354_v46  ;;  %v6426_v45 = vld [vmem:[%s9138_s4 + $0x1e0] ss:$16 sps:$4 sm:$0xff]   ;;  %v6429_v46 = vld [vmem:[%s9138_s4 + $0x1e8] ss:$16 sps:$4 sm:$0xff]  }
  0xd1   :  { %2280 = vmatprep.subr.bf16.mxu0 %v6362_v49 }
  0xd2   :  { %1590 = vmatmul.mubr.bf16.vlgmr.msra.gmra.mrb[4].mxu1 %v7137_v23  ;;  %v6372_v23 = vld [vmem:[%s9138_s4 + $0xc0] ss:$16 sps:$4 sm:$0xff]  }
  0xd3   :  { %1599 = vmatpush1.bf16.msra.mxu1 %v6333_v47  ;;  %1630 = vmatprep.mubr.bf16.mxu1 %v6993_v3  ;;  %v6434_v47 = vld [vmem:[%s9138_s4 + $0x204] ss:$16 sps:$4 sm:$0xff]  }
  0xd4   :  { %2354 = vmatprep.subr.bf16.mxu1 %v6341_v48  ;;  %2281 = vmatpush1.bf16.msra.mxu0 %v6360_v50  ;;  %v6437_v48 = vld [vmem:[%s9138_s4 + $0x20c] ss:$16 sps:$4 sm:$0xff]  }
  0xd5   :  { %2282 = vmatprep.subr.bf16.mxu0 %v6368_v51 }
  0xd8   :  { %2283 = vmatpush1.bf16.msra.mxu0 %v6366_v52 }
  0xd9   :  { %2284 = vmatprep.subr.bf16.mxu0 %v6374_v53 }
  0xdc   :  { %2285 = vmatpush1.bf16.msra.mxu0 %v6372_v23 }
  0xdd   :  { %2286 = vmatprep.subr.bf16.mxu0 %v6380_v55 }
  0xde   :  { %5496 = vmatmul.mubr.msk.bf16.vlgmr.msra.gmra.mrb[4].mxu1 %vm1307_vm0, %v7150_v27  ;;  %v6392_v27 = vld [vmem:[%s9138_s4 + $0x124] ss:$16 sps:$4 sm:$0xff]  }
  0xdf   :  { %2355 = vmatpush1.bf16.msra.mxu1 %v6339_v54 }
  0xe0   :  { %2356 = vmatprep.subr.bf16.mxu1 %v6347_v56  ;;  %2287 = vmatpush1.bf16.msra.mxu0 %v6378_v57 }
  0xe1   :  { %2288 = vmatprep.subr.bf16.mxu0 %v6386_v59 }
  0xe3   :  { %2357 = vmatpush1.bf16.msra.mxu1 %v6345_v58 }
  0xe4   :  { %2358 = vmatprep.subr.bf16.mxu1 %v6353_v60  ;;  %2289 = vmatpush1.bf16.msra.mxu0 %v6384_v61 }
  0xe5   :  { %v7804_v1 = vpop.f32.mrb[0].mxu1  ;;  %2290 = vmatprep.subr.bf16.mxu0 %v6392_v27 }
  0xe6   :  { %v7812_v5 = vpop.f32.mrb[1].mxu1 }
  0xe7   :  { %v1472_v8 = vpop.f32.mrb[2].mxu1  ;;  %2359 = vmatpush1.bf16.msra.mxu1 %v6351_v62 }
  0xe8   :  { %v1473_v9 = vpop.f32.mrb[3].mxu1  ;;  %2360 = vmatprep.subr.bf16.mxu1 %v6359_v63  ;;  %2291 = vmatpush1.bf16.msra.mxu0 %v6390_v0 }
  0xe9   :  { %2292 = vmatprep.subr.bf16.mxu0 %v6398_v4 }
  0xeb   :  { %2361 = vmatpush1.bf16.msra.mxu1 %v6357_v2 }
  0xec   :  { %2362 = vmatprep.subr.bf16.mxu1 %v6365_v7  ;;  %2293 = vmatpush1.bf16.msra.mxu0 %v6396_v10 }
  0xed   :  { %2294 = vmatprep.subr.bf16.mxu0 %v6404_v12 }
  0xef   :  { %2363 = vmatpush1.bf16.msra.mxu1 %v6363_v11 }
  0xf0   :  { %2364 = vmatprep.subr.bf16.mxu1 %v6371_v13  ;;  %2295 = vmatpush1.bf16.msra.mxu0 %v6402_v14 }
  0xf1   :  { %2296 = vmatprep.subr.bf16.mxu0 %v6410_v18 }
  0xf3   :  { %2365 = vmatpush1.bf16.msra.mxu1 %v6369_v16 }
  0xf4   :  { %2366 = vmatprep.subr.bf16.mxu1 %v6377_v21  ;;  %2297 = vmatpush1.bf16.msra.mxu0 %v6408_v22 }
  0xf5   :  { %2298 = vmatprep.subr.bf16.mxu0 %v6416_v24 }
  0xf7   :  { %2367 = vmatpush1.bf16.msra.mxu1 %v6375_v19 }
  0xf8   :  { %2368 = vmatprep.subr.bf16.mxu1 %v6383_v25  ;;  %2299 = vmatpush1.bf16.msra.mxu0 %v6414_v26 }
  0xf9   :  { %2300 = vmatprep.subr.bf16.mxu0 %v6422_v39 }
  0xfb   :  { %2369 = vmatpush1.bf16.msra.mxu1 %v6381_v28 }
  0xfc   :  { %2370 = vmatprep.subr.bf16.mxu1 %v6389_v29  ;;  %2301 = vmatpush1.bf16.msra.mxu0 %v6420_v41 }
  0xfd   :  { %2302 = vmatprep.subr.bf16.mxu0 %v6428_v43 }
  0xff   :  { %2371 = vmatpush1.bf16.msra.mxu1 %v6387_v30 }
 0x100   :  { %2372 = vmatprep.subr.bf16.mxu1 %v6395_v20  ;;  %2303 = vmatpush1.bf16.msra.mxu0 %v6426_v45 }
 0x101   :  { %2313 = vmatprep.subr.bf16.mxu0 %v6434_v47 }
 0x103   :  { %2373 = vmatpush1.bf16.msra.mxu1 %v6393_v31 }
 0x104   :  { %2374 = vmatprep.subr.bf16.mxu1 %v6401_v32 }
 0x107   :  { %2375 = vmatpush1.bf16.msra.mxu1 %v6399_v33 }
 0x108   :  { %2376 = vmatprep.subr.bf16.mxu1 %v6407_v17 }
 0x10b   :  { %2377 = vmatpush1.bf16.msra.mxu1 %v6405_v34 }
 0x10c   :  { %2378 = vmatprep.subr.bf16.mxu1 %v6413_v35 }
 0x10f   :  { %2379 = vmatpush1.bf16.msra.mxu1 %v6411_v36 }
 0x110   :  { %2380 = vmatprep.subr.bf16.mxu1 %v6419_v37 }
 0x113   :  { %2381 = vmatpush1.bf16.msra.mxu1 %v6417_v38 }
 0x114   :  { %2382 = vmatprep.subr.bf16.mxu1 %v6425_v40 }
 0x117   :  { %2383 = vmatpush1.bf16.msra.mxu1 %v6423_v42 }
 0x118   :  { %2384 = vmatprep.subr.bf16.mxu1 %v6431_v44 }
 0x11b   :  { %2385 = vmatpush1.bf16.msra.mxu1 %v6429_v46 }
 0x11c   :  { %2395 = vmatprep.subr.bf16.mxu1 %v6437_v48 }
 0x11d   :  { %23 = vsyncpa [#allocation5], 0  ;;  %v7926_v49 = vsub.s32 0, %v7098_v6  ;;  %v7931_v50 = vld [vmem:[%s9137_s3] sm:$0xf]  ;;  %v7934_v51 = vsub.s32 1, %v7098_v6 }
 0x11e   :  { %v6432_v63 = vld [vmem:[%s9138_s4 + $0x200] ss:$16 sps:$4 sm:$0xff]   ;;  %v6435_v0 = vld [vmem:[%s9138_s4 + $0x208] ss:$16 sps:$4 sm:$0xff]   ;;  %v6440_v4 = vld [vmem:[%s9138_s4 + $0x224] ss:$16 sps:$4 sm:$0xff]  }
 0x11f   :  { %v255_v52 = vrot.slane %v7931_v50, %v7926_v49  ;;  %v259_v53 = vrot.slane %v7931_v50, %v7934_v51  ;;  %v6441_v7 = vld [vmem:[%s9138_s4 + $0x228] ss:$16 sps:$4 sm:$0xff]   ;;  %v6446_v8 = vld [vmem:[%s9138_s4 + $0x244] ss:$16 sps:$4 sm:$0xff]   ;;  %v6449_v9 = vld [vmem:[%s9138_s4 + $0x24c] ss:$16 sps:$4 sm:$0xff]  }
 0x120   :  { %v6444_v10 = vld [vmem:[%s9138_s4 + $0x240] ss:$16 sps:$4 sm:$0xff]   ;;  %v6447_v11 = vld [vmem:[%s9138_s4 + $0x248] ss:$16 sps:$4 sm:$0xff]   ;;  %v6452_v12 = vld [vmem:[%s9138_s4 + $0x264] ss:$16 sps:$4 sm:$0xff]  }
 0x121   :  { %v6455_v13 = vld [vmem:[%s9138_s4 + $0x26c] ss:$16 sps:$4 sm:$0xff]   ;;  %v7979_v14 = vsub.s32 3, %v7098_v6  ;;  %v6450_v16 = vld [vmem:[%s9138_s4 + $0x260] ss:$16 sps:$4 sm:$0xff]   ;;  %v8014_v34 = vsub.s32 2, %v7098_v6 }
 0x122   :  { %v6453_v18 = vld [vmem:[%s9138_s4 + $0x268] ss:$16 sps:$4 sm:$0xff]   ;;  %v6458_v21 = vld [vmem:[%s9138_s4 + $0x284] ss:$16 sps:$4 sm:$0xff]   ;;  %v6461_v22 = vld [vmem:[%s9138_s4 + $0x28c] ss:$16 sps:$4 sm:$0xff]  }
 0x123   :  { %v267_v19 = vrot.slane %v7931_v50, %v7979_v14  ;;  %v6456_v24 = vld [vmem:[%s9138_s4 + $0x280] ss:$16 sps:$4 sm:$0xff]   ;;  %v6459_v25 = vld [vmem:[%s9138_s4 + $0x288] ss:$16 sps:$4 sm:$0xff]   ;;  %v6464_v28 = vld [vmem:[%s9138_s4 + $0x2a4] ss:$16 sps:$4 sm:$0xff]   ;;  %v263_v41 = vrot.slane %v7931_v50, %v8014_v34 }
 0x124   :  { %v6467_v29 = vld [vmem:[%s9138_s4 + $0x2ac] ss:$16 sps:$4 sm:$0xff]   ;;  %v6462_v33 = vld [vmem:[%s9138_s4 + $0x2a0] ss:$16 sps:$4 sm:$0xff]   ;;  %v6465_v17 = vld [vmem:[%s9138_s4 + $0x2a8] ss:$16 sps:$4 sm:$0xff]  }
 0x125   :  { %v6470_v36 = vld [vmem:[%s9138_s4 + $0x2c4] ss:$16 sps:$4 sm:$0xff]   ;;  %v6473_v37 = vld [vmem:[%s9138_s4 + $0x2cc] ss:$16 sps:$4 sm:$0xff]   ;;  %v6468_v39 = vld [vmem:[%s9138_s4 + $0x2c0] ss:$16 sps:$4 sm:$0xff]  }
 0x126   :  { %v6471_v40 = vld [vmem:[%s9138_s4 + $0x2c8] ss:$16 sps:$4 sm:$0xff]   ;;  %v6476_v42 = vld [vmem:[%s9138_s4 + $0x2e4] ss:$16 sps:$4 sm:$0xff]   ;;  %v6479_v43 = vld [vmem:[%s9138_s4 + $0x2ec] ss:$16 sps:$4 sm:$0xff]  }
 0x127   :  { %v6474_v44 = vld [vmem:[%s9138_s4 + $0x2e0] ss:$16 sps:$4 sm:$0xff]   ;;  %v6477_v45 = vld [vmem:[%s9138_s4 + $0x2e8] ss:$16 sps:$4 sm:$0xff]   ;;  %v6482_v47 = vld [vmem:[%s9138_s4 + $0x304] ss:$16 sps:$4 sm:$0xff]  }
 0x128   :  { %v6485_v48 = vld [vmem:[%s9138_s4 + $0x30c] ss:$16 sps:$4 sm:$0xff]   ;;  %v6480_v50 = vld [vmem:[%s9138_s4 + $0x300] ss:$16 sps:$4 sm:$0xff]   ;;  %s6995_s0 = smov 20   ;;  %vm2815_vm1 = vcmask 1041408  }
 0x129   :  { %vm2736_vm2 = vcmask 162816   ;;  %vm2738_vm3 = vcmask 320512   ;;  %s6996_s26 = smov 108   ;;  %vm2751_vm4 = vcmask 156672   ;;  %s6997_s18 = smov [#allocation4]  }
 0x12a   :  { %s5274_s19 = sshll.u32 %s6997_s18, 4  ;;  %s6998_s2 = smov [#allocation2]   ;;  %s5275_s19 = int_to_ptr.vmem [resolvable:$true] %s5274_s19 }
 0x12b   :  { %s5264_s20 = sshll.u32 %s6998_s2, 4  ;;  %s6923_s21 = scalar_lea.vmem %s5275_s19, 32  ;;  %s5265_s20 = int_to_ptr.vmem [resolvable:$true] %s5264_s20 }
 0x12c   :  { %p6924_p0 = scmp.ne.s32.totalorder %s5275_s19, %s6923_s21  ;;  %p6928_p1 = scmp.lt.s32.totalorder %s5275_s19, %s5275_s19 }
 0x12d   :  { %p6929_p2 = scmp.lt.s32.totalorder %s6923_s21, %s6923_s21 }
 0x12f   :  { %p6930_p3 = por %p6929_p2, %p6928_p1 }
 0x131   :  { %p6931_p4 = pnand %p6930_p3, %p6924_p0 }
 0x196   :  { %v1427_v23 = vpop.f32.mrb[0].mxu0 }
 0x197   :  { %v5966_v54 = vadd.f32 %v1427_v23, %v255_v52  ;;  %v1429_v55 = vpop.f32.mrb[1].mxu0  ;;  %v6483_v52 = vld [vmem:[%s9138_s4 + $0x308] ss:$16 sps:$4 sm:$0xff]   ;;  %v6487_v23 = vld [vmem:[%s9140_s6 + $0x40] sm:$0xff]  }
 0x198   :  { %v5968_v56 = vadd.f32 %v1429_v55, %v259_v53  ;;  %v1431_v57 = vpop.f32.mrb[2].mxu0  ;;  %v6488_v55 = vld [vmem:[%s9140_s6] sm:$0xff]  }
 0x199   :  { %v5967_v58 = vadd.f32 %v5966_v54, %v7804_v1  ;;  %v1432_v59 = vpop.f32.mrb[3].mxu0  ;;  %v6443_v1 = vld [vmem:[%s9138_s4 + $0x22c] ss:$16 sps:$4 sm:$0xff]   ;;  %v6486_v54 = vld [vmem:[%s9140_s6 + $0x80] sm:$0xff]  }
 0x19a   :  { %v5969_v60 = vadd.f32 %v5968_v56, %v7812_v5  ;;  %v6438_v5 = vld [vmem:[%s9138_s4 + $0x220] ss:$16 sps:$4 sm:$0xff]   ;;  %v6490_v57 = vld [vmem:[%s9140_s6 + $0x48] sm:$0xff]  }
 0x19b   :  { %v1639_v61 = vmax.f32 %v5967_v58, 0.0  ;;  %v6489_v58 = vld [vmem:[%s9140_s6 + $0x88] sm:$0xff]  }
 0x19c   :  { %v1640_v62 = vmax.f32 %v5969_v60, 0.0  ;;  %v6491_v59 = vld [vmem:[%s9140_s6 + $0x8] sm:$0xff]   ;;  %v6493_v60 = vld [vmem:[%s9140_s6 + $0x50] sm:$0xff]  }
 0x19d   :  { %v1643_v2 = vpack.c.bf16 %v1639_v61, %v1639_v61  ;;  %v6492_v61 = vld [vmem:[%s9140_s6 + $0x90] sm:$0xff]  }
 0x19e   :  { %v1644_v27 = vpack.c.bf16 %v1640_v62, %v1640_v62  ;;  %v6494_v62 = vld [vmem:[%s9140_s6 + $0x10] sm:$0xff]  }
 0x1a0   :  { %2304 = vmatprep.mubr.bf16.mxu0 %v1644_v27  ;;  %2386 = vmatprep.mubr.bf16.mxu1 %v1644_v27  ;;  %v6496_v27 = vld [vmem:[%s9140_s6 + $0x58] sm:$0xff]  }
 0x1a1   :  { %2305 = vmatmul.mubr.bf16.vlgmr.msra.gmra.mrb[4].mxu0 %v1643_v2  ;;  %2387 = vmatmul.mubr.bf16.vlgmr.msra.gmra.mrb[8].mxu1 %v1643_v2  ;;  %v6499_v2 = vld [vmem:[%s9140_s6 + $0x60] sm:$0xff]  }
 0x1a2   :  { %2314 = vmatpush1.bf16.msra.mxu0 %v6432_v63  ;;  %2396 = vmatpush1.bf16.msra.mxu1 %v6435_v0  ;;  %v6495_v63 = vld [vmem:[%s9140_s6 + $0x98] sm:$0xff]  }
 0x1a3   :  { %2315 = vmatprep.subr.bf16.mxu0 %v6440_v4  ;;  %2397 = vmatprep.subr.bf16.mxu1 %v6443_v1  ;;  %v6497_v0 = vld [vmem:[%s9140_s6 + $0x18] sm:$0xff]   ;;  %v6498_v4 = vld [vmem:[%s9140_s6 + $0xa0] sm:$0xff]  }
 0x1a4   :  { %v6500_v1 = vld [vmem:[%s9140_s6 + $0x20] sm:$0xff]  }
 0x1a6   :  { %2316 = vmatpush1.bf16.msra.mxu0 %v6438_v5  ;;  %2398 = vmatpush1.bf16.msra.mxu1 %v6441_v7  ;;  %v6502_v5 = vld [vmem:[%s9140_s6 + $0x68] sm:$0xff]  }
 0x1a7   :  { %2317 = vmatprep.subr.bf16.mxu0 %v6446_v8  ;;  %2399 = vmatprep.subr.bf16.mxu1 %v6449_v9  ;;  %v6501_v7 = vld [vmem:[%s9140_s6 + $0xa8] sm:$0xff]   ;;  %v6504_v9 = vld [vmem:[%s9140_s6 + $0xb0] sm:$0xff]  }
 0x1a8   :  { %v6503_v8 = vld [vmem:[%s9140_s6 + $0x28] sm:$0xff]  }
 0x1aa   :  { %2318 = vmatpush1.bf16.msra.mxu0 %v6444_v10  ;;  %2400 = vmatpush1.bf16.msra.mxu1 %v6447_v11  ;;  %v6505_v10 = vld [vmem:[%s9140_s6 + $0x70] sm:$0xff]  }
 0x1ab   :  { %2319 = vmatprep.subr.bf16.mxu0 %v6452_v12  ;;  %2401 = vmatprep.subr.bf16.mxu1 %v6455_v13  ;;  %v6506_v11 = vld [vmem:[%s9140_s6 + $0x30] sm:$0xff]   ;;  %v6507_v12 = vld [vmem:[%s9140_s6 + $0xb8] sm:$0xff]  }
 0x1ac   :  { %v6508_v13 = vld [vmem:[%s9140_s6 + $0x78] sm:$0xff]  }
 0x1ae   :  { %2320 = vmatpush1.bf16.msra.mxu0 %v6450_v16  ;;  %2402 = vmatpush1.bf16.msra.mxu1 %v6453_v18  ;;  %v6509_v16 = vld [vmem:[%s9140_s6 + $0x38] sm:$0xff]   ;;  %v6510_v18 = vld [vmem:[%s9140_s6 + $0xc0] sm:$0xff]  }
 0x1af   :  { %2321 = vmatprep.subr.bf16.mxu0 %v6458_v21  ;;  %2403 = vmatprep.subr.bf16.mxu1 %v6461_v22  ;;  %v2740_v21 = vld [vmem:[%s9135_s1] sm:$0x3] }
 0x1b0   :  { %2742 = vrot.lane.b32.xlu0 %v2740_v21, %s6995_s0  ;;  %v1747_v22 = vld [vmem:[%s9139_s5] sm:$0xf] }
 0x1b1   :  { %v1632_v26 = vpop.f32.mrb[4].mxu1  ;;  %v6539_v21 = vld [vmem:[%s9144_s10 + $0x60] ss:$16 sps:$4 sm:$0xff]  }
 0x1b2   :  { %v1634_v30 = vpop.f32.mrb[5].mxu1  ;;  %2322 = vmatpush1.bf16.msra.mxu0 %v6456_v24  ;;  %2404 = vmatpush1.bf16.msra.mxu1 %v6459_v25  ;;  %v5970_v46 = vadd.f32 %v1632_v26, %v263_v41  ;;  %v1760_v24 = vrot.slane %v1747_v22, %v8014_v34  ;;  %v1756_v25 = vrot.slane %v1747_v22, %v7934_v51 }
 0x1b3   :  { %v5971_v20 = vadd.f32 %v1634_v30, %v267_v19  ;;  %v1636_v31 = vpop.f32.mrb[6].mxu1  ;;  %2323 = vmatprep.subr.bf16.mxu0 %v6464_v28  ;;  %2405 = vmatprep.subr.bf16.mxu1 %v6467_v29  ;;  %v1752_v19 = vrot.slane %v1747_v22, %v7926_v49  ;;  %v1764_v26 = vrot.slane %v1747_v22, %v7979_v14  ;;  %v6547_v22 = vld [vmem:[%s9144_s10 + $0x84] ss:$16 sps:$4 sm:$0xff]  }
 0x1b4   :  { %v1637_v32 = vpop.f32.mrb[7].mxu1  ;;  %v1641_v53 = vmax.f32 %v5970_v46, 0.0 }
 0x1b5   :  { %v1642_v35 = vmax.f32 %v5971_v20, 0.0 }
 0x1b6   :  { %2324 = vmatpush1.bf16.msra.mxu0 %v6462_v33  ;;  %2406 = vmatpush1.bf16.msra.mxu1 %v6465_v17  ;;  %v1645_v56 = vpack.c.bf16 %v1641_v53, %v1641_v53 }
 0x1b7   :  { %v1646_v38 = vpack.c.bf16 %v1642_v35, %v1642_v35  ;;  %2325 = vmatprep.subr.bf16.mxu0 %v6470_v36  ;;  %2407 = vmatprep.subr.bf16.mxu1 %v6473_v37 }
 0x1b9   :  { %5597 = vmatprep.mubr.msk.bf16.mxu0 %vm1307_vm0, %v1646_v38  ;;  %5598 = vmatprep.mubr.msk.bf16.mxu1 %vm1307_vm0, %v1646_v38 }
 0x1ba   :  { %2326 = vmatpush1.bf16.msra.mxu0 %v6468_v39  ;;  %2408 = vmatpush1.bf16.msra.mxu1 %v6471_v40 }
 0x1bb   :  { %2327 = vmatprep.subr.bf16.mxu0 %v6476_v42  ;;  %2409 = vmatprep.subr.bf16.mxu1 %v6479_v43 }
 0x1be   :  { %2328 = vmatpush1.bf16.msra.mxu0 %v6474_v44  ;;  %2410 = vmatpush1.bf16.msra.mxu1 %v6477_v45 }
 0x1bf   :  { %2329 = vmatprep.subr.bf16.mxu0 %v6482_v47  ;;  %2411 = vmatprep.subr.bf16.mxu1 %v6485_v48  ;;  %v6511_v47 = vld [vmem:[%s9142_s8] ss:$16 sps:$4 sm:$0xff]   ;;  %v6513_v48 = vld [vmem:[%s9142_s8 + $0x4] ss:$16 sps:$4 sm:$0xff]  }
 0x1c2   :  { %2330 = vmatpush1.bf16.msra.mxu0 %v6480_v50  ;;  %2412 = vmatpush1.bf16.msra.mxu1 %v6483_v52  ;;  %v2758_v50 = vld [vmem:[%s9142_s8 + $0x20] sm:$0x33] }
 0x1c3   :  { %2694 = vmatprep.subr.bf16.mxu1 %v6993_v3  ;;  %5922 = vmatprep.subr.bf16.mxu0 %v6487_v23  ;;  %v5631_v52 = vcombine.high %v2758_v50, %v2758_v50 }
 0x1c5   :  { %2346 = vmatmul.mubr.bf16.vlgmr.msra.gmra.mrb[4].mxu0 %v1645_v56  ;;  %2428 = vmatmul.mubr.bf16.vlgmr.msra.gmra.mrb[8].mxu1 %v1645_v56 }
 0x1c6   :  { %2695 = vmatpush1.bf16.msra.mxu1 %v6486_v54  ;;  %5923 = vmatpush3.bf16.msra.mxu0 %v6488_v55  ;;  %v5599_v54 = vld [vmem:[%s9141_s7] ss:$0 sm:$0xff] }
 0x1c7   :  { %2696 = vmatprep.subr.bf16.mxu1 %v6993_v3  ;;  %5924 = vmatprep.subr.bf16.mxu0 %v6490_v57 }
 0x1ca   :  { %2697 = vmatpush1.bf16.msra.mxu1 %v6489_v58  ;;  %5925 = vmatpush3.bf16.msra.mxu0 %v6491_v59 }
 0x1cb   :  { %2698 = vmatprep.subr.bf16.mxu1 %v6993_v3  ;;  %5926 = vmatprep.subr.bf16.mxu0 %v6493_v60 }
 0x1ce   :  { %2699 = vmatpush1.bf16.msra.mxu1 %v6492_v61  ;;  %5927 = vmatpush3.bf16.msra.mxu0 %v6494_v62 }
 0x1cf   :  { %2700 = vmatprep.subr.bf16.mxu1 %v6993_v3  ;;  %5928 = vmatprep.subr.bf16.mxu0 %v6496_v27 }
 0x1d2   :  { %2701 = vmatpush1.bf16.msra.mxu1 %v6495_v63  ;;  %5929 = vmatpush3.bf16.msra.mxu0 %v6497_v0  ;;  %v5630_v0 = vcombine.low %v2758_v50, %v2758_v50 }
 0x1d3   :  { %2702 = vmatprep.subr.bf16.mxu1 %v6993_v3  ;;  %5930 = vmatprep.subr.bf16.mxu0 %v6499_v2 }
 0x1d4   :  { %v2817_v2 = vsel %vm2815_vm1, %v5630_v0, 0  ;;  %v6568_v0 = vld [vmem:[%s9144_s10 + $0xec] ss:$16 sps:$4 sm:$0xff]  }
 0x1d6   :  { %2703 = vmatpush1.bf16.msra.mxu1 %v6498_v4  ;;  %5931 = vmatpush3.bf16.msra.mxu0 %v6500_v1  ;;  %v6518_v4 = vld [vmem:[%s9142_s8 + $0xc] ss:$16 sps:$4 sm:$0xff]  }
 0x1d7   :  { %2704 = vmatprep.subr.bf16.mxu1 %v6993_v3  ;;  %5932 = vmatprep.subr.bf16.mxu0 %v6502_v5 }
 0x1da   :  { %2705 = vmatpush1.bf16.msra.mxu1 %v6501_v7  ;;  %5933 = vmatpush3.bf16.msra.mxu0 %v6503_v8 }
 0x1db   :  { %2706 = vmatprep.subr.bf16.mxu1 %v6993_v3  ;;  %5934 = vmatprep.subr.bf16.mxu0 %v6505_v10  ;;  %v6523_v10 = vld [vmem:[%s9144_s10 + $0x4] ss:$16 sps:$4 sm:$0xff]  }
 0x1de   :  { %2707 = vmatpush1.bf16.msra.mxu1 %v6504_v9  ;;  %5935 = vmatpush3.bf16.msra.mxu0 %v6506_v11  ;;  %v6521_v9 = vld [vmem:[%s9144_s10] ss:$16 sps:$4 sm:$0xff]   ;;  %v6529_v11 = vld [vmem:[%s9144_s10 + $0x24] ss:$16 sps:$4 sm:$0xff]  }
 0x1df   :  { %2708 = vmatprep.subr.bf16.mxu1 %v6993_v3  ;;  %5936 = vmatprep.subr.bf16.mxu0 %v6508_v13  ;;  %v6535_v13 = vld [vmem:[%s9144_s10 + $0x44] ss:$16 sps:$4 sm:$0xff]  }
 0x1e2   :  { %2709 = vmatpush1.bf16.msra.mxu1 %v6507_v12  ;;  %5937 = vmatpush3.bf16.msra.mxu0 %v6509_v16  ;;  %v6527_v12 = vld [vmem:[%s9144_s10 + $0x20] ss:$16 sps:$4 sm:$0xff]  }
 0x1e3   :  { %2710 = vmatprep.subr.bf16.mxu1 %v6993_v3  ;;  %3543 = vmatprep.subr.bf16.mxu0 %v6523_v10  ;;  %v6533_v16 = vld [vmem:[%s9144_s10 + $0x40] ss:$16 sps:$4 sm:$0xff]   ;;  %v6592_v10 = vld [vmem:[%s9144_s10 + $0x16c] ss:$16 sps:$4 sm:$0xff]  }
 0x1e6   :  { %2711 = vmatpush1.bf16.msra.mxu1 %v6510_v18  ;;  %v6541_v18 = vld [vmem:[%s9144_s10 + $0x64] ss:$16 sps:$4 sm:$0xff]  }
 0x1e7   :  { %2828 = vmatprep.subr.bf16.mxu1 %v6513_v48 }
 0x222   :  { %v2743_v1 = vpop.permute.xlu0 %2742 }
 0x298   :  { %v2347_v28 = vpop.f32.mrb[4].mxu0  ;;  %v2429_v29 = vpop.f32.mrb[8].mxu1 }
 0x299   :  { %v5972_v30 = vadd.f32 %v2347_v28, %v1752_v19  ;;  %v5974_v20 = vadd.f32 %v2429_v29, %v1760_v24  ;;  %v2349_v31 = vpop.f32.mrb[5].mxu0  ;;  %v2431_v32 = vpop.f32.mrb[9].mxu1  ;;  %v6545_v19 = vld [vmem:[%s9144_s10 + $0x80] ss:$16 sps:$4 sm:$0xff]   ;;  %v6553_v24 = vld [vmem:[%s9144_s10 + $0xa4] ss:$16 sps:$4 sm:$0xff]  }
 0x29a   :  { %v5973_v33 = vadd.f32 %v2349_v31, %v1756_v25  ;;  %v5975_v17 = vadd.f32 %v2431_v32, %v1764_v26  ;;  %v2351_v35 = vpop.f32.mrb[6].mxu0  ;;  %v2433_v36 = vpop.f32.mrb[10].mxu1  ;;  %v6551_v25 = vld [vmem:[%s9144_s10 + $0xa0] ss:$16 sps:$4 sm:$0xff]   ;;  %v6559_v26 = vld [vmem:[%s9144_s10 + $0xc4] ss:$16 sps:$4 sm:$0xff]  }
 0x29b   :  { %v2436_v37 = vmax.f32 %v5972_v30, 0.0  ;;  %v2438_v38 = vmax.f32 %v5974_v20, 0.0  ;;  %v2352_v39 = vpop.f32.mrb[7].mxu0  ;;  %v2434_v40 = vpop.f32.mrb[11].mxu1  ;;  %v6557_v28 = vld [vmem:[%s9144_s10 + $0xc0] ss:$16 sps:$4 sm:$0xff]  }
 0x29c   :  { %v2437_v41 = vmax.f32 %v5973_v33, 0.0  ;;  %v2439_v42 = vmax.f32 %v5975_v17, 0.0  ;;  %v6565_v29 = vld [vmem:[%s9144_s10 + $0xe4] ss:$16 sps:$4 sm:$0xff]   ;;  %v6563_v30 = vld [vmem:[%s9144_s10 + $0xe0] ss:$16 sps:$4 sm:$0xff]  }
 0x29d   :  { %v2440_v45 = vpack.c.bf16 %v2436_v37, %v2436_v37  ;;  %v2442_v46 = vpack.c.bf16 %v2438_v38, %v2438_v38  ;;  %v6571_v20 = vld [vmem:[%s9144_s10 + $0x104] ss:$16 sps:$4 sm:$0xff]   ;;  %v6569_v31 = vld [vmem:[%s9144_s10 + $0x100] ss:$16 sps:$4 sm:$0xff]  }
 0x29e   :  { %v2441_v43 = vpack.c.bf16 %v2437_v41, %v2437_v41  ;;  %v2443_v44 = vpack.c.bf16 %v2439_v42, %v2439_v42  ;;  %v6577_v32 = vld [vmem:[%s9144_s10 + $0x124] ss:$16 sps:$4 sm:$0xff]   ;;  %v6575_v33 = vld [vmem:[%s9144_s10 + $0x120] ss:$16 sps:$4 sm:$0xff]  }
 0x29f   :  { %v6583_v17 = vld [vmem:[%s9144_s10 + $0x144] ss:$16 sps:$4 sm:$0xff]   ;;  %v6581_v35 = vld [vmem:[%s9144_s10 + $0x140] ss:$16 sps:$4 sm:$0xff]  }
 0x2a0   :  { %2686 = vmatprep.mubr.bf16.mxu0 %v2441_v43  ;;  %5625 = vmatprep.mubr.msk.bf16.mxu1 %vm1307_vm0, %v2443_v44  ;;  %v6589_v36 = vld [vmem:[%s9144_s10 + $0x164] ss:$16 sps:$4 sm:$0xff]   ;;  %v6587_v37 = vld [vmem:[%s9144_s10 + $0x160] ss:$16 sps:$4 sm:$0xff]   ;;  %v2759_v43 = vld [vmem:[%s9142_s8 + $0x28] sm:$0x33] }
 0x2a1   :  { %2687 = vmatmul.mubr.bf16.vlgmr.msra.gmra.mrb[8].mxu0 %v2440_v45  ;;  %2727 = vmatmul.mubr.bf16.vlgmr.msra.gmra.mrb[12].mxu1 %v2442_v46  ;;  %v6595_v38 = vld [vmem:[%s9144_s10 + $0x184] ss:$16 sps:$4 sm:$0xff]   ;;  %v6593_v39 = vld [vmem:[%s9144_s10 + $0x180] ss:$16 sps:$4 sm:$0xff]   ;;  %v6516_v45 = vld [vmem:[%s9142_s8 + $0x8] ss:$16 sps:$4 sm:$0xff]   ;;  %v5632_v48 = vcombine.low %v2759_v43, %v2759_v43 }
 0x2a2   :  { %2860 = vmatprep.mubr.bf16.mxu1 %v6993_v3  ;;  %2829 = vmatpush1.bf16.msra.mxu1 %v6511_v47  ;;  %v6601_v40 = vld [vmem:[%s9144_s10 + $0x1a4] ss:$16 sps:$4 sm:$0xff]   ;;  %v6599_v41 = vld [vmem:[%s9144_s10 + $0x1a0] ss:$16 sps:$4 sm:$0xff]   ;;  %v5633_v47 = vcombine.high %v2759_v43, %v2759_v43 }
 0x2a3   :  { %5634 = vmatprep.subr.msk.bf16.mxu1 %vm2815_vm1, %v5631_v52  ;;  %3544 = vmatpush1.bf16.msra.mxu0 %v6521_v9  ;;  %v2823_v50 = vsel %vm2815_vm1, %v5632_v48, 0  ;;  %v6526_v52 = vld [vmem:[%s9144_s10 + $0xc] ss:$16 sps:$4 sm:$0xff]   ;;  %v6584_v9 = vld [vmem:[%s9144_s10 + $0x148] ss:$16 sps:$4 sm:$0xff]  }
 0x2a4   :  { %3545 = vmatprep.subr.bf16.mxu0 %v6529_v11  ;;  %v6590_v11 = vld [vmem:[%s9144_s10 + $0x168] ss:$16 sps:$4 sm:$0xff]   ;;  %v6617_v43 = vld [vmem:[%s9144_s10 + $0x200] ss:$16 sps:$4 sm:$0xff]   ;;  %v6628_v48 = vld [vmem:[%s9144_s10 + $0x22c] ss:$16 sps:$4 sm:$0xff]  }
 0x2a6   :  { %2831 = vmatpush1.bf16.msra.mxu1 %v2817_v2  ;;  %v6566_v2 = vld [vmem:[%s9144_s10 + $0xe8] ss:$16 sps:$4 sm:$0xff]  }
 0x2a7   :  { %2869 = vmatprep.subr.bf16.mxu1 %v6518_v4  ;;  %3546 = vmatpush1.bf16.msra.mxu0 %v6527_v12  ;;  %v6574_v4 = vld [vmem:[%s9144_s10 + $0x10c] ss:$16 sps:$4 sm:$0xff]  }
 0x2a8   :  { %3547 = vmatprep.subr.bf16.mxu0 %v6535_v13  ;;  %v6598_v12 = vld [vmem:[%s9144_s10 + $0x18c] ss:$16 sps:$4 sm:$0xff]   ;;  %v6596_v13 = vld [vmem:[%s9144_s10 + $0x188] ss:$16 sps:$4 sm:$0xff]  }
 0x2ab   :  { %3548 = vmatpush1.bf16.msra.mxu0 %v6533_v16  ;;  %v6604_v16 = vld [vmem:[%s9144_s10 + $0x1ac] ss:$16 sps:$4 sm:$0xff]  }
 0x2ac   :  { %3549 = vmatprep.subr.bf16.mxu0 %v6541_v18  ;;  %v6602_v18 = vld [vmem:[%s9144_s10 + $0x1a8] ss:$16 sps:$4 sm:$0xff]  }
 0x2af   :  { %3550 = vmatpush1.bf16.msra.mxu0 %v6539_v21  ;;  %v6607_v21 = vld [vmem:[%s9144_s10 + $0x1c4] ss:$16 sps:$4 sm:$0xff]  }
 0x2b0   :  { %3551 = vmatprep.subr.bf16.mxu0 %v6547_v22  ;;  %v6610_v22 = vld [vmem:[%s9144_s10 + $0x1cc] ss:$16 sps:$4 sm:$0xff]  }
 0x2b3   :  { %3552 = vmatpush1.bf16.msra.mxu0 %v6545_v19  ;;  %v6605_v19 = vld [vmem:[%s9144_s10 + $0x1c0] ss:$16 sps:$4 sm:$0xff]  }
 0x2b4   :  { %3553 = vmatprep.subr.bf16.mxu0 %v6553_v24  ;;  %v6608_v24 = vld [vmem:[%s9144_s10 + $0x1c8] ss:$16 sps:$4 sm:$0xff]  }
 0x2b7   :  { %3554 = vmatpush1.bf16.msra.mxu0 %v6551_v25  ;;  %v6613_v25 = vld [vmem:[%s9144_s10 + $0x1e4] ss:$16 sps:$4 sm:$0xff]  }
 0x2b8   :  { %3555 = vmatprep.subr.bf16.mxu0 %v6559_v26  ;;  %v6616_v26 = vld [vmem:[%s9144_s10 + $0x1ec] ss:$16 sps:$4 sm:$0xff]  }
 0x2bb   :  { %3556 = vmatpush1.bf16.msra.mxu0 %v6557_v28  ;;  %v6611_v28 = vld [vmem:[%s9144_s10 + $0x1e0] ss:$16 sps:$4 sm:$0xff]  }
 0x2bc   :  { %3557 = vmatprep.subr.bf16.mxu0 %v6565_v29  ;;  %v6614_v29 = vld [vmem:[%s9144_s10 + $0x1e8] ss:$16 sps:$4 sm:$0xff]  }
 0x2bf   :  { %3558 = vmatpush1.bf16.msra.mxu0 %v6563_v30  ;;  %v6619_v30 = vld [vmem:[%s9144_s10 + $0x204] ss:$16 sps:$4 sm:$0xff]  }
 0x2c0   :  { %3559 = vmatprep.subr.bf16.mxu0 %v6571_v20  ;;  %v6622_v20 = vld [vmem:[%s9144_s10 + $0x20c] ss:$16 sps:$4 sm:$0xff]  }
 0x2c3   :  { %3560 = vmatpush1.bf16.msra.mxu0 %v6569_v31  ;;  %v8387_v31 = vld [vmem:[%s9143_s9] sm:$0xf] }
 0x2c4   :  { %3561 = vmatprep.subr.bf16.mxu0 %v6577_v32  ;;  %v2765_v32 = vrot.slane %v8387_v31, %v7926_v49 }
 0x2c7   :  { %3562 = vmatpush1.bf16.msra.mxu0 %v6575_v33  ;;  %v2769_v33 = vrot.slane %v8387_v31, %v7934_v51 }
 0x2c8   :  { %3563 = vmatprep.subr.bf16.mxu0 %v6583_v17 }
 0x2cb   :  { %3564 = vmatpush1.bf16.msra.mxu0 %v6581_v35 }
 0x2cc   :  { %3565 = vmatprep.subr.bf16.mxu0 %v6589_v36 }
 0x2cf   :  { %3566 = vmatpush1.bf16.msra.mxu0 %v6587_v37 }
 0x2d0   :  { %3567 = vmatprep.subr.bf16.mxu0 %v6595_v38 }
 0x2d3   :  { %3568 = vmatpush1.bf16.msra.mxu0 %v6593_v39 }
 0x2d4   :  { %3569 = vmatprep.subr.bf16.mxu0 %v6601_v40 }
 0x2d7   :  { %3570 = vmatpush1.bf16.msra.mxu0 %v6599_v41 }
 0x2d8   :  { %3571 = vmatprep.subr.bf16.mxu0 %v6607_v21  ;;  %v2773_v21 = vrot.slane %v8387_v31, %v8014_v34 }
 0x2db   :  { %3572 = vmatpush1.bf16.msra.mxu0 %v6605_v19  ;;  %v6664_v19 = vld [vmem:[%s9144_s10 + $0x2ec] ss:$16 sps:$4 sm:$0xff]  }
 0x2dc   :  { %3573 = vmatprep.subr.bf16.mxu0 %v6613_v25  ;;  %v6662_v25 = vld [vmem:[%s9144_s10 + $0x2e8] ss:$16 sps:$4 sm:$0xff]  }
 0x2df   :  { %3574 = vmatpush1.bf16.msra.mxu0 %v6611_v28  ;;  %v6667_v28 = vld [vmem:[%s9144_s10 + $0x304] ss:$16 sps:$4 sm:$0xff]  }
 0x2e0   :  { %3584 = vmatprep.subr.bf16.mxu0 %v6619_v30  ;;  %v6665_v30 = vld [vmem:[%s9144_s10 + $0x300] ss:$16 sps:$4 sm:$0xff]  }
 0x374   :  { %v5938_v53 = vpop.f32.mrb[8].mxu0  ;;  %v2728_v23 = vpop.f32.mrb[12].mxu1 }
 0x375   :  { %v5939_v55 = vpop.f32.mrb[9].mxu0  ;;  %v2730_v56 = vpop.f32.mrb[13].mxu1 }
 0x376   :  { %v5940_v57 = vadd.f32 %v5939_v55, %v5938_v53  ;;  %v5941_v58 = vpop.f32.mrb[10].mxu0  ;;  %v2731_v59 = vpop.f32.mrb[14].mxu1  ;;  %v6524_v53 = vld [vmem:[%s9144_s10 + $0x8] ss:$16 sps:$4 sm:$0xff]   ;;  %v6538_v55 = vld [vmem:[%s9144_s10 + $0x4c] ss:$16 sps:$4 sm:$0xff]  }
 0x377   :  { %v5942_v60 = vpop.f32.mrb[11].mxu0  ;;  %v2732_v61 = vpop.f32.mrb[15].mxu1  ;;  %v6536_v56 = vld [vmem:[%s9144_s10 + $0x48] ss:$16 sps:$4 sm:$0xff]   ;;  %v6550_v59 = vld [vmem:[%s9144_s10 + $0x8c] ss:$16 sps:$4 sm:$0xff]  }
 0x378   :  { %v2689_v62 = vadd.f32 %v5940_v57, %v5599_v54  ;;  %v6530_v54 = vld [vmem:[%s9144_s10 + $0x28] ss:$16 sps:$4 sm:$0xff]   ;;  %v6544_v57 = vld [vmem:[%s9144_s10 + $0x6c] ss:$16 sps:$4 sm:$0xff]  }
 0x379   :  { %v6542_v58 = vld [vmem:[%s9144_s10 + $0x68] ss:$16 sps:$4 sm:$0xff]   ;;  %v6556_v61 = vld [vmem:[%s9144_s10 + $0xac] ss:$16 sps:$4 sm:$0xff]  }
 0x37a   :  { %v8165_v27 = vadd.f32 %v2728_v23, %v2689_v62  ;;  %v6532_v23 = vld [vmem:[%s9144_s10 + $0x2c] ss:$16 sps:$4 sm:$0xff]   ;;  %v6548_v60 = vld [vmem:[%s9144_s10 + $0x88] ss:$16 sps:$4 sm:$0xff]  }
 0x37b   :  { %v6554_v62 = vld [vmem:[%s9144_s10 + $0xa8] ss:$16 sps:$4 sm:$0xff]  }
 0x37c   :  { %v2734_v63 = vmul.f32 1.442695, %v8165_v27 }
 0x37e   :  { %6921 = vpow2.f32 %v2734_v63  ;;  %v6560_v63 = vld [vmem:[%s9144_s10 + $0xc8] ss:$16 sps:$4 sm:$0xff]  }
 0x388   :  { %v6922_v5 = vpop.eup %6921 }
 0x389   :  { %v2745_v7 = vmul.f32 %v6922_v5, %v2743_v1  ;;  %v2737_v8 = vsel %vm2736_vm2, %v8165_v27, %v6922_v5  ;;  %v6572_v1 = vld [vmem:[%s9144_s10 + $0x108] ss:$16 sps:$4 sm:$0xff]   ;;  %v6580_v5 = vld [vmem:[%s9144_s10 + $0x12c] ss:$16 sps:$4 sm:$0xff]  }
 0x38a   :  { %2739 = vst.msk [vmem:[#allocation2] sm:$0x3] %vm2738_vm3, %v2737_v8  ;;  %v6586_v8 = vld [vmem:[%s9144_s10 + $0x14c] ss:$16 sps:$4 sm:$0xff]  }
 0x38b   :  { %2747 = vrot.lane.b32.xlu0 %v2745_v7, %s6996_s26  ;;  %v6578_v7 = vld [vmem:[%s9144_s10 + $0x128] ss:$16 sps:$4 sm:$0xff]  }
 0x3fd   :  { %v2748_v42 = vpop.permute.xlu0 %2747 }
 0x3fe   :  { %v2750_v44 = vadd.f32 %v2748_v42, %v8165_v27  ;;  %v6562_v27 = vld [vmem:[%s9144_s10 + $0xcc] ss:$16 sps:$4 sm:$0xff]  }
 0x400   :  { %v2753_v46 = vpack.c.bf16 %v2750_v44, %v2750_v44  ;;  %2752 = vst.msk [vmem:[#allocation4] sm:$0x3] %vm2751_vm4, %v2750_v44  ;;  %v6620_v44 = vld [vmem:[%s9144_s10 + $0x208] ss:$16 sps:$4 sm:$0xff]  }
 0x402   :  { %5635 = vmatmul.mubr.msk.bf16.vlgmr.msra.gmra.mrb[16].mxu1 %vm2736_vm2, %v2753_v46 }
 0x403   :  { %2870 = vmatpush1.bf16.msra.mxu1 %v6516_v45  ;;  %2901 = vmatprep.mubr.bf16.mxu1 %v6993_v3  ;;  %v2777_v45 = vrot.slane %v8387_v31, %v7979_v14 }
 0x404   :  { %5636 = vmatprep.subr.msk.bf16.mxu1 %vm2815_vm1, %v5633_v47  ;;  %v6625_v47 = vld [vmem:[%s9144_s10 + $0x224] ss:$16 sps:$4 sm:$0xff]  }
 0x407   :  { %2872 = vmatpush1.bf16.msra.mxu1 %v2823_v50 }
 0x408   :  { %3625 = vmatprep.subr.bf16.mxu1 %v6526_v52 }
 0x40a   :  { %5637 = vmatmul.mubr.msk.bf16.vlgmr.msra.gmra.mrb[20].mxu1 %vm2736_vm2, %v2753_v46 }
 0x40b   :  { %3626 = vmatpush1.bf16.msra.mxu1 %v6524_v53 }
 0x40c   :  { %3627 = vmatprep.subr.bf16.mxu1 %v6532_v23 }
 0x40f   :  { %3628 = vmatpush1.bf16.msra.mxu1 %v6530_v54  ;;  %v6623_v54 = vld [vmem:[%s9144_s10 + $0x220] ss:$16 sps:$4 sm:$0xff]  }
 0x410   :  { %3629 = vmatprep.subr.bf16.mxu1 %v6538_v55  ;;  %v6626_v55 = vld [vmem:[%s9144_s10 + $0x228] ss:$16 sps:$4 sm:$0xff]  }
 0x413   :  { %3630 = vmatpush1.bf16.msra.mxu1 %v6536_v56 }
 0x414   :  { %3631 = vmatprep.subr.bf16.mxu1 %v6544_v57  ;;  %v6631_v57 = vld [vmem:[%s9144_s10 + $0x244] ss:$16 sps:$4 sm:$0xff]  }
 0x417   :  { %3632 = vmatpush1.bf16.msra.mxu1 %v6542_v58  ;;  %v6634_v58 = vld [vmem:[%s9144_s10 + $0x24c] ss:$16 sps:$4 sm:$0xff]  }
 0x418   :  { %3633 = vmatprep.subr.bf16.mxu1 %v6550_v59 }
 0x41b   :  { %3634 = vmatpush1.bf16.msra.mxu1 %v6548_v60 }
 0x41c   :  { %3635 = vmatprep.subr.bf16.mxu1 %v6556_v61  ;;  %v6629_v61 = vld [vmem:[%s9144_s10 + $0x240] ss:$16 sps:$4 sm:$0xff]  }
 0x41f   :  { %3636 = vmatpush1.bf16.msra.mxu1 %v6554_v62  ;;  %v6632_v62 = vld [vmem:[%s9144_s10 + $0x248] ss:$16 sps:$4 sm:$0xff]  }
 0x420   :  { %3637 = vmatprep.subr.bf16.mxu1 %v6562_v27  ;;  %v6637_v27 = vld [vmem:[%s9144_s10 + $0x264] ss:$16 sps:$4 sm:$0xff]  }
 0x423   :  { %3638 = vmatpush1.bf16.msra.mxu1 %v6560_v63  ;;  %v6640_v63 = vld [vmem:[%s9144_s10 + $0x26c] ss:$16 sps:$4 sm:$0xff]  }
 0x424   :  { %3639 = vmatprep.subr.bf16.mxu1 %v6568_v0  ;;  %v6635_v0 = vld [vmem:[%s9144_s10 + $0x260] ss:$16 sps:$4 sm:$0xff]  }
 0x427   :  { %3640 = vmatpush1.bf16.msra.mxu1 %v6566_v2  ;;  %v6638_v2 = vld [vmem:[%s9144_s10 + $0x268] ss:$16 sps:$4 sm:$0xff]  }
 0x428   :  { %3641 = vmatprep.subr.bf16.mxu1 %v6574_v4  ;;  %v6643_v4 = vld [vmem:[%s9144_s10 + $0x284] ss:$16 sps:$4 sm:$0xff]  }
 0x42b   :  { %3642 = vmatpush1.bf16.msra.mxu1 %v6572_v1  ;;  %v6646_v1 = vld [vmem:[%s9144_s10 + $0x28c] ss:$16 sps:$4 sm:$0xff]  }
 0x42c   :  { %3643 = vmatprep.subr.bf16.mxu1 %v6580_v5  ;;  %v6641_v5 = vld [vmem:[%s9144_s10 + $0x280] ss:$16 sps:$4 sm:$0xff]  }
 0x42f   :  { %3644 = vmatpush1.bf16.msra.mxu1 %v6578_v7  ;;  %v6644_v7 = vld [vmem:[%s9144_s10 + $0x288] ss:$16 sps:$4 sm:$0xff]  }
 0x430   :  { %3645 = vmatprep.subr.bf16.mxu1 %v6586_v8  ;;  %v6649_v8 = vld [vmem:[%s9144_s10 + $0x2a4] ss:$16 sps:$4 sm:$0xff]  }
 0x433   :  { %3646 = vmatpush1.bf16.msra.mxu1 %v6584_v9  ;;  %v6652_v9 = vld [vmem:[%s9144_s10 + $0x2ac] ss:$16 sps:$4 sm:$0xff]  }
 0x434   :  { %3647 = vmatprep.subr.bf16.mxu1 %v6592_v10  ;;  %v6647_v10 = vld [vmem:[%s9144_s10 + $0x2a0] ss:$16 sps:$4 sm:$0xff]  }
 0x437   :  { %3648 = vmatpush1.bf16.msra.mxu1 %v6590_v11  ;;  %v6650_v11 = vld [vmem:[%s9144_s10 + $0x2a8] ss:$16 sps:$4 sm:$0xff]  }
 0x438   :  { %3649 = vmatprep.subr.bf16.mxu1 %v6598_v12  ;;  %v6655_v12 = vld [vmem:[%s9144_s10 + $0x2c4] ss:$16 sps:$4 sm:$0xff]  }
 0x43b   :  { %3650 = vmatpush1.bf16.msra.mxu1 %v6596_v13  ;;  %v6658_v13 = vld [vmem:[%s9144_s10 + $0x2cc] ss:$16 sps:$4 sm:$0xff]  }
 0x43c   :  { %3651 = vmatprep.subr.bf16.mxu1 %v6604_v16  ;;  %v6653_v16 = vld [vmem:[%s9144_s10 + $0x2c0] ss:$16 sps:$4 sm:$0xff]  }
 0x43f   :  { %3652 = vmatpush1.bf16.msra.mxu1 %v6602_v18  ;;  %v6656_v18 = vld [vmem:[%s9144_s10 + $0x2c8] ss:$16 sps:$4 sm:$0xff]  }
 0x440   :  { %3653 = vmatprep.subr.bf16.mxu1 %v6610_v22  ;;  %v6661_v22 = vld [vmem:[%s9144_s10 + $0x2e4] ss:$16 sps:$4 sm:$0xff]  }
 0x443   :  { %3654 = vmatpush1.bf16.msra.mxu1 %v6608_v24  ;;  %v6659_v24 = vld [vmem:[%s9144_s10 + $0x2e0] ss:$16 sps:$4 sm:$0xff]  }
 0x444   :  { %3655 = vmatprep.subr.bf16.mxu1 %v6616_v26 }
 0x447   :  { %3656 = vmatpush1.bf16.msra.mxu1 %v6614_v29  ;;  %v6670_v29 = vld [vmem:[%s9144_s10 + $0x30c] ss:$16 sps:$4 sm:$0xff]  }
 0x448   :  { %3666 = vmatprep.subr.bf16.mxu1 %v6622_v20  ;;  %v6668_v20 = vld [vmem:[%s9144_s10 + $0x308] ss:$16 sps:$4 sm:$0xff]  }
 0x4d5   :  { %v2862_v17 = vpop.f32.mrb[16].mxu1 }
 0x4d6   :  { %v2863_v35 = vadd.f32 %v2862_v17, %v2765_v32  ;;  %v2864_v36 = vpop.f32.mrb[17].mxu1  ;;  %v6673_v32 = vld [vmem:[%s9146_s12 + $0x4] ss:$28 sps:$4 sm:$0xff]  }
 0x4d7   :  { %v2865_v37 = vadd.f32 %v2864_v36, %v2769_v33  ;;  %v2866_v38 = vpop.f32.mrb[18].mxu1  ;;  %v6676_v33 = vld [vmem:[%s9146_s12 + $0xc] ss:$28 sps:$4 sm:$0xff]   ;;  %v6671_v17 = vld [vmem:[%s9146_s12] ss:$28 sps:$4 sm:$0xff]  }
 0x4d8   :  { %v2910_v39 = vmax.f32 %v2863_v35, 0.0  ;;  %v2867_v40 = vpop.f32.mrb[19].mxu1  ;;  %v6674_v35 = vld [vmem:[%s9146_s12 + $0x8] ss:$28 sps:$4 sm:$0xff]  }
 0x4d9   :  { %v2911_v41 = vmax.f32 %v2865_v37, 0.0  ;;  %v6679_v37 = vld [vmem:[%s9146_s12 + $0x3c] ss:$28 sps:$4 sm:$0xff]   ;;  %v6682_v38 = vld [vmem:[%s9146_s12 + $0x44] ss:$28 sps:$4 sm:$0xff]  }
 0x4da   :  { %v2914_v46 = vpack.c.bf16 %v2910_v39, %v2910_v39  ;;  %v6677_v39 = vld [vmem:[%s9146_s12 + $0x38] ss:$28 sps:$4 sm:$0xff]   ;;  %v6680_v40 = vld [vmem:[%s9146_s12 + $0x40] ss:$28 sps:$4 sm:$0xff]  }
 0x4db   :  { %v2915_v42 = vpack.c.bf16 %v2911_v41, %v2911_v41  ;;  %v6685_v41 = vld [vmem:[%s9146_s12 + $0x74] ss:$28 sps:$4 sm:$0xff]  }
 0x4dd   :  { %v8407_v50 = vpop.f32.mrb[20].mxu1  ;;  %3575 = vmatprep.mubr.bf16.mxu0 %v2915_v42  ;;  %3657 = vmatprep.mubr.bf16.mxu1 %v2915_v42  ;;  %v6688_v42 = vld [vmem:[%s9146_s12 + $0x7c] ss:$28 sps:$4 sm:$0xff]  }
 0x4de   :  { %v2905_v52 = vpop.f32.mrb[21].mxu1  ;;  %3576 = vmatmul.mubr.bf16.vlgmr.msra.gmra.mrb[12].mxu0 %v2914_v46  ;;  %3658 = vmatmul.mubr.bf16.vlgmr.msra.gmra.mrb[24].mxu1 %v2914_v46  ;;  %v2904_v26 = vadd.f32 %v8407_v50, %v2773_v21  ;;  %v6694_v46 = vld [vmem:[%s9146_s12 + $0xb4] ss:$28 sps:$4 sm:$0xff]   ;;  %v6697_v50 = vld [vmem:[%s9146_s12 + $0xe4] ss:$28 sps:$4 sm:$0xff]  }
 0x4df   :  { %v2906_v53 = vadd.f32 %v2905_v52, %v2777_v45  ;;  %3585 = vmatpush1.bf16.msra.mxu0 %v6617_v43  ;;  %3667 = vmatpush1.bf16.msra.mxu1 %v6620_v44  ;;  %v2907_v23 = vpop.f32.mrb[22].mxu1  ;;  %v6683_v43 = vld [vmem:[%s9146_s12 + $0x70] ss:$28 sps:$4 sm:$0xff]   ;;  %v6686_v44 = vld [vmem:[%s9146_s12 + $0x78] ss:$28 sps:$4 sm:$0xff]  }
 0x4e0   :  { %v2908_v56 = vpop.f32.mrb[23].mxu1  ;;  %3586 = vmatprep.subr.bf16.mxu0 %v6625_v47  ;;  %3668 = vmatprep.subr.bf16.mxu1 %v6628_v48  ;;  %v2912_v31 = vmax.f32 %v2904_v26, 0.0  ;;  %v6691_v45 = vld [vmem:[%s9146_s12 + $0xac] ss:$28 sps:$4 sm:$0xff]   ;;  %v6742_v21 = vld [vmem:[%s9146_s12 + $0x274] ss:$28 sps:$4 sm:$0xff]  }
 0x4e1   :  { %v2913_v59 = vmax.f32 %v2906_v53, 0.0  ;;  %v6689_v47 = vld [vmem:[%s9146_s12 + $0xa8] ss:$28 sps:$4 sm:$0xff]   ;;  %v6692_v48 = vld [vmem:[%s9146_s12 + $0xb0] ss:$28 sps:$4 sm:$0xff]  }
 0x4e2   :  { %v2916_v36 = vpack.c.bf16 %v2912_v31, %v2912_v31  ;;  %v6700_v52 = vld [vmem:[%s9146_s12 + $0xec] ss:$28 sps:$4 sm:$0xff]   ;;  %v6695_v53 = vld [vmem:[%s9146_s12 + $0xe0] ss:$28 sps:$4 sm:$0xff]   ;;  %v6701_v56 = vld [vmem:[%s9146_s12 + $0x118] ss:$28 sps:$4 sm:$0xff]  }
 0x4e3   :  { %v2917_v60 = vpack.c.bf16 %v2913_v59, %v2913_v59  ;;  %3587 = vmatpush1.bf16.msra.mxu0 %v6623_v54  ;;  %3669 = vmatpush1.bf16.msra.mxu1 %v6626_v55  ;;  %v6698_v23 = vld [vmem:[%s9146_s12 + $0xe8] ss:$28 sps:$4 sm:$0xff]   ;;  %v6703_v54 = vld [vmem:[%s9146_s12 + $0x11c] ss:$28 sps:$4 sm:$0xff]  }
 0x4e4   :  { %3588 = vmatprep.subr.bf16.mxu0 %v6631_v57  ;;  %3670 = vmatprep.subr.bf16.mxu1 %v6634_v58  ;;  %v6706_v55 = vld [vmem:[%s9146_s12 + $0x124] ss:$28 sps:$4 sm:$0xff]   ;;  %v6709_v58 = vld [vmem:[%s9146_s12 + $0x154] ss:$28 sps:$4 sm:$0xff]   ;;  %v6712_v59 = vld [vmem:[%s9146_s12 + $0x15c] ss:$28 sps:$4 sm:$0xff]  }
 0x4e5   :  { %5738 = vmatprep.mubr.msk.bf16.mxu0 %vm1307_vm0, %v2917_v60  ;;  %5739 = vmatprep.mubr.msk.bf16.mxu1 %vm1307_vm0, %v2917_v60  ;;  %v6704_v57 = vld [vmem:[%s9146_s12 + $0x120] ss:$28 sps:$4 sm:$0xff]   ;;  %v6707_v60 = vld [vmem:[%s9146_s12 + $0x150] ss:$28 sps:$4 sm:$0xff]  }
 0x4e6   :  { %v6743_v26 = vld [vmem:[%s9146_s12 + $0x2a0] ss:$28 sps:$4 sm:$0xff]  }
 0x4e7   :  { %3589 = vmatpush1.bf16.msra.mxu0 %v6629_v61  ;;  %3671 = vmatpush1.bf16.msra.mxu1 %v6632_v62  ;;  %v6710_v61 = vld [vmem:[%s9146_s12 + $0x158] ss:$28 sps:$4 sm:$0xff]   ;;  %v6715_v62 = vld [vmem:[%s9146_s12 + $0x18c] ss:$28 sps:$4 sm:$0xff]   ;;  %v6752_v31 = vld [vmem:[%s9146_s12 + $0x2e0] ss:$28 sps:$4 sm:$0xff]  }
 0x4e8   :  { %3590 = vmatprep.subr.bf16.mxu0 %v6637_v27  ;;  %3672 = vmatprep.subr.bf16.mxu1 %v6640_v63  ;;  %v6718_v27 = vld [vmem:[%s9146_s12 + $0x194] ss:$28 sps:$4 sm:$0xff]   ;;  %v6713_v63 = vld [vmem:[%s9146_s12 + $0x188] ss:$28 sps:$4 sm:$0xff]  }
 0x4eb   :  { %3591 = vmatpush1.bf16.msra.mxu0 %v6635_v0  ;;  %3673 = vmatpush1.bf16.msra.mxu1 %v6638_v2  ;;  %v6716_v0 = vld [vmem:[%s9146_s12 + $0x190] ss:$28 sps:$4 sm:$0xff]   ;;  %v6721_v2 = vld [vmem:[%s9146_s12 + $0x1c4] ss:$28 sps:$4 sm:$0xff]  }
 0x4ec   :  { %3592 = vmatprep.subr.bf16.mxu0 %v6643_v4  ;;  %3674 = vmatprep.subr.bf16.mxu1 %v6646_v1  ;;  %v6724_v4 = vld [vmem:[%s9146_s12 + $0x1cc] ss:$28 sps:$4 sm:$0xff]   ;;  %v6719_v1 = vld [vmem:[%s9146_s12 + $0x1c0] ss:$28 sps:$4 sm:$0xff]  }
 0x4ef   :  { %3593 = vmatpush1.bf16.msra.mxu0 %v6641_v5  ;;  %3675 = vmatpush1.bf16.msra.mxu1 %v6644_v7  ;;  %v6722_v5 = vld [vmem:[%s9146_s12 + $0x1c8] ss:$28 sps:$4 sm:$0xff]   ;;  %v6727_v7 = vld [vmem:[%s9146_s12 + $0x1fc] ss:$28 sps:$4 sm:$0xff]  }
 0x4f0   :  { %3594 = vmatprep.subr.bf16.mxu0 %v6649_v8  ;;  %3676 = vmatprep.subr.bf16.mxu1 %v6652_v9  ;;  %v6730_v8 = vld [vmem:[%s9146_s12 + $0x204] ss:$28 sps:$4 sm:$0xff]   ;;  %v6725_v9 = vld [vmem:[%s9146_s12 + $0x1f8] ss:$28 sps:$4 sm:$0xff]  }
 0x4f3   :  { %3595 = vmatpush1.bf16.msra.mxu0 %v6647_v10  ;;  %3677 = vmatpush1.bf16.msra.mxu1 %v6650_v11  ;;  %v6728_v10 = vld [vmem:[%s9146_s12 + $0x200] ss:$28 sps:$4 sm:$0xff]   ;;  %v6733_v11 = vld [vmem:[%s9146_s12 + $0x234] ss:$28 sps:$4 sm:$0xff]  }
 0x4f4   :  { %3596 = vmatprep.subr.bf16.mxu0 %v6655_v12  ;;  %3678 = vmatprep.subr.bf16.mxu1 %v6658_v13  ;;  %v6736_v12 = vld [vmem:[%s9146_s12 + $0x23c] ss:$28 sps:$4 sm:$0xff]   ;;  %v6731_v13 = vld [vmem:[%s9146_s12 + $0x230] ss:$28 sps:$4 sm:$0xff]  }
 0x4f7   :  { %3597 = vmatpush1.bf16.msra.mxu0 %v6653_v16  ;;  %3679 = vmatpush1.bf16.msra.mxu1 %v6656_v18  ;;  %v6734_v16 = vld [vmem:[%s9146_s12 + $0x238] ss:$28 sps:$4 sm:$0xff]   ;;  %v6739_v18 = vld [vmem:[%s9146_s12 + $0x26c] ss:$28 sps:$4 sm:$0xff]  }
 0x4f8   :  { %3598 = vmatprep.subr.bf16.mxu0 %v6661_v22  ;;  %3680 = vmatprep.subr.bf16.mxu1 %v6664_v19  ;;  %v6737_v22 = vld [vmem:[%s9146_s12 + $0x268] ss:$28 sps:$4 sm:$0xff]   ;;  %v6740_v19 = vld [vmem:[%s9146_s12 + $0x270] ss:$28 sps:$4 sm:$0xff]  }
 0x4fb   :  { %3599 = vmatpush1.bf16.msra.mxu0 %v6659_v24  ;;  %3681 = vmatpush1.bf16.msra.mxu1 %v6662_v25  ;;  %v6745_v24 = vld [vmem:[%s9146_s12 + $0x2a4] ss:$28 sps:$4 sm:$0xff]   ;;  %v6748_v25 = vld [vmem:[%s9146_s12 + $0x2ac] ss:$28 sps:$4 sm:$0xff]  }
 0x4fc   :  { %3600 = vmatprep.subr.bf16.mxu0 %v6667_v28  ;;  %3682 = vmatprep.subr.bf16.mxu1 %v6670_v29  ;;  %v6746_v28 = vld [vmem:[%s9146_s12 + $0x2a8] ss:$28 sps:$4 sm:$0xff]   ;;  %v6751_v29 = vld [vmem:[%s9146_s12 + $0x2dc] ss:$28 sps:$4 sm:$0xff]  }
 0x4ff   :  { %3601 = vmatpush1.bf16.msra.mxu0 %v6665_v30  ;;  %3683 = vmatpush1.bf16.msra.mxu1 %v6668_v20  ;;  %v6754_v30 = vld [vmem:[%s9146_s12 + $0x2e4] ss:$28 sps:$4 sm:$0xff]   ;;  %v6749_v20 = vld [vmem:[%s9146_s12 + $0x2d8] ss:$28 sps:$4 sm:$0xff]  }
 0x500   :  { %4855 = vmatprep.subr.bf16.mxu0 %v6673_v32  ;;  %4937 = vmatprep.subr.bf16.mxu1 %v6676_v33  ;;  %v6757_v32 = vld [vmem:[%s9146_s12 + $0x314] ss:$28 sps:$4 sm:$0xff]   ;;  %v6760_v33 = vld [vmem:[%s9146_s12 + $0x31c] ss:$28 sps:$4 sm:$0xff]  }
 0x502   :  { %3617 = vmatmul.mubr.bf16.vlgmr.msra.gmra.mrb[12].mxu0 %v2916_v36  ;;  %3699 = vmatmul.mubr.bf16.vlgmr.msra.gmra.mrb[24].mxu1 %v2916_v36  ;;  %v6763_v36 = vld [vmem:[%s9146_s12 + $0x34c] ss:$28 sps:$4 sm:$0xff]  }
 0x503   :  { %4856 = vmatpush1.bf16.msra.mxu0 %v6671_v17  ;;  %4938 = vmatpush1.bf16.msra.mxu1 %v6674_v35  ;;  %v6755_v17 = vld [vmem:[%s9146_s12 + $0x310] ss:$28 sps:$4 sm:$0xff]   ;;  %v6758_v35 = vld [vmem:[%s9146_s12 + $0x318] ss:$28 sps:$4 sm:$0xff]  }
 0x504   :  { %4857 = vmatprep.subr.bf16.mxu0 %v6679_v37  ;;  %4939 = vmatprep.subr.bf16.mxu1 %v6682_v38  ;;  %v6766_v37 = vld [vmem:[%s9146_s12 + $0x354] ss:$28 sps:$4 sm:$0xff]   ;;  %v6761_v38 = vld [vmem:[%s9146_s12 + $0x348] ss:$28 sps:$4 sm:$0xff]  }
 0x507   :  { %4858 = vmatpush1.bf16.msra.mxu0 %v6677_v39  ;;  %4940 = vmatpush1.bf16.msra.mxu1 %v6680_v40  ;;  %v6764_v39 = vld [vmem:[%s9146_s12 + $0x350] ss:$28 sps:$4 sm:$0xff]   ;;  %v6769_v40 = vld [vmem:[%s9146_s12 + $0x384] ss:$28 sps:$4 sm:$0xff]  }
 0x508   :  { %4859 = vmatprep.subr.bf16.mxu0 %v6685_v41  ;;  %4941 = vmatprep.subr.bf16.mxu1 %v6688_v42  ;;  %v6772_v41 = vld [vmem:[%s9146_s12 + $0x38c] ss:$28 sps:$4 sm:$0xff]   ;;  %v8705_v42 = vld [vmem:[%s9145_s11] sm:$0xf] }
 0x50b   :  { %4860 = vmatpush1.bf16.msra.mxu0 %v6683_v43  ;;  %4942 = vmatpush1.bf16.msra.mxu1 %v6686_v44  ;;  %v3023_v43 = vrot.slane %v8705_v42, %v7926_v49  ;;  %v3027_v44 = vrot.slane %v8705_v42, %v7934_v51 }
 0x50c   :  { %4861 = vmatprep.subr.bf16.mxu0 %v6691_v45  ;;  %4943 = vmatprep.subr.bf16.mxu1 %v6694_v46  ;;  %v3035_v45 = vrot.slane %v8705_v42, %v7979_v14 }
 0x50f   :  { %4862 = vmatpush1.bf16.msra.mxu0 %v6689_v47  ;;  %4944 = vmatpush1.bf16.msra.mxu1 %v6692_v48 }
 0x510   :  { %4863 = vmatprep.subr.bf16.mxu0 %v6697_v50  ;;  %4945 = vmatprep.subr.bf16.mxu1 %v6700_v52 }
 0x513   :  { %4864 = vmatpush1.bf16.msra.mxu0 %v6695_v53  ;;  %4946 = vmatpush1.bf16.msra.mxu1 %v6698_v23 }
 0x514   :  { %4865 = vmatprep.subr.bf16.mxu0 %v6703_v54  ;;  %4947 = vmatprep.subr.bf16.mxu1 %v6706_v55 }
 0x517   :  { %4866 = vmatpush1.bf16.msra.mxu0 %v6701_v56  ;;  %4948 = vmatpush1.bf16.msra.mxu1 %v6704_v57 }
 0x518   :  { %4867 = vmatprep.subr.bf16.mxu0 %v6709_v58  ;;  %4949 = vmatprep.subr.bf16.mxu1 %v6712_v59 }
 0x51b   :  { %4868 = vmatpush1.bf16.msra.mxu0 %v6707_v60  ;;  %4950 = vmatpush1.bf16.msra.mxu1 %v6710_v61 }
 0x51c   :  { %4869 = vmatprep.subr.bf16.mxu0 %v6715_v62  ;;  %4951 = vmatprep.subr.bf16.mxu1 %v6718_v27  ;;  %v6767_v62 = vld [vmem:[%s9146_s12 + $0x380] ss:$28 sps:$4 sm:$0xff]   ;;  %v6770_v27 = vld [vmem:[%s9146_s12 + $0x388] ss:$28 sps:$4 sm:$0xff]  }
 0x51f   :  { %4870 = vmatpush1.bf16.msra.mxu0 %v6713_v63  ;;  %4952 = vmatpush1.bf16.msra.mxu1 %v6716_v0  ;;  %v6775_v0 = vld [vmem:[%s9146_s12 + $0x3bc] ss:$28 sps:$4 sm:$0xff]  }
 0x520   :  { %4871 = vmatprep.subr.bf16.mxu0 %v6721_v2  ;;  %4953 = vmatprep.subr.bf16.mxu1 %v6724_v4  ;;  %v6778_v2 = vld [vmem:[%s9146_s12 + $0x3c4] ss:$28 sps:$4 sm:$0xff]  }
 0x523   :  { %4872 = vmatpush1.bf16.msra.mxu0 %v6719_v1  ;;  %4954 = vmatpush1.bf16.msra.mxu1 %v6722_v5  ;;  %v6773_v1 = vld [vmem:[%s9146_s12 + $0x3b8] ss:$28 sps:$4 sm:$0xff]   ;;  %v6776_v5 = vld [vmem:[%s9146_s12 + $0x3c0] ss:$28 sps:$4 sm:$0xff]  }
 0x524   :  { %4873 = vmatprep.subr.bf16.mxu0 %v6727_v7  ;;  %4955 = vmatprep.subr.bf16.mxu1 %v6730_v8  ;;  %v6781_v7 = vld [vmem:[%s9146_s12 + $0x3f4] ss:$28 sps:$4 sm:$0xff]   ;;  %v6784_v8 = vld [vmem:[%s9146_s12 + $0x3fc] ss:$28 sps:$4 sm:$0xff]  }
 0x527   :  { %4874 = vmatpush1.bf16.msra.mxu0 %v6725_v9  ;;  %4956 = vmatpush1.bf16.msra.mxu1 %v6728_v10  ;;  %v6779_v9 = vld [vmem:[%s9146_s12 + $0x3f0] ss:$28 sps:$4 sm:$0xff]   ;;  %v6782_v10 = vld [vmem:[%s9146_s12 + $0x3f8] ss:$28 sps:$4 sm:$0xff]  }
 0x528   :  { %4875 = vmatprep.subr.bf16.mxu0 %v6733_v11  ;;  %4957 = vmatprep.subr.bf16.mxu1 %v6736_v12  ;;  %v6787_v11 = vld [vmem:[%s9146_s12 + $0x42c] ss:$28 sps:$4 sm:$0xff]   ;;  %v6790_v12 = vld [vmem:[%s9146_s12 + $0x434] ss:$28 sps:$4 sm:$0xff]  }
 0x52b   :  { %4876 = vmatpush1.bf16.msra.mxu0 %v6731_v13  ;;  %4958 = vmatpush1.bf16.msra.mxu1 %v6734_v16  ;;  %v6785_v13 = vld [vmem:[%s9146_s12 + $0x428] ss:$28 sps:$4 sm:$0xff]   ;;  %v6788_v16 = vld [vmem:[%s9146_s12 + $0x430] ss:$28 sps:$4 sm:$0xff]  }
 0x52c   :  { %4877 = vmatprep.subr.bf16.mxu0 %v6739_v18  ;;  %4959 = vmatprep.subr.bf16.mxu1 %v6742_v21  ;;  %v6793_v18 = vld [vmem:[%s9146_s12 + $0x464] ss:$28 sps:$4 sm:$0xff]   ;;  %v6796_v21 = vld [vmem:[%s9146_s12 + $0x46c] ss:$28 sps:$4 sm:$0xff]  }
 0x52f   :  { %4878 = vmatpush1.bf16.msra.mxu0 %v6737_v22  ;;  %4960 = vmatpush1.bf16.msra.mxu1 %v6740_v19  ;;  %v6791_v22 = vld [vmem:[%s9146_s12 + $0x460] ss:$28 sps:$4 sm:$0xff]   ;;  %v6794_v19 = vld [vmem:[%s9146_s12 + $0x468] ss:$28 sps:$4 sm:$0xff]  }
 0x530   :  { %4879 = vmatprep.subr.bf16.mxu0 %v6745_v24  ;;  %4961 = vmatprep.subr.bf16.mxu1 %v6748_v25  ;;  %v6799_v24 = vld [vmem:[%s9146_s12 + $0x49c] ss:$28 sps:$4 sm:$0xff]   ;;  %v6802_v25 = vld [vmem:[%s9146_s12 + $0x4a4] ss:$28 sps:$4 sm:$0xff]  }
 0x533   :  { %4880 = vmatpush1.bf16.msra.mxu0 %v6743_v26  ;;  %4962 = vmatpush1.bf16.msra.mxu1 %v6746_v28  ;;  %v6797_v26 = vld [vmem:[%s9146_s12 + $0x498] ss:$28 sps:$4 sm:$0xff]   ;;  %v6800_v28 = vld [vmem:[%s9146_s12 + $0x4a0] ss:$28 sps:$4 sm:$0xff]  }
 0x534   :  { %4881 = vmatprep.subr.bf16.mxu0 %v6751_v29  ;;  %4963 = vmatprep.subr.bf16.mxu1 %v6754_v30  ;;  %v6805_v29 = vld [vmem:[%s9146_s12 + $0x4d4] ss:$28 sps:$4 sm:$0xff]   ;;  %v6808_v30 = vld [vmem:[%s9146_s12 + $0x4dc] ss:$28 sps:$4 sm:$0xff]  }
 0x537   :  { %4882 = vmatpush1.bf16.msra.mxu0 %v6749_v20  ;;  %4964 = vmatpush1.bf16.msra.mxu1 %v6752_v31  ;;  %v6803_v20 = vld [vmem:[%s9146_s12 + $0x4d0] ss:$28 sps:$4 sm:$0xff]   ;;  %v6806_v31 = vld [vmem:[%s9146_s12 + $0x4d8] ss:$28 sps:$4 sm:$0xff]  }
 0x538   :  { %4883 = vmatprep.subr.bf16.mxu0 %v6757_v32  ;;  %4965 = vmatprep.subr.bf16.mxu1 %v6760_v33  ;;  %v3031_v32 = vrot.slane %v8705_v42, %v8014_v34  ;;  %v6811_v33 = vld [vmem:[%s9146_s12 + $0x50c] ss:$28 sps:$4 sm:$0xff]  }
 0x53b   :  { %4884 = vmatpush1.bf16.msra.mxu0 %v6755_v17  ;;  %4966 = vmatpush1.bf16.msra.mxu1 %v6758_v35  ;;  %v6814_v17 = vld [vmem:[%s9146_s12 + $0x514] ss:$28 sps:$4 sm:$0xff]   ;;  %v6809_v35 = vld [vmem:[%s9146_s12 + $0x508] ss:$28 sps:$4 sm:$0xff]  }
 0x53c   :  { %4885 = vmatprep.subr.bf16.mxu0 %v6763_v36  ;;  %4967 = vmatprep.subr.bf16.mxu1 %v6766_v37  ;;  %v6812_v36 = vld [vmem:[%s9146_s12 + $0x510] ss:$28 sps:$4 sm:$0xff]  }
 0x53f   :  { %4886 = vmatpush1.bf16.msra.mxu0 %v6761_v38  ;;  %4968 = vmatpush1.bf16.msra.mxu1 %v6764_v39  ;;  %v6817_v38 = vld [vmem:[%s9146_s12 + $0x544] ss:$28 sps:$4 sm:$0xff]   ;;  %v6820_v39 = vld [vmem:[%s9146_s12 + $0x54c] ss:$28 sps:$4 sm:$0xff]  }
 0x540   :  { %4896 = vmatprep.subr.bf16.mxu0 %v6769_v40  ;;  %4978 = vmatprep.subr.bf16.mxu1 %v6772_v41  ;;  %v6815_v40 = vld [vmem:[%s9146_s12 + $0x540] ss:$28 sps:$4 sm:$0xff]   ;;  %v6818_v41 = vld [vmem:[%s9146_s12 + $0x548] ss:$28 sps:$4 sm:$0xff]  }
 0x5d5   :  { %v3618_v46 = vpop.f32.mrb[12].mxu0  ;;  %v8713_v47 = vpop.f32.mrb[24].mxu1 }
 0x5d6   :  { %v5976_v48 = vadd.f32 %v3618_v46, %v3023_v43  ;;  %v3620_v50 = vpop.f32.mrb[13].mxu0  ;;  %v3702_v52 = vpop.f32.mrb[25].mxu1  ;;  %v5978_v37 = vadd.f32 %v8713_v47, %v3031_v32  ;;  %v6823_v43 = vld [vmem:[%s9146_s12 + $0x14] ss:$28 sps:$4 sm:$0xff]   ;;  %v6876_v32 = vld [vmem:[%s9146_s12 + $0x440] ss:$28 sps:$4 sm:$0xff]  }
 0x5d7   :  { %v5977_v53 = vadd.f32 %v3620_v50, %v3027_v44  ;;  %v5979_v23 = vadd.f32 %v3702_v52, %v3035_v45  ;;  %v3622_v54 = vpop.f32.mrb[14].mxu0  ;;  %v3704_v55 = vpop.f32.mrb[26].mxu1  ;;  %v6824_v44 = vld [vmem:[%s9146_s12 + $0x1d8] ss:$28 sps:$4 sm:$0xff]   ;;  %v6821_v45 = vld [vmem:[%s9146_s12 + $0x10] ss:$28 sps:$4 sm:$0xff]  }
 0x5d8   :  { %v3707_v56 = vmax.f32 %v5976_v48, 0.0  ;;  %v3623_v57 = vpop.f32.mrb[15].mxu0  ;;  %v3705_v58 = vpop.f32.mrb[27].mxu1  ;;  %v3709_v42 = vmax.f32 %v5978_v37, 0.0  ;;  %v6825_v47 = vld [vmem:[%s9146_s12 + $0x18] ss:$28 sps:$4 sm:$0xff]  }
 0x5d9   :  { %v3708_v59 = vmax.f32 %v5977_v53, 0.0  ;;  %v3710_v60 = vmax.f32 %v5979_v23, 0.0  ;;  %v6828_v48 = vld [vmem:[%s9146_s12 + $0x4c] ss:$28 sps:$4 sm:$0xff]   ;;  %v6833_v23 = vld [vmem:[%s9146_s12 + $0x84] ss:$28 sps:$4 sm:$0xff]  }
 0x5da   :  { %v8723_v63 = vpack.c.bf16 %v3707_v56, %v3707_v56  ;;  %v8843_v46 = vpack.c.bf16 %v3709_v42, %v3709_v42  ;;  %v6829_v50 = vld [vmem:[%s9146_s12 + $0x210] ss:$28 sps:$4 sm:$0xff]   ;;  %v6826_v52 = vld [vmem:[%s9146_s12 + $0x48] ss:$28 sps:$4 sm:$0xff]   ;;  %v6831_v55 = vld [vmem:[%s9146_s12 + $0x80] ss:$28 sps:$4 sm:$0xff]  }
 0x5db   :  { %v8715_v61 = vpack.c.bf16 %v3708_v59, %v3708_v59  ;;  %v8733_v4 = vpack.c.bf16 %v3710_v60, %v3710_v60  ;;  %v6830_v53 = vld [vmem:[%s9146_s12 + $0x50] ss:$28 sps:$4 sm:$0xff]   ;;  %v6834_v54 = vld [vmem:[%s9146_s12 + $0x248] ss:$28 sps:$4 sm:$0xff]   ;;  %v6838_v57 = vld [vmem:[%s9146_s12 + $0xbc] ss:$28 sps:$4 sm:$0xff]  }
 0x5dc   :  { %v6835_v56 = vld [vmem:[%s9146_s12 + $0x88] ss:$28 sps:$4 sm:$0xff]   ;;  %v6839_v58 = vld [vmem:[%s9146_s12 + $0x280] ss:$28 sps:$4 sm:$0xff]   ;;  %v6836_v59 = vld [vmem:[%s9146_s12 + $0xb8] ss:$28 sps:$4 sm:$0xff]  }
 0x5dd   :  { %4887 = vmatprep.mubr.bf16.mxu0 %v8715_v61  ;;  %4969 = vmatprep.mubr.bf16.mxu1 %v8715_v61  ;;  %v6840_v60 = vld [vmem:[%s9146_s12 + $0xc0] ss:$28 sps:$4 sm:$0xff]   ;;  %v6881_v37 = vld [vmem:[%s9146_s12 + $0x2e8] ss:$28 sps:$4 sm:$0xff]  }
 0x5de   :  { %4888 = vmatmul.mubr.bf16.vlgmr.msra.gmra.mrb[16].mxu0 %v8723_v63  ;;  %4970 = vmatmul.mubr.bf16.vlgmr.msra.gmra.mrb[28].mxu1 %v8723_v63  ;;  %v6891_v42 = vld [vmem:[%s9146_s12 + $0x35c] ss:$28 sps:$4 sm:$0xff]  }
 0x5df   :  { %4897 = vmatpush1.bf16.msra.mxu0 %v6767_v62  ;;  %4979 = vmatpush1.bf16.msra.mxu1 %v6770_v27  ;;  %v6844_v62 = vld [vmem:[%s9146_s12 + $0x2b8] ss:$28 sps:$4 sm:$0xff]   ;;  %v6841_v27 = vld [vmem:[%s9146_s12 + $0xf0] ss:$28 sps:$4 sm:$0xff]  }
 0x5e0   :  { %5915 = vmatprep.mubr.msk.bf16.mxu0 %vm1307_vm0, %v8733_v4  ;;  %5916 = vmatprep.mubr.msk.bf16.mxu1 %vm1307_vm0, %v8733_v4 }
 0x5e1   :  { %4898 = vmatprep.subr.bf16.mxu0 %v6775_v0  ;;  %4980 = vmatprep.subr.bf16.mxu1 %v6778_v2  ;;  %v6845_v0 = vld [vmem:[%s9146_s12 + $0xf8] ss:$28 sps:$4 sm:$0xff]   ;;  %v6848_v2 = vld [vmem:[%s9146_s12 + $0x12c] ss:$28 sps:$4 sm:$0xff]  }
 0x5e3   :  { %4899 = vmatpush1.bf16.msra.mxu0 %v6773_v1  ;;  %4981 = vmatpush1.bf16.msra.mxu1 %v6776_v5  ;;  %v6849_v1 = vld [vmem:[%s9146_s12 + $0x2f0] ss:$28 sps:$4 sm:$0xff]   ;;  %v6846_v5 = vld [vmem:[%s9146_s12 + $0x128] ss:$28 sps:$4 sm:$0xff]  }
 0x5e4   :  { %4900 = vmatprep.subr.bf16.mxu0 %v6781_v7  ;;  %4982 = vmatprep.subr.bf16.mxu1 %v6784_v8  ;;  %v6850_v7 = vld [vmem:[%s9146_s12 + $0x130] ss:$28 sps:$4 sm:$0xff]   ;;  %v6853_v8 = vld [vmem:[%s9146_s12 + $0x164] ss:$28 sps:$4 sm:$0xff]  }
 0x5e7   :  { %4901 = vmatpush1.bf16.msra.mxu0 %v6779_v9  ;;  %4983 = vmatpush1.bf16.msra.mxu1 %v6782_v10  ;;  %v6854_v9 = vld [vmem:[%s9146_s12 + $0x328] ss:$28 sps:$4 sm:$0xff]   ;;  %v6851_v10 = vld [vmem:[%s9146_s12 + $0x160] ss:$28 sps:$4 sm:$0xff]  }
 0x5e8   :  { %4902 = vmatprep.subr.bf16.mxu0 %v6787_v11  ;;  %4984 = vmatprep.subr.bf16.mxu1 %v6790_v12  ;;  %v6855_v11 = vld [vmem:[%s9146_s12 + $0x168] ss:$28 sps:$4 sm:$0xff]   ;;  %v6858_v12 = vld [vmem:[%s9146_s12 + $0x19c] ss:$28 sps:$4 sm:$0xff]  }
 0x5eb   :  { %4903 = vmatpush1.bf16.msra.mxu0 %v6785_v13  ;;  %4985 = vmatpush1.bf16.msra.mxu1 %v6788_v16  ;;  %v6859_v13 = vld [vmem:[%s9146_s12 + $0x360] ss:$28 sps:$4 sm:$0xff]   ;;  %v6856_v16 = vld [vmem:[%s9146_s12 + $0x198] ss:$28 sps:$4 sm:$0xff]  }
 0x5ec   :  { %4904 = vmatprep.subr.bf16.mxu0 %v6793_v18  ;;  %4986 = vmatprep.subr.bf16.mxu1 %v6796_v21  ;;  %v6860_v18 = vld [vmem:[%s9146_s12 + $0x1a0] ss:$28 sps:$4 sm:$0xff]   ;;  %v6863_v21 = vld [vmem:[%s9146_s12 + $0x1d4] ss:$28 sps:$4 sm:$0xff]  }
 0x5ef   :  { %4905 = vmatpush1.bf16.msra.mxu0 %v6791_v22  ;;  %4987 = vmatpush1.bf16.msra.mxu1 %v6794_v19  ;;  %v6861_v22 = vld [vmem:[%s9146_s12 + $0x1d0] ss:$28 sps:$4 sm:$0xff]   ;;  %v6864_v19 = vld [vmem:[%s9146_s12 + $0x398] ss:$28 sps:$4 sm:$0xff]  }
 0x5f0   :  { %4906 = vmatprep.subr.bf16.mxu0 %v6799_v24  ;;  %4988 = vmatprep.subr.bf16.mxu1 %v6802_v25  ;;  %v6867_v24 = vld [vmem:[%s9146_s12 + $0x20c] ss:$28 sps:$4 sm:$0xff]  }
 0x5f1   :  { %v6865_v25 = vld [vmem:[%s9146_s12 + $0x208] ss:$28 sps:$4 sm:$0xff]  }
 0x5f3   :  { %4907 = vmatpush1.bf16.msra.mxu0 %v6797_v26  ;;  %4989 = vmatpush1.bf16.msra.mxu1 %v6800_v28  ;;  %v6868_v26 = vld [vmem:[%s9146_s12 + $0x3d0] ss:$28 sps:$4 sm:$0xff]   ;;  %v6871_v28 = vld [vmem:[%s9146_s12 + $0x244] ss:$28 sps:$4 sm:$0xff]  }
 0x5f4   :  { %4908 = vmatprep.subr.bf16.mxu0 %v6805_v29  ;;  %4990 = vmatprep.subr.bf16.mxu1 %v6808_v30  ;;  %v6869_v29 = vld [vmem:[%s9146_s12 + $0x240] ss:$28 sps:$4 sm:$0xff]   ;;  %v6872_v30 = vld [vmem:[%s9146_s12 + $0x408] ss:$28 sps:$4 sm:$0xff]  }
 0x5f7   :  { %4909 = vmatpush1.bf16.msra.mxu0 %v6803_v20  ;;  %4991 = vmatpush1.bf16.msra.mxu1 %v6806_v31  ;;  %v6875_v20 = vld [vmem:[%s9146_s12 + $0x27c] ss:$28 sps:$4 sm:$0xff]  }
 0x5f8   :  { %4910 = vmatprep.subr.bf16.mxu0 %v6811_v33  ;;  %4992 = vmatprep.subr.bf16.mxu1 %v6814_v17  ;;  %v6873_v31 = vld [vmem:[%s9146_s12 + $0x278] ss:$28 sps:$4 sm:$0xff]   ;;  %v6877_v17 = vld [vmem:[%s9146_s12 + $0x2b0] ss:$28 sps:$4 sm:$0xff]  }
 0x5f9   :  { %v6879_v33 = vld [vmem:[%s9146_s12 + $0x2b4] ss:$28 sps:$4 sm:$0xff]  }
 0x5fb   :  { %4911 = vmatpush1.bf16.msra.mxu0 %v6809_v35  ;;  %4993 = vmatpush1.bf16.msra.mxu1 %v6812_v36  ;;  %v6880_v35 = vld [vmem:[%s9146_s12 + $0x478] ss:$28 sps:$4 sm:$0xff]   ;;  %v6883_v36 = vld [vmem:[%s9146_s12 + $0x2ec] ss:$28 sps:$4 sm:$0xff]  }
 0x5fc   :  { %4912 = vmatprep.subr.bf16.mxu0 %v6817_v38  ;;  %4994 = vmatprep.subr.bf16.mxu1 %v6820_v39  ;;  %v6884_v38 = vld [vmem:[%s9146_s12 + $0x4b0] ss:$28 sps:$4 sm:$0xff]   ;;  %v6887_v39 = vld [vmem:[%s9146_s12 + $0x324] ss:$28 sps:$4 sm:$0xff]  }
 0x5ff   :  { %4913 = vmatpush1.bf16.msra.mxu0 %v6815_v40  ;;  %4995 = vmatpush1.bf16.msra.mxu1 %v6818_v41  ;;  %v6885_v40 = vld [vmem:[%s9146_s12 + $0x320] ss:$28 sps:$4 sm:$0xff]   ;;  %v6888_v41 = vld [vmem:[%s9146_s12 + $0x4e8] ss:$28 sps:$4 sm:$0xff]  }
 0x600   :  { %5019 = vmatprep.subr.bf16.mxu0 %v6823_v43  ;;  %5944 = vmatprep.subr.bf16.mxu1 %v6824_v44  ;;  %v6889_v43 = vld [vmem:[%s9146_s12 + $0x358] ss:$28 sps:$4 sm:$0xff]   ;;  %v6892_v44 = vld [vmem:[%s9146_s12 + $0x520] ss:$28 sps:$4 sm:$0xff]  }
 0x602   :  { %4929 = vmatmul.mubr.bf16.vlgmr.msra.gmra.mrb[16].mxu0 %v8843_v46  ;;  %5011 = vmatmul.mubr.bf16.vlgmr.msra.gmra.mrb[28].mxu1 %v8843_v46 }
 0x603   :  { %5020 = vmatpush1.bf16.msra.mxu0 %v6821_v45  ;;  %5051 = vmatprep.mubr.bf16.mxu0 %v8715_v61  ;;  %v6895_v45 = vld [vmem:[%s9146_s12 + $0x394] ss:$28 sps:$4 sm:$0xff]  }
 0x604   :  { %5945 = vmatpush3.bf16.msra.mxu1 %v6825_v47  ;;  %5133 = vmatprep.mubr.bf16.mxu1 %v8715_v61  ;;  %v6843_v61 = vld [vmem:[%s9146_s12 + $0xf4] ss:$28 sps:$4 sm:$0xff]  }
 0x605   :  { %5021 = vmatprep.subr.bf16.mxu0 %v6828_v48  ;;  %5946 = vmatprep.subr.bf16.mxu1 %v6829_v50  ;;  %v6893_v47 = vld [vmem:[%s9146_s12 + $0x390] ss:$28 sps:$4 sm:$0xff]   ;;  %v6896_v48 = vld [vmem:[%s9146_s12 + $0x558] ss:$28 sps:$4 sm:$0xff]  }
 0x606   :  { %v6899_v50 = vld [vmem:[%s9146_s12 + $0x3cc] ss:$28 sps:$4 sm:$0xff]  }
 0x607   :  { %5022 = vmatpush1.bf16.msra.mxu0 %v6826_v52  ;;  %v6897_v52 = vld [vmem:[%s9146_s12 + $0x3c8] ss:$28 sps:$4 sm:$0xff]  }
 0x608   :  { %5947 = vmatpush3.bf16.msra.mxu1 %v6830_v53  ;;  %5023 = vmatprep.subr.bf16.mxu0 %v6833_v23  ;;  %v6902_v53 = vld [vmem:[%s9146_s12 + $0x404] ss:$28 sps:$4 sm:$0xff]   ;;  %v6908_v23 = vld [vmem:[%s9146_s12 + $0x474] ss:$28 sps:$4 sm:$0xff]  }
 0x609   :  { %5948 = vmatprep.subr.bf16.mxu1 %v6834_v54  ;;  %v6906_v54 = vld [vmem:[%s9146_s12 + $0x470] ss:$28 sps:$4 sm:$0xff]  }
 0x60b   :  { %5024 = vmatpush1.bf16.msra.mxu0 %v6831_v55  ;;  %v6911_v55 = vld [vmem:[%s9146_s12 + $0x4ac] ss:$28 sps:$4 sm:$0xff]  }
 0x60c   :  { %5949 = vmatpush3.bf16.msra.mxu1 %v6835_v56  ;;  %5025 = vmatprep.subr.bf16.mxu0 %v6838_v57  ;;  %v6909_v56 = vld [vmem:[%s9146_s12 + $0x4a8] ss:$28 sps:$4 sm:$0xff]  }
 0x60d   :  { %5950 = vmatprep.subr.bf16.mxu1 %v6839_v58  ;;  %v6914_v57 = vld [vmem:[%s9146_s12 + $0x4e4] ss:$28 sps:$4 sm:$0xff]  }
 0x60e   :  { %v6912_v58 = vld [vmem:[%s9146_s12 + $0x4e0] ss:$28 sps:$4 sm:$0xff]  }
 0x60f   :  { %5026 = vmatpush1.bf16.msra.mxu0 %v6836_v59  ;;  %v6917_v59 = vld [vmem:[%s9146_s12 + $0x51c] ss:$28 sps:$4 sm:$0xff]  }
 0x610   :  { %5951 = vmatpush3.bf16.msra.mxu1 %v6840_v60  ;;  %5027 = vmatprep.subr.bf16.mxu0 %v6843_v61  ;;  %v6915_v60 = vld [vmem:[%s9146_s12 + $0x518] ss:$28 sps:$4 sm:$0xff]  }
 0x611   :  { %5952 = vmatprep.subr.bf16.mxu1 %v6844_v62  ;;  %v6920_v61 = vld [vmem:[%s9146_s12 + $0x554] ss:$28 sps:$4 sm:$0xff]  }
 0x612   :  { %v6918_v62 = vld [vmem:[%s9146_s12 + $0x550] ss:$28 sps:$4 sm:$0xff]  }
 0x613   :  { %5028 = vmatpush1.bf16.msra.mxu0 %v6841_v27 }
 0x614   :  { %5953 = vmatpush3.bf16.msra.mxu1 %v6845_v0  ;;  %5029 = vmatprep.subr.bf16.mxu0 %v6848_v2 }
 0x615   :  { %5954 = vmatprep.subr.bf16.mxu1 %v6849_v1 }
 0x617   :  { %5030 = vmatpush1.bf16.msra.mxu0 %v6846_v5 }
 0x618   :  { %5955 = vmatpush3.bf16.msra.mxu1 %v6850_v7  ;;  %5031 = vmatprep.subr.bf16.mxu0 %v6853_v8 }
 0x619   :  { %5956 = vmatprep.subr.bf16.mxu1 %v6854_v9 }
 0x61b   :  { %5032 = vmatpush1.bf16.msra.mxu0 %v6851_v10 }
 0x61c   :  { %5957 = vmatpush3.bf16.msra.mxu1 %v6855_v11  ;;  %5033 = vmatprep.subr.bf16.mxu0 %v6858_v12 }
 0x61d   :  { %5958 = vmatprep.subr.bf16.mxu1 %v6859_v13 }
 0x61f   :  { %5034 = vmatpush1.bf16.msra.mxu0 %v6856_v16 }
 0x620   :  { %5959 = vmatpush3.bf16.msra.mxu1 %v6860_v18  ;;  %5035 = vmatprep.subr.bf16.mxu0 %v6863_v21 }
 0x621   :  { %5141 = vmatprep.subr.bf16.mxu1 %v6993_v3 }
 0x623   :  { %5134 = vmatmul.mubr.bf16.vlgmr.msra.gmra.mrb[32].mxu1 %v8723_v63  ;;  %5036 = vmatpush1.bf16.msra.mxu0 %v6861_v22 }
 0x624   :  { %5142 = vmatpush1.bf16.msra.mxu1 %v6864_v19  ;;  %5918 = vmatprep.mubr.msk.bf16.mxu1 %vm1307_vm0, %v8733_v4 }
 0x625   :  { %5037 = vmatprep.subr.bf16.mxu0 %v6867_v24  ;;  %5143 = vmatprep.subr.bf16.mxu1 %v6993_v3 }
 0x627   :  { %5038 = vmatpush1.bf16.msra.mxu0 %v6865_v25 }
 0x628   :  { %5144 = vmatpush1.bf16.msra.mxu1 %v6868_v26  ;;  %5039 = vmatprep.subr.bf16.mxu0 %v6871_v28 }
 0x629   :  { %5145 = vmatprep.subr.bf16.mxu1 %v6993_v3 }
 0x62b   :  { %5040 = vmatpush1.bf16.msra.mxu0 %v6869_v29 }
 0x62c   :  { %5146 = vmatpush1.bf16.msra.mxu1 %v6872_v30  ;;  %5041 = vmatprep.subr.bf16.mxu0 %v6875_v20 }
 0x62d   :  { %5147 = vmatprep.subr.bf16.mxu1 %v6993_v3 }
 0x62f   :  { %5042 = vmatpush1.bf16.msra.mxu0 %v6873_v31 }
 0x630   :  { %5148 = vmatpush1.bf16.msra.mxu1 %v6876_v32  ;;  %5043 = vmatprep.subr.bf16.mxu0 %v6879_v33 }
 0x631   :  { %5149 = vmatprep.subr.bf16.mxu1 %v6993_v3 }
 0x633   :  { %5044 = vmatpush1.bf16.msra.mxu0 %v6877_v17 }
 0x634   :  { %5150 = vmatpush1.bf16.msra.mxu1 %v6880_v35  ;;  %5045 = vmatprep.subr.bf16.mxu0 %v6883_v36 }
 0x635   :  { %5151 = vmatprep.subr.bf16.mxu1 %v6993_v3 }
 0x637   :  { %5046 = vmatpush1.bf16.msra.mxu0 %v6881_v37 }
 0x638   :  { %5152 = vmatpush1.bf16.msra.mxu1 %v6884_v38  ;;  %5047 = vmatprep.subr.bf16.mxu0 %v6887_v39 }
 0x639   :  { %5153 = vmatprep.subr.bf16.mxu1 %v6993_v3 }
 0x63b   :  { %5048 = vmatpush1.bf16.msra.mxu0 %v6885_v40 }
 0x63c   :  { %5154 = vmatpush1.bf16.msra.mxu1 %v6888_v41  ;;  %5049 = vmatprep.subr.bf16.mxu0 %v6891_v42 }
 0x63d   :  { %5155 = vmatprep.subr.bf16.mxu1 %v6993_v3 }
 0x63f   :  { %5050 = vmatpush1.bf16.msra.mxu0 %v6889_v43 }
 0x640   :  { %5156 = vmatpush1.bf16.msra.mxu1 %v6892_v44  ;;  %5060 = vmatprep.subr.bf16.mxu0 %v6895_v45 }
 0x641   :  { %5157 = vmatprep.subr.bf16.mxu1 %v6993_v3  ;;  %v6900_v3 = vld [vmem:[%s9146_s12 + $0x400] ss:$28 sps:$4 sm:$0xff]  }
 0x642   :  { %5052 = vmatmul.mubr.bf16.vlgmr.msra.gmra.mrb[20].mxu0 %v8723_v63  ;;  %v6905_v63 = vld [vmem:[%s9146_s12 + $0x43c] ss:$28 sps:$4 sm:$0xff]  }
 0x643   :  { %5061 = vmatpush1.bf16.msra.mxu0 %v6893_v47  ;;  %5917 = vmatprep.mubr.msk.bf16.mxu0 %vm1307_vm0, %v8733_v4  ;;  %v6903_v4 = vld [vmem:[%s9146_s12 + $0x438] ss:$28 sps:$4 sm:$0xff]  }
 0x644   :  { %5158 = vmatpush1.bf16.msra.mxu1 %v6896_v48  ;;  %5062 = vmatprep.subr.bf16.mxu0 %v6899_v50 }
 0x647   :  { %5174 = vmatmul.mubr.bf16.vlgmr.msra.gmra.mrb[36].mxu1 %v8843_v46  ;;  %5063 = vmatpush1.bf16.msra.mxu0 %v6897_v52 }
 0x648   :  { %5064 = vmatprep.subr.bf16.mxu0 %v6902_v53 }
 0x64b   :  { %5065 = vmatpush1.bf16.msra.mxu0 %v6900_v3 }
 0x64c   :  { %5066 = vmatprep.subr.bf16.mxu0 %v6905_v63 }
 0x64f   :  { %5067 = vmatpush1.bf16.msra.mxu0 %v6903_v4 }
 0x650   :  { %5068 = vmatprep.subr.bf16.mxu0 %v6908_v23 }
 0x653   :  { %5069 = vmatpush1.bf16.msra.mxu0 %v6906_v54 }
 0x654   :  { %5070 = vmatprep.subr.bf16.mxu0 %v6911_v55 }
 0x657   :  { %5071 = vmatpush1.bf16.msra.mxu0 %v6909_v56 }
 0x658   :  { %5072 = vmatprep.subr.bf16.mxu0 %v6914_v57 }
 0x65b   :  { %5073 = vmatpush1.bf16.msra.mxu0 %v6912_v58 }
 0x65c   :  { %5074 = vmatprep.subr.bf16.mxu0 %v6917_v59 }
 0x65f   :  { %5075 = vmatpush1.bf16.msra.mxu0 %v6915_v60 }
 0x660   :  { %5076 = vmatprep.subr.bf16.mxu0 %v6920_v61 }
 0x663   :  { %5077 = vmatpush1.bf16.msra.mxu0 %v6918_v62 }
 0x666   :  { %5093 = vmatmul.mubr.bf16.vlgmr.msra.gmra.mrb[20].mxu0 %v8843_v46 }
 0x667   :  { %6934 = shalt.err (!%p6931_p4)
}
 0x668   :  { %s6935_s12 = scalar_lea.hbm %s9149_s15, 32 }
 0x669   :  { %p6936_p5 = scmp.ne.s32.totalorder %s9149_s15, %s6935_s12  ;;  %p6939_p6 = scmp.lt.u32.totalorder %s6935_s12, %s9149_s15 }
 0x66b   :  { %p6941_p7 = pnand %p6939_p6, %p6936_p5 }
 0x66d   :  { %6944 = shalt.err (!%p6941_p7)
}
 0x66e   :  { %5277 = dma.vmem_to_hbm [thread:$0]  %s5275_s19, 32, %s9149_s15, [#allocation5]  }
 0x66f   :  { %s6945_s9 = scalar_lea.vmem %s5265_s20, 32  ;;  %p6950_p9 = scmp.lt.s32.totalorder %s5265_s20, %s5265_s20 }
 0x670   :  { %p6946_p8 = scmp.ne.s32.totalorder %s5265_s20, %s6945_s9  ;;  %p6951_p10 = scmp.lt.s32.totalorder %s6945_s9, %s6945_s9 }
 0x672   :  { %p6952_p11 = por %p6951_p10, %p6950_p9 }
 0x674   :  { %p6953_p12 = pnand %p6952_p11, %p6946_p8 }
 0x676   :  { %6956 = shalt.err (!%p6953_p12)
}
 0x677   :  { %s6957_s11 = scalar_lea.hbm %s9148_s14, 32 }
 0x678   :  { %p6958_p13 = scmp.ne.s32.totalorder %s9148_s14, %s6957_s11  ;;  %p6961_p0 = scmp.lt.u32.totalorder %s6957_s11, %s9148_s14 }
 0x67a   :  { %p6963_p1 = pnand %p6961_p0, %p6958_p13 }
 0x67c   :  { %6966 = shalt.err (!%p6963_p1)
}
 0x67d   :  { %5267 = dma.vmem_to_hbm [thread:$0]  %s5265_s20, 32, %s9148_s14, [#allocation3]   ;;  %v3915_v46 = vld [vmem:[%s9147_s13] sm:$0x7f]  ;;  %v3943_v30 = vsub.s32 6, %v7098_v6  ;;  %v3935_v37 = vsub.s32 4, %v7098_v6 }
 0x67e   :  { %v3920_v27 = vrot.slane %v3915_v46, %v7926_v49  ;;  %v3928_v0 = vrot.slane %v3915_v46, %v8014_v34  ;;  %v3924_v2 = vrot.slane %v3915_v46, %v7934_v51  ;;  %v3932_v1 = vrot.slane %v3915_v46, %v7979_v14  ;;  %s6999_s13 = smov [#allocation6]  }
 0x67f   :  { %v3944_v20 = vrot.slane %v3915_v46, %v3943_v30  ;;  %vm5244_vm5 = vcmask 1040384   ;;  %vm5245_vm6 = vcmask 1041409   ;;  %v3939_v38 = vsub.s32 5, %v7098_v6  ;;  %s5284_s14 = sshll.u32 %s6999_s13, 4  ;;  %s5285_s14 = int_to_ptr.vmem [resolvable:$true] %s5284_s14 }
 0x680   :  { %vm5246_vm7 = vmor %vm5245_vm6, %vm5244_vm5  ;;  %vm5247_vm8 = vcmask 1042434   ;;  %v3936_v39 = vrot.slane %v3915_v46, %v3935_v37  ;;  %vm5249_vm10 = vcmask 1043459   ;;  %vm5251_vm12 = vcmask 1044484   ;;  %s6967_s5 = scalar_lea.vmem %s5285_s14, 112  ;;  %s6971_s6 = scalar_lea.vmem %s5285_s14, 128 }
 0x681   :  { %v3940_v40 = vrot.slane %v3915_v46, %v3939_v38  ;;  %vm5248_vm9 = vmor %vm5247_vm8, %vm5246_vm7  ;;  %vm5253_vm14 = vcmask 1045509   ;;  %vm5255_vm0 = vcmask 129030   ;;  %p6968_p2 = scmp.ne.s32.totalorder %s5285_s14, %s6967_s5  ;;  %p6972_p3 = scmp.lt.s32.totalorder %s5285_s14, %s5285_s14 }
 0x682   :  { %vm5250_vm11 = vmor %vm5249_vm10, %vm5248_vm9  ;;  %p6973_p4 = scmp.lt.s32.totalorder %s6971_s6, %s6967_s5 }
 0x683   :  { %vm5252_vm13 = vmor %vm5251_vm12, %vm5250_vm11 }
 0x684   :  { %vm5254_vm15 = vmor %vm5253_vm14, %vm5252_vm13  ;;  %p6974_p5 = por %p6973_p4, %p6972_p3 }
 0x685   :  { %vm5256_vm1 = vmor %vm5255_vm0, %vm5254_vm15 }
 0x686   :  { %p6975_p6 = pnand %p6974_p5, %p6968_p2 }
 0x6d5   :  { %v4930_v5 = vpop.f32.mrb[16].mxu0  ;;  %v5012_v7 = vpop.f32.mrb[28].mxu1 }
 0x6d6   :  { %v5980_v8 = vadd.f32 %v4930_v5, %v3920_v27  ;;  %v5982_v9 = vadd.f32 %v5012_v7, %v3928_v0  ;;  %v4932_v10 = vpop.f32.mrb[17].mxu0  ;;  %v5014_v11 = vpop.f32.mrb[29].mxu1 }
 0x6d7   :  { %v5981_v12 = vadd.f32 %v4932_v10, %v3924_v2  ;;  %v5983_v13 = vadd.f32 %v5014_v11, %v3932_v1  ;;  %v4934_v16 = vpop.f32.mrb[18].mxu0  ;;  %v5016_v18 = vpop.f32.mrb[30].mxu1 }
 0x6d8   :  { %v4935_v21 = vpop.f32.mrb[19].mxu0  ;;  %v5017_v22 = vpop.f32.mrb[31].mxu1 }
 0x6d9   :  { %v5919_v19 = vpack.c.bf16 %v5981_v12, %v5980_v8  ;;  %v5920_v49 = vpack.c.bf16 %v5983_v13, %v5982_v9 }
 0x6db   :  { %v5204_v34 = vrot.slane %v5919_v19, %v7116_v15  ;;  %v5211_v51 = vrot.slane %v5920_v49, %v7116_v15 }
 0x6dd   :  { %v5226_v24 = vcombine.low %v5204_v34, %v5211_v51 }
 0x6df   :  { %v5234_v3 = vrot.slane %v5226_v24, %v7116_v15 }
 0x6f6   :  { %v5960_v14 = vpop.f32.mrb[32].mxu1 }
 0x6f7   :  { %v5961_v25 = vpop.f32.mrb[33].mxu1 }
 0x6f8   :  { %v5962_v26 = vadd.f32 %v5961_v25, %v5960_v14  ;;  %v5963_v28 = vpop.f32.mrb[34].mxu1 }
 0x6f9   :  { %v5964_v29 = vpop.f32.mrb[35].mxu1 }
 0x6fa   :  { %v5136_v31 = vadd.f32 %v5962_v26, %v3944_v20 }
 0x71a   :  { %v5175_v32 = vpop.f32.mrb[36].mxu1 }
 0x71b   :  { %v5176_v33 = vadd.f32 %v5175_v32, %v5136_v31  ;;  %v5177_v17 = vpop.f32.mrb[37].mxu1 }
 0x71c   :  { %v5178_v35 = vpop.f32.mrb[38].mxu1 }
 0x71d   :  { %v5179_v36 = vpop.f32.mrb[39].mxu1  ;;  %v5187_v44 = vpack.c.bf16 %v5176_v33, %v5176_v33 }
 0x71f   :  { %v5225_v6 = vrot.slane %v5187_v44, %v7116_v15 }
 0x739   :  { %v5094_v41 = vpop.f32.mrb[20].mxu0 }
 0x73a   :  { %v5984_v42 = vadd.f32 %v5094_v41, %v3936_v39  ;;  %v5096_v43 = vpop.f32.mrb[21].mxu0 }
 0x73b   :  { %v5985_v45 = vadd.f32 %v5096_v43, %v3940_v40  ;;  %v5098_v47 = vpop.f32.mrb[22].mxu0 }
 0x73c   :  { %v5099_v48 = vpop.f32.mrb[23].mxu0 }
 0x73d   :  { %v5921_v50 = vpack.c.bf16 %v5985_v45, %v5984_v42 }
 0x73f   :  { %v5218_v52 = vrot.slane %v5921_v50, %v7116_v15 }
 0x741   :  { %v5227_v53 = vcombine.low %v5218_v52, %v5225_v6 }
 0x743   :  { %v5241_v63 = vrot.slane %v5227_v53, %v7116_v15 }
 0x745   :  { %v5242_v4 = vcombine.low %v5234_v3, %v5241_v63 }
 0x747   :  { %5257 = vst.msk [vmem:[#allocation6] sm:$0x7f] %vm5256_vm1, %v5242_v4 }
 0x748   :  { %6978 = shalt.err (!%p6975_p6)
}
 0x749   :  { %s6979_s2 = scalar_lea.hbm %s9150_s16, 112 }
 0x74a   :  { %p6980_p7 = scmp.ne.s32.totalorder %s9150_s16, %s6979_s2  ;;  %p6983_p8 = scmp.lt.u32.totalorder %s6979_s2, %s9150_s16 }
 0x74c   :  { %p6985_p9 = pnand %p6983_p8, %p6980_p7 }
 0x74e   :  { %6988 = shalt.err (!%p6985_p9)
}
 0x74f   :  { %5287 = dma.vmem_to_hbm [thread:$0]  %s5285_s14, 112, %s9150_s16, [#allocation5]  }
 0x750   :  { %6989 = dma.done.wait [#allocation3], 32  }
 0x751   :  { %6990 = vsyncadd [#allocation3], 4294967264 }
 0x752   :  { %6991 = dma.done.wait [#allocation5], 144  }
 0x753   :  { %6992 = vsyncadd [#allocation5], 4294967152 }
 0x754   :  { %5297 = vsyncpa [#allocation3], 1 }
 0x755   :  { %5298 = vsyncpa [#allocation5], 1 }

</bundles_post_ra>
